<compile_context>
chip_gen: v7x
topology: tpu7x:2x2x1
jax: 0.10.0
libtpu: 0.0.40
codegen_flags: <defaults>
</compile_context>

<pallas_src>
import jax
import jax.numpy as jnp
from jax.experimental import pallas as pl
from jax.experimental.pallas import tpu as pltpu


_IN_FEATURES = 3 * 32 * 32      # 3072
_HIDDEN = 256
_N_OUTPUTS = 10
_PAD_OUT = 128                  # lane-dense padded classifier width
_MAX_TM = 512                   # safe on v5e (16 MiB scoped), v6e, v7x


def _round_up(x, m):
    return (x + m - 1) // m * m


# ----------------------------------------------------------------------------
# Pallas kernel: fused  cast -> fc1(int8 W, dequant) -> ReLU -> fc2
# ----------------------------------------------------------------------------

def mlp_fused_kernel(x_ref, w1q_ref, s1_ref, b1_ref, w2_ref, b2_ref, o_ref):
    """(TM, 3072) f32 -> bf16 @ dequant(int8 W1) + b1 -> ReLU -> @ W2(256,128) + b2."""
    # In-kernel activation cast (review item 1).
    x_bf16 = x_ref[...].astype(jnp.bfloat16)

    # Dequantize int8 W1 with per-output-channel scales, then bf16 MXU matmul.
    w1 = (w1q_ref[...].astype(jnp.float32) * s1_ref[...]).astype(jnp.bfloat16)
    h = jnp.dot(x_bf16, w1, preferred_element_type=jnp.float32)
    h = jnp.maximum(h + b1_ref[...], 0.0)                      # f32 epilogue

    o_ref[...] = (
        jnp.dot(h.astype(jnp.bfloat16), w2_ref[...],
                preferred_element_type=jnp.float32)
        + b2_ref[...]
    )


# ----------------------------------------------------------------------------
# Wrapper
# ----------------------------------------------------------------------------

@jax.jit
def mlp_forward(x_nchw, params):
    """Mirrors MLPNet.forward: flatten (C,H,W order), fc1+ReLU, fc2, return (x, x)."""
    w1_q, s1, b1, w2_pad, b2_pad = params

    n = x_nchw.shape[0]
    # PyTorch x.view(-1, 3*32*32) on an NCHW tensor == row-major reshape. Keep f32.
    x_flat = x_nchw.reshape(n, _IN_FEATURES)

    # Pad batch to a multiple of 8 (sublane-dense) and pick the M tile.
    tm = min(_MAX_TM, _round_up(n, 8))
    n_pad = _round_up(n, tm)
    if n_pad != n:
        x_flat = jnp.pad(x_flat, ((0, n_pad - n), (0, 0)))

    grid = (n_pad // tm,)

    flops = 2 * n_pad * (_IN_FEATURES * _HIDDEN + _HIDDEN * _PAD_OUT)
    bytes_accessed = (
        n_pad * _IN_FEATURES * 4            # x  (f32 in)
        + _IN_FEATURES * _HIDDEN * 1        # W1 (int8)
        + _HIDDEN * 4 * 2                   # s1 + b1
        + _HIDDEN * _PAD_OUT * 2            # W2 (bf16)
        + _PAD_OUT * 4                      # b2
        + n_pad * _PAD_OUT * 4              # out (f32)
    )

    out_pad = pl.pallas_call(
        mlp_fused_kernel,
        out_shape=jax.ShapeDtypeStruct((n_pad, _PAD_OUT), jnp.float32),
        grid_spec=pltpu.PrefetchScalarGridSpec(
            num_scalar_prefetch=0,
            grid=grid,
            in_specs=[
                # Streamed activation tile.
                pl.BlockSpec((tm, _IN_FEATURES), lambda i: (i, 0)),
                # Weights / biases: constant block index -> DMA'd once, VMEM-resident.
                pl.BlockSpec((_IN_FEATURES, _HIDDEN), lambda i: (0, 0)),
                pl.BlockSpec((1, _HIDDEN), lambda i: (0, 0)),
                pl.BlockSpec((1, _HIDDEN), lambda i: (0, 0)),
                pl.BlockSpec((_HIDDEN, _PAD_OUT), lambda i: (0, 0)),
                pl.BlockSpec((1, _PAD_OUT), lambda i: (0, 0)),
            ],
            out_specs=pl.BlockSpec((tm, _PAD_OUT), lambda i: (i, 0)),
        ),
        compiler_params=pltpu.CompilerParams(
            dimension_semantics=("parallel",),   # lets v7x use both TensorCores
        ),
        cost_estimate=pl.CostEstimate(
            flops=flops, transcendentals=0, bytes_accessed=bytes_accessed),
    )(x_flat, w1_q, s1, b1.reshape(1, _HIDDEN), w2_pad, b2_pad.reshape(1, _PAD_OUT))

    logits = out_pad[:n, :_N_OUTPUTS]   # drop padded rows + zero-padded lanes
    return logits, logits


# ----------------------------------------------------------------------------
# Parameters (deterministic synthetic init, PyTorch Linear layout transposed)
# ----------------------------------------------------------------------------

def init_params(key):
    k1, k2, k3, k4 = jax.random.split(key, 4)

    # fc1: PyTorch weight (256, 3072) -> stored transposed (3072, 256).
    w1 = (jax.random.normal(k1, (_IN_FEATURES, _HIDDEN), jnp.float32)
          * (1.0 / _IN_FEATURES) ** 0.5)
    # Per-output-channel symmetric int8 quantization for storage/DMA.
    absmax = jnp.maximum(jnp.max(jnp.abs(w1), axis=0, keepdims=True), 1e-8)
    s1 = (absmax / 127.0).astype(jnp.float32)                    # (1, 256)
    w1_q = jnp.clip(jnp.round(w1 / s1), -127, 127).astype(jnp.int8)

    b1 = jax.random.normal(k2, (_HIDDEN,), jnp.float32) * 0.05

    # fc2: PyTorch weight (10, 256) -> transposed (256, 10), zero-padded to 128 lanes.
    w2 = (jax.random.normal(k3, (_HIDDEN, _N_OUTPUTS), jnp.float32)
          * (1.0 / _HIDDEN) ** 0.5)
    w2_pad = jnp.zeros((_HIDDEN, _PAD_OUT), jnp.float32).at[:, :_N_OUTPUTS].set(w2)
    w2_pad = w2_pad.astype(jnp.bfloat16)

    b2 = jax.random.normal(k4, (_N_OUTPUTS,), jnp.float32) * 0.05
    b2_pad = jnp.zeros((_PAD_OUT,), jnp.float32).at[:_N_OUTPUTS].set(b2)

    return (w1_q, s1, b1, w2_pad, b2_pad)


def reference_forward(x_nchw, params):
    """Pure-JAX f32 reference (dequantized weights) for a sanity check."""
    w1_q, s1, b1, w2_pad, b2_pad = params
    w1 = w1_q.astype(jnp.float32) * s1
    x = x_nchw.reshape(x_nchw.shape[0], _IN_FEATURES)
    h = jnp.maximum(x @ w1 + b1, 0.0)
    out = h @ w2_pad.astype(jnp.float32) + b2_pad
    return out[:, :_N_OUTPUTS]


# ----------------------------------------------------------------------------
# Main
# ----------------------------------------------------------------------------

if __name__ == "__main__":
    key = jax.random.PRNGKey(0)
    k_params, k_x = jax.random.split(key)
    params = init_params(k_params)

    # fc1 expects 3*32*32 input features -> CIFAR-shaped input, small batch.
    x = jax.random.normal(k_x, (2, 3, 32, 32), jnp.float32)

    logit, logit2 = mlp_forward(x, params)
    jax.block_until_ready((logit, logit2))

    assert logit.shape == (2, _N_OUTPUTS), logit.shape
    assert jnp.allclose(logit, logit2)
    assert bool(jnp.all(jnp.isfinite(logit)))

    # bf16 MXU + int8 W1 storage => loose tolerance vs the f32 reference.
    ref = reference_forward(x, params)
    assert bool(jnp.allclose(logit, ref, rtol=1e-1, atol=1e-1)), (
        float(jnp.max(jnp.abs(logit - ref))))

    print("KERNEL_OK")
</pallas_src>

<mosaic_0001>
module attributes {stable_mosaic.version = 11 : i64} {
  func.func @mlp_fused_kernel(%arg0: i32, %arg1: memref<8x3072xf32, #tpu.memory_space<vmem>>, %arg2: memref<3072x256xi8, #tpu.memory_space<vmem>>, %arg3: memref<1x256xf32, #tpu.memory_space<vmem>>, %arg4: memref<1x256xf32, #tpu.memory_space<vmem>>, %arg5: memref<256x128xbf16, #tpu.memory_space<vmem>>, %arg6: memref<1x128xf32, #tpu.memory_space<vmem>>, %arg7: memref<8x128xf32, #tpu.memory_space<vmem>>) attributes {dimension_semantics = [#tpu.dimension_semantics<parallel>], iteration_bounds = array<i64: 1>, scalar_prefetch = 0 : i64, scratch_operands = 0 : i64, tpu.core_type = #tpu.core_type<tc>, window_params = [{transform_indices = @transform_0, window_bounds = array<i64: 8, 3072>}, {pipeline_mode = #tpu.pipeline_mode<synchronous>, transform_indices = @transform_1, window_bounds = array<i64: 3072, 256>}, {pipeline_mode = #tpu.pipeline_mode<synchronous>, transform_indices = @transform_2, window_bounds = array<i64: 1, 256>}, {pipeline_mode = #tpu.pipeline_mode<synchronous>, transform_indices = @transform_3, window_bounds = array<i64: 1, 256>}, {pipeline_mode = #tpu.pipeline_mode<synchronous>, transform_indices = @transform_4, window_bounds = array<i64: 256, 128>}, {pipeline_mode = #tpu.pipeline_mode<synchronous>, transform_indices = @transform_5, window_bounds = array<i64: 1, 128>}, {transform_indices = @transform_6, window_bounds = array<i64: 8, 128>}]} {
    %c0 = arith.constant 0 : index
    %c0_0 = arith.constant 0 : index
    %0 = vector.load %arg1[%c0, %c0_0] : memref<8x3072xf32, #tpu.memory_space<vmem>>, vector<8x3072xf32>
    %1 = arith.truncf %0 : vector<8x3072xf32> to vector<8x3072xbf16>
    %c0_1 = arith.constant 0 : index
    %c0_2 = arith.constant 0 : index
    %2 = vector.load %arg2[%c0_1, %c0_2] : memref<3072x256xi8, #tpu.memory_space<vmem>>, vector<3072x256xi8>
    %3 = arith.sitofp %2 : vector<3072x256xi8> to vector<3072x256xf32>
    %c0_3 = arith.constant 0 : index
    %c0_4 = arith.constant 0 : index
    %4 = vector.load %arg3[%c0_3, %c0_4] : memref<1x256xf32, #tpu.memory_space<vmem>>, vector<1x256xf32>
    %5 = vector.broadcast %4 : vector<1x256xf32> to vector<3072x256xf32>
    %6 = arith.mulf %3, %5 : vector<3072x256xf32>
    %7 = arith.truncf %6 : vector<3072x256xf32> to vector<3072x256xbf16>
    %cst = arith.constant dense<0.000000e+00> : vector<8x256xf32>
    %8 = tpu.matmul %1, %7, %cst {dimension_numbers = #tpu.dot_dimension_numbers<[1], [0], [0], [1], [0, 0, 1, 1], [], []>} : vector<8x3072xbf16>, vector<3072x256xbf16>, vector<8x256xf32> -> vector<8x256xf32>
    %c0_5 = arith.constant 0 : index
    %c0_6 = arith.constant 0 : index
    %9 = vector.load %arg4[%c0_5, %c0_6] : memref<1x256xf32, #tpu.memory_space<vmem>>, vector<1x256xf32>
    %10 = vector.broadcast %9 : vector<1x256xf32> to vector<8x256xf32>
    %11 = arith.addf %8, %10 : vector<8x256xf32>
    %cst_7 = arith.constant 0.000000e+00 : f32
    %12 = vector.broadcast %cst_7 : f32 to vector<8x256xf32>
    %13 = arith.maximumf %11, %12 : vector<8x256xf32>
    %14 = arith.truncf %13 : vector<8x256xf32> to vector<8x256xbf16>
    %c0_8 = arith.constant 0 : index
    %c0_9 = arith.constant 0 : index
    %15 = vector.load %arg5[%c0_8, %c0_9] : memref<256x128xbf16, #tpu.memory_space<vmem>>, vector<256x128xbf16>
    %cst_10 = arith.constant dense<0.000000e+00> : vector<8x128xf32>
    %16 = tpu.matmul %14, %15, %cst_10 {dimension_numbers = #tpu.dot_dimension_numbers<[1], [0], [0], [1], [0, 0, 1, 1], [], []>} : vector<8x256xbf16>, vector<256x128xbf16>, vector<8x128xf32> -> vector<8x128xf32>
    %c0_11 = arith.constant 0 : index
    %c0_12 = arith.constant 0 : index
    %17 = vector.load %arg6[%c0_11, %c0_12] : memref<1x128xf32, #tpu.memory_space<vmem>>, vector<1x128xf32>
    %18 = vector.broadcast %17 : vector<1x128xf32> to vector<8x128xf32>
    %19 = arith.addf %16, %18 : vector<8x128xf32>
    %c0_13 = arith.constant 0 : index
    %c0_14 = arith.constant 0 : index
    %20 = vector.load %arg7[%c0_13, %c0_14] : memref<8x128xf32, #tpu.memory_space<vmem>>, vector<8x128xf32>
    tpu.vector_store %arg7[%c0_13, %c0_14], %19 {strides = array<i32>} : memref<8x128xf32, #tpu.memory_space<vmem>>, vector<8x128xf32>,
    return
  }
  func.func @transform_0(%arg0: i32) -> (i32, i32) {
    %c0_i32 = arith.constant 0 : i32
    %c0_i32_0 = arith.constant 0 : i32
    return %arg0, %c0_i32 : i32, i32
  }
  func.func @transform_1(%arg0: i32) -> (i32, i32) {
    %c0_i32 = arith.constant 0 : i32
    %c0_i32_0 = arith.constant 0 : i32
    %c0_i32_1 = arith.constant 0 : i32
    return %c0_i32, %c0_i32_0 : i32, i32
  }
  func.func @transform_2(%arg0: i32) -> (i32, i32) {
    %c0_i32 = arith.constant 0 : i32
    %c0_i32_0 = arith.constant 0 : i32
    %c0_i32_1 = arith.constant 0 : i32
    return %c0_i32, %c0_i32_0 : i32, i32
  }
  func.func @transform_3(%arg0: i32) -> (i32, i32) {
    %c0_i32 = arith.constant 0 : i32
    %c0_i32_0 = arith.constant 0 : i32
    %c0_i32_1 = arith.constant 0 : i32
    return %c0_i32, %c0_i32_0 : i32, i32
  }
  func.func @transform_4(%arg0: i32) -> (i32, i32) {
    %c0_i32 = arith.constant 0 : i32
    %c0_i32_0 = arith.constant 0 : i32
    %c0_i32_1 = arith.constant 0 : i32
    return %c0_i32, %c0_i32_0 : i32, i32
  }
  func.func @transform_5(%arg0: i32) -> (i32, i32) {
    %c0_i32 = arith.constant 0 : i32
    %c0_i32_0 = arith.constant 0 : i32
    %c0_i32_1 = arith.constant 0 : i32
    return %c0_i32, %c0_i32_0 : i32, i32
  }
  func.func @transform_6(%arg0: i32) -> (i32, i32) {
    %c0_i32 = arith.constant 0 : i32
    %c0_i32_0 = arith.constant 0 : i32
    return %arg0, %c0_i32 : i32, i32
  }
}

</mosaic_0001>

<bundles_post_ra>
// kernel: mlp_forward.1
= control target key start
LH: loop header
LB: loop body
LE: loop exit
PB: predicated region body
PF: predicated region fallthrough
CT: control target
= control target key end

     0   :  { %11 = vsyncpa [#allocation3], 0  ;;  %s3793_s21 = smov [#allocation2]   ;;  %s5035_s0 = inlined_call_operand.vmem [shape: f32[8,3072], index: 0, kind: input, shape index: {}]   ;;  %s5036_s1 = inlined_call_operand.hbm [shape: s8[3072,256], index: 1, kind: input, shape index: {}]   ;;  %s5037_s2 = inlined_call_operand.vmem [shape: f32[1,256], index: 2, kind: input, shape index: {}]   ;;  %s5038_s3 = inlined_call_operand.vmem [shape: f32[1,256], index: 3, kind: input, shape index: {}]   ;;  %s5039_s4 = inlined_call_operand.vmem [shape: bf16[256,128], index: 4, kind: input, shape index: {}]   ;;  %s5040_s5 = inlined_call_operand.vmem [shape: f32[1,128], index: 5, kind: input, shape index: {}]   ;;  %s5041_s6 = inlined_call_operand.vmem [shape: f32[8,128], index: 6, kind: output, shape index: {}]  }
   0x1   :  { %s19_s22 = sshll.u32 %s3793_s21, 4  ;;  %s3769_s25 = scalar_lea.hbm %s5036_s1, 24576  ;;  %s20_s22 = int_to_ptr.vmem [resolvable:$true] %s19_s22 }
   0x2   :  { %p3770_p0 = scmp.ne.s32.totalorder %s5036_s1, %s3769_s25  ;;  %p3773_p1 = scmp.lt.u32.totalorder %s3769_s25, %s5036_s1 }
   0x4   :  { %p3775_p2 = pnand %p3773_p1, %p3770_p0 }
   0x6   :  { %3778 = shalt.err (!%p3775_p2)
}
   0x7   :  { %s3779_s30 = scalar_lea.vmem %s20_s22, 24576  ;;  %p3784_p4 = scmp.lt.s32.totalorder %s20_s22, %s20_s22 }
   0x8   :  { %p3780_p3 = scmp.ne.s32.totalorder %s20_s22, %s3779_s30  ;;  %p3785_p5 = scmp.lt.s32.totalorder %s3779_s30, %s3779_s30 }
   0xa   :  { %p3786_p6 = por %p3785_p5, %p3784_p4 }
   0xc   :  { %p3787_p7 = pnand %p3786_p6, %p3780_p3 }
   0xe   :  { %3790 = shalt.err (!%p3787_p7)
}
   0xf   :  { %s3794_s7 = smov 256   ;;  %s3795_s8 = smov 16  }
  0x10   :  { %25 = dma.hbm_to_vmem [thread:$0]  %s5036_s1, 24576, %s20_s22, [#allocation3], %s3794_s7, %s3794_s7, %s3795_s8  }
  0x11   :  { %3791 = dma.done.wait [#allocation3], 24576  }
  0x12   :  { %3792 = vsyncadd [#allocation3], 4294942720  ;;  %v1816_v0 = vlaneseq  ;;  %v87_v4 = vld [vmem:[#allocation2 + $0x8] sm:$0xff]  ;;  %v1814_v5 = vld [vmem:[%s5037_s2] sm:$0x3] }
  0x13   :  { %v183_v6 = vld [vmem:[#allocation2 + $0x308] sm:$0xff]  ;;  %v279_v7 = vunpack.c.0.s8 %v87_v4  ;;  %v281_v8 = vunpack.c.1.s8 %v87_v4  ;;  %v86_v11 = vld [vmem:[#allocation2] sm:$0xff]  ;;  %v283_v35 = vunpack.c.2.s8 %v87_v4  ;;  %v285_v36 = vunpack.c.3.s8 %v87_v4  ;;  %v89_v49 = vld [vmem:[#allocation2 + $0x18] sm:$0xff] }
  0x14   :  { %v3843_v1 = vshrl.u32 %v1816_v0, 7  ;;  %v663_v10 = vunpack.c.0.s8 %v183_v6  ;;  %v182_v12 = vld [vmem:[#allocation2 + $0x300] sm:$0xff]  ;;  %v665_v13 = vunpack.c.1.s8 %v183_v6  ;;  %v278_v14 = vunpack.c.0.s8 %v86_v11  ;;  %v185_v58 = vld [vmem:[#allocation2 + $0x318] sm:$0xff]  ;;  %v88_v63 = vld [vmem:[#allocation2 + $0x10] sm:$0xff] }
  0x15   :  { %v280_v15 = vunpack.c.1.s8 %v86_v11  ;;  %v1047_v17 = vcvt.s32.f32 %v279_v7  ;;  %v1049_v18 = vcvt.s32.f32 %v281_v8  ;;  %v662_v20 = vunpack.c.0.s8 %v182_v12 }
  0x16   :  { %v1822_v2 = vsub.s32 1, %v3843_v1  ;;  %v1818_v3 = vsub.s32 0, %v3843_v1  ;;  %v1431_v19 = vcvt.s32.f32 %v663_v10  ;;  %v1433_v21 = vcvt.s32.f32 %v665_v13 }
  0x17   :  { %v1046_v22 = vcvt.s32.f32 %v278_v14  ;;  %v1048_v23 = vcvt.s32.f32 %v280_v15  ;;  %v664_v24 = vunpack.c.1.s8 %v182_v12  ;;  %v1430_v28 = vcvt.s32.f32 %v662_v20 }
  0x18   :  { %v3852_v9 = vrot.slane %v1814_v5, %v1822_v2  ;;  %v3856_v16 = vrot.slane %v1814_v5, %v1818_v3  ;;  %v667_v40 = vunpack.c.2.s8 %v183_v6  ;;  %v1051_v41 = vcvt.s32.f32 %v283_v35 }
  0x19   :  { %v1432_v32 = vcvt.s32.f32 %v664_v24  ;;  %v1053_v42 = vcvt.s32.f32 %v285_v36  ;;  %v669_v43 = vunpack.c.3.s8 %v183_v6  ;;  %v282_v44 = vunpack.c.2.s8 %v86_v11 }
  0x1a   :  { %v1827_v25 = vmul.f32 %v3852_v9, %v1047_v17  ;;  %v1829_v26 = vmul.f32 %v3852_v9, %v1049_v18  ;;  %v2211_v27 = vmul.f32 %v3852_v9, %v1431_v19  ;;  %v2213_v29 = vmul.f32 %v3852_v9, %v1433_v21 }
  0x1b   :  { %v1826_v30 = vmul.f32 %v3856_v16, %v1046_v22  ;;  %v1828_v31 = vmul.f32 %v3856_v16, %v1048_v23  ;;  %v2210_v34 = vmul.f32 %v3856_v16, %v1430_v28  ;;  %v2212_v39 = vmul.f32 %v3856_v16, %v1432_v32 }
  0x1c   :  { %v2595_v33 = vpack.c.bf16 %v1829_v26, %v1827_v25  ;;  %v2787_v37 = vpack.c.bf16 %v2213_v29, %v2211_v27  ;;  %v1435_v46 = vcvt.s32.f32 %v667_v40  ;;  %v284_v47 = vunpack.c.3.s8 %v86_v11 }
  0x1d   :  { %v2594_v38 = vpack.c.bf16 %v1828_v31, %v1826_v30  ;;  %v2786_v45 = vpack.c.bf16 %v2212_v39, %v2210_v34  ;;  %v666_v48 = vunpack.c.2.s8 %v182_v12  ;;  %v1831_v50 = vmul.f32 %v3852_v9, %v1051_v41 }
  0x1e   :  { %2990 = vmatprep.subr.bf16.mxu1 %v2595_v33  ;;  %3236 = vmatprep.subr.bf16.mxu0 %v2787_v37  ;;  %v1833_v51 = vmul.f32 %v3852_v9, %v1053_v42  ;;  %v1437_v52 = vcvt.s32.f32 %v669_v43  ;;  %v1050_v53 = vcvt.s32.f32 %v282_v44  ;;  %v2215_v54 = vmul.f32 %v3852_v9, %v1435_v46  ;;  %v3881_v42 = vld [vmem:[#allocation2 + $0x28] sm:$0xff] }
  0x1f   :  { %2991 = vmatpush1.bf16.msra.mxu1 %v2594_v38  ;;  %3237 = vmatpush1.bf16.msra.mxu0 %v2786_v45  ;;  %v1052_v55 = vcvt.s32.f32 %v284_v47  ;;  %v668_v56 = vunpack.c.3.s8 %v182_v12  ;;  %v1434_v57 = vcvt.s32.f32 %v666_v48  ;;  %v287_v62 = vunpack.c.0.s8 %v89_v49  ;;  %v184_v12 = vld [vmem:[#allocation2 + $0x310] sm:$0xff] }
  0x20   :  { %v2597_v59 = vpack.c.bf16 %v1833_v51, %v1831_v50  ;;  %v2217_v60 = vmul.f32 %v3852_v9, %v1437_v52  ;;  %v1830_v61 = vmul.f32 %v3856_v16, %v1050_v53  ;;  %v289_v6 = vunpack.c.1.s8 %v89_v49 }
  0x21   :  { %v1832_v0 = vmul.f32 %v3856_v16, %v1052_v55  ;;  %v1436_v4 = vcvt.s32.f32 %v668_v56  ;;  %v2214_v5 = vmul.f32 %v3856_v16, %v1434_v57  ;;  %v1055_v8 = vcvt.s32.f32 %v287_v62 }
  0x22   :  { %2992 = vmatprep.subr.bf16.mxu1 %v2597_v59  ;;  %v2789_v7 = vpack.c.bf16 %v2217_v60, %v2215_v54  ;;  %v671_v10 = vunpack.c.0.s8 %v185_v58  ;;  %v673_v11 = vunpack.c.1.s8 %v185_v58  ;;  %v1057_v15 = vcvt.s32.f32 %v289_v6 }
  0x23   :  { %v2596_v13 = vpack.c.bf16 %v1832_v0, %v1830_v61  ;;  %v2216_v14 = vmul.f32 %v3856_v16, %v1436_v4  ;;  %v286_v17 = vunpack.c.0.s8 %v88_v63  ;;  %v1835_v18 = vmul.f32 %v3852_v9, %v1055_v8  ;;  %v90_v0 = vld [vmem:[#allocation2 + $0x20] sm:$0xff] }
  0x24   :  { %3238 = vmatprep.subr.bf16.mxu0 %v2789_v7  ;;  %v1439_v19 = vcvt.s32.f32 %v671_v10  ;;  %v1441_v20 = vcvt.s32.f32 %v673_v11  ;;  %v288_v21 = vunpack.c.1.s8 %v88_v63  ;;  %v1837_v23 = vmul.f32 %v3852_v9, %v1057_v15 }
  0x25   :  { %2993 = vmatpush1.bf16.msra.mxu1 %v2596_v13  ;;  %v2788_v22 = vpack.c.bf16 %v2216_v14, %v2214_v5  ;;  %v1054_v24 = vcvt.s32.f32 %v286_v17  ;;  %v670_v25 = vunpack.c.0.s8 %v184_v12  ;;  %v672_v29 = vunpack.c.1.s8 %v184_v12  ;;  %v186_v13 = vld [vmem:[#allocation2 + $0x320] sm:$0xff] }
  0x26   :  { %v2219_v26 = vmul.f32 %v3852_v9, %v1439_v19  ;;  %v2221_v27 = vmul.f32 %v3852_v9, %v1441_v20  ;;  %v1056_v28 = vcvt.s32.f32 %v288_v21  ;;  %v2599_v30 = vpack.c.bf16 %v1837_v23, %v1835_v18 }
  0x27   :  { %3239 = vmatpush1.bf16.msra.mxu0 %v2788_v22  ;;  %v1834_v31 = vmul.f32 %v3856_v16, %v1054_v24  ;;  %v1438_v32 = vcvt.s32.f32 %v670_v25  ;;  %v291_v33 = vunpack.c.2.s8 %v89_v49  ;;  %v1440_v36 = vcvt.s32.f32 %v672_v29 }
  0x28   :  { %v2791_v34 = vpack.c.bf16 %v2221_v27, %v2219_v26  ;;  %v1836_v35 = vmul.f32 %v3856_v16, %v1056_v28  ;;  %v293_v37 = vunpack.c.3.s8 %v89_v49  ;;  %2994 = vmatprep.subr.bf16.mxu1 %v2599_v30  ;;  %v675_v40 = vunpack.c.2.s8 %v185_v58  ;;  %v3885_v49 = vld [vmem:[#allocation2 + $0x328] sm:$0xff] }
  0x29   :  { %v2218_v38 = vmul.f32 %v3856_v16, %v1438_v32  ;;  %v1059_v39 = vcvt.s32.f32 %v291_v33  ;;  %v677_v41 = vunpack.c.3.s8 %v185_v58  ;;  %v2220_v44 = vmul.f32 %v3856_v16, %v1440_v36 }
  0x2a   :  { %3240 = vmatprep.subr.bf16.mxu0 %v2791_v34  ;;  %v2598_v43 = vpack.c.bf16 %v1836_v35, %v1834_v31  ;;  %v1061_v45 = vcvt.s32.f32 %v293_v37  ;;  %v290_v46 = vunpack.c.2.s8 %v88_v63  ;;  %v1443_v48 = vcvt.s32.f32 %v675_v40 }
  0x2b   :  { %v1839_v47 = vmul.f32 %v3852_v9, %v1059_v39  ;;  %v1445_v50 = vcvt.s32.f32 %v677_v41  ;;  %v292_v51 = vunpack.c.3.s8 %v88_v63  ;;  %v2790_v52 = vpack.c.bf16 %v2220_v44, %v2218_v38 }
  0x2c   :  { %2995 = vmatpush1.bf16.msra.mxu1 %v2598_v43  ;;  %v1841_v53 = vmul.f32 %v3852_v9, %v1061_v45  ;;  %v1058_v54 = vcvt.s32.f32 %v290_v46  ;;  %v674_v55 = vunpack.c.2.s8 %v184_v12  ;;  %v2223_v56 = vmul.f32 %v3852_v9, %v1443_v48 }
  0x2d   :  { %v2225_v57 = vmul.f32 %v3852_v9, %v1445_v50  ;;  %v1060_v58 = vcvt.s32.f32 %v292_v51  ;;  %v676_v59 = vunpack.c.3.s8 %v184_v12  ;;  %3241 = vmatpush1.bf16.msra.mxu0 %v2790_v52  ;;  %v295_v63 = vunpack.c.0.s8 %v3881_v42 }
  0x2e   :  { %v2601_v60 = vpack.c.bf16 %v1841_v53, %v1839_v47  ;;  %v1838_v61 = vmul.f32 %v3856_v16, %v1058_v54  ;;  %v1442_v62 = vcvt.s32.f32 %v674_v55  ;;  %v297_v7 = vunpack.c.1.s8 %v3881_v42 }
  0x2f   :  { %v2793_v4 = vpack.c.bf16 %v2225_v57, %v2223_v56  ;;  %v1840_v5 = vmul.f32 %v3856_v16, %v1060_v58  ;;  %v1444_v6 = vcvt.s32.f32 %v676_v59  ;;  %v1063_v10 = vcvt.s32.f32 %v295_v63 }
  0x30   :  { %2996 = vmatprep.subr.bf16.mxu1 %v2601_v60  ;;  %v2222_v8 = vmul.f32 %v3856_v16, %v1442_v62  ;;  %v679_v11 = vunpack.c.0.s8 %v3885_v49  ;;  %v681_v12 = vunpack.c.1.s8 %v3885_v49  ;;  %v1065_v17 = vcvt.s32.f32 %v297_v7  ;;  %v189_v60 = vld [vmem:[#allocation2 + $0x338] sm:$0xff] }
  0x31   :  { %3242 = vmatprep.subr.bf16.mxu0 %v2793_v4  ;;  %v2600_v14 = vpack.c.bf16 %v1840_v5, %v1838_v61  ;;  %v2224_v15 = vmul.f32 %v3856_v16, %v1444_v6  ;;  %v294_v18 = vunpack.c.0.s8 %v90_v0  ;;  %v1843_v19 = vmul.f32 %v3852_v9, %v1063_v10  ;;  %v92_v4 = vld [vmem:[#allocation2 + $0x30] sm:$0xff] }
  0x32   :  { %v1447_v20 = vcvt.s32.f32 %v679_v11  ;;  %v1449_v21 = vcvt.s32.f32 %v681_v12  ;;  %v296_v22 = vunpack.c.1.s8 %v90_v0  ;;  %v1845_v24 = vmul.f32 %v3852_v9, %v1065_v17 }
  0x33   :  { %2997 = vmatpush1.bf16.msra.mxu1 %v2600_v14  ;;  %v2792_v23 = vpack.c.bf16 %v2224_v15, %v2222_v8  ;;  %v1062_v25 = vcvt.s32.f32 %v294_v18  ;;  %v678_v26 = vunpack.c.0.s8 %v186_v13  ;;  %v680_v30 = vunpack.c.1.s8 %v186_v13 }
  0x34   :  { %v2227_v27 = vmul.f32 %v3852_v9, %v1447_v20  ;;  %v2229_v28 = vmul.f32 %v3852_v9, %v1449_v21  ;;  %v1064_v29 = vcvt.s32.f32 %v296_v22  ;;  %v2603_v31 = vpack.c.bf16 %v1845_v24, %v1843_v19 }
  0x35   :  { %3243 = vmatpush1.bf16.msra.mxu0 %v2792_v23  ;;  %v1842_v32 = vmul.f32 %v3856_v16, %v1062_v25  ;;  %v1446_v33 = vcvt.s32.f32 %v678_v26  ;;  %v299_v34 = vunpack.c.2.s8 %v3881_v42  ;;  %v1448_v37 = vcvt.s32.f32 %v680_v30 }
  0x36   :  { %v2795_v35 = vpack.c.bf16 %v2229_v28, %v2227_v27  ;;  %v1844_v36 = vmul.f32 %v3856_v16, %v1064_v29  ;;  %v301_v38 = vunpack.c.3.s8 %v3881_v42  ;;  %2998 = vmatprep.subr.bf16.mxu1 %v2603_v31  ;;  %v683_v41 = vunpack.c.2.s8 %v3885_v49  ;;  %v93_v42 = vld [vmem:[#allocation2 + $0x38] sm:$0xff] }
  0x37   :  { %v2226_v39 = vmul.f32 %v3856_v16, %v1446_v33  ;;  %v1067_v40 = vcvt.s32.f32 %v299_v34  ;;  %v685_v43 = vunpack.c.3.s8 %v3885_v49  ;;  %v2228_v45 = vmul.f32 %v3856_v16, %v1448_v37 }
  0x38   :  { %3244 = vmatprep.subr.bf16.mxu0 %v2795_v35  ;;  %v2602_v44 = vpack.c.bf16 %v1844_v36, %v1842_v32  ;;  %v1069_v46 = vcvt.s32.f32 %v301_v38  ;;  %v298_v47 = vunpack.c.2.s8 %v90_v0  ;;  %v1451_v50 = vcvt.s32.f32 %v683_v41 }
  0x39   :  { %v1847_v48 = vmul.f32 %v3852_v9, %v1067_v40  ;;  %v1453_v51 = vcvt.s32.f32 %v685_v43  ;;  %v300_v52 = vunpack.c.3.s8 %v90_v0  ;;  %v2794_v53 = vpack.c.bf16 %v2228_v45, %v2226_v39 }
  0x3a   :  { %2999 = vmatpush1.bf16.msra.mxu1 %v2602_v44  ;;  %v1849_v54 = vmul.f32 %v3852_v9, %v1069_v46  ;;  %v1066_v55 = vcvt.s32.f32 %v298_v47  ;;  %v682_v56 = vunpack.c.2.s8 %v186_v13  ;;  %v2231_v49 = vmul.f32 %v3852_v9, %v1451_v50 }
  0x3b   :  { %v2233_v57 = vmul.f32 %v3852_v9, %v1453_v51  ;;  %v1068_v58 = vcvt.s32.f32 %v300_v52  ;;  %v684_v59 = vunpack.c.3.s8 %v186_v13  ;;  %3245 = vmatpush1.bf16.msra.mxu0 %v2794_v53  ;;  %v303_v0 = vunpack.c.0.s8 %v93_v42  ;;  %v188_v13 = vld [vmem:[#allocation2 + $0x330] sm:$0xff] }
  0x3c   :  { %v2605_v61 = vpack.c.bf16 %v1849_v54, %v1847_v48  ;;  %v1846_v62 = vmul.f32 %v3856_v16, %v1066_v55  ;;  %v1450_v63 = vcvt.s32.f32 %v682_v56  ;;  %v305_v8 = vunpack.c.1.s8 %v93_v42  ;;  %v95_v54 = vld [vmem:[#allocation2 + $0x48] sm:$0xff] }
  0x3d   :  { %v2797_v5 = vpack.c.bf16 %v2233_v57, %v2231_v49  ;;  %v1848_v6 = vmul.f32 %v3856_v16, %v1068_v58  ;;  %v1452_v7 = vcvt.s32.f32 %v684_v59  ;;  %v1071_v11 = vcvt.s32.f32 %v303_v0 }
  0x3e   :  { %3000 = vmatprep.subr.bf16.mxu1 %v2605_v61  ;;  %v2230_v10 = vmul.f32 %v3856_v16, %v1450_v63  ;;  %v687_v12 = vunpack.c.0.s8 %v189_v60  ;;  %v689_v14 = vunpack.c.1.s8 %v189_v60  ;;  %v1073_v18 = vcvt.s32.f32 %v305_v8  ;;  %v191_v61 = vld [vmem:[#allocation2 + $0x348] sm:$0xff] }
  0x3f   :  { %3246 = vmatprep.subr.bf16.mxu0 %v2797_v5  ;;  %v2604_v15 = vpack.c.bf16 %v1848_v6, %v1846_v62  ;;  %v2232_v17 = vmul.f32 %v3856_v16, %v1452_v7  ;;  %v302_v19 = vunpack.c.0.s8 %v92_v4  ;;  %v1851_v20 = vmul.f32 %v3852_v9, %v1071_v11  ;;  %v94_v5 = vld [vmem:[#allocation2 + $0x40] sm:$0xff] }
  0x40   :  { %v1455_v21 = vcvt.s32.f32 %v687_v12  ;;  %v1457_v22 = vcvt.s32.f32 %v689_v14  ;;  %v304_v23 = vunpack.c.1.s8 %v92_v4  ;;  %v1853_v25 = vmul.f32 %v3852_v9, %v1073_v18 }
  0x41   :  { %3001 = vmatpush1.bf16.msra.mxu1 %v2604_v15  ;;  %v2796_v24 = vpack.c.bf16 %v2232_v17, %v2230_v10  ;;  %v1070_v26 = vcvt.s32.f32 %v302_v19  ;;  %v686_v27 = vunpack.c.0.s8 %v188_v13  ;;  %v688_v31 = vunpack.c.1.s8 %v188_v13 }
  0x42   :  { %v2235_v28 = vmul.f32 %v3852_v9, %v1455_v21  ;;  %v2237_v29 = vmul.f32 %v3852_v9, %v1457_v22  ;;  %v1072_v30 = vcvt.s32.f32 %v304_v23  ;;  %v2607_v32 = vpack.c.bf16 %v1853_v25, %v1851_v20 }
  0x43   :  { %3247 = vmatpush1.bf16.msra.mxu0 %v2796_v24  ;;  %v1850_v33 = vmul.f32 %v3856_v16, %v1070_v26  ;;  %v1454_v34 = vcvt.s32.f32 %v686_v27  ;;  %v307_v35 = vunpack.c.2.s8 %v93_v42  ;;  %v1456_v38 = vcvt.s32.f32 %v688_v31 }
  0x44   :  { %v2799_v36 = vpack.c.bf16 %v2237_v29, %v2235_v28  ;;  %v1852_v37 = vmul.f32 %v3856_v16, %v1072_v30  ;;  %v309_v39 = vunpack.c.3.s8 %v93_v42  ;;  %3002 = vmatprep.subr.bf16.mxu1 %v2607_v32  ;;  %v691_v43 = vunpack.c.2.s8 %v189_v60 }
  0x45   :  { %v2234_v40 = vmul.f32 %v3856_v16, %v1454_v34  ;;  %v1075_v41 = vcvt.s32.f32 %v307_v35  ;;  %v693_v44 = vunpack.c.3.s8 %v189_v60  ;;  %v2236_v46 = vmul.f32 %v3856_v16, %v1456_v38 }
  0x46   :  { %3248 = vmatprep.subr.bf16.mxu0 %v2799_v36  ;;  %v2606_v45 = vpack.c.bf16 %v1852_v37, %v1850_v33  ;;  %v1077_v47 = vcvt.s32.f32 %v309_v39  ;;  %v306_v48 = vunpack.c.2.s8 %v92_v4  ;;  %v1459_v51 = vcvt.s32.f32 %v691_v43 }
  0x47   :  { %v1855_v50 = vmul.f32 %v3852_v9, %v1075_v41  ;;  %v1461_v52 = vcvt.s32.f32 %v693_v44  ;;  %v308_v53 = vunpack.c.3.s8 %v92_v4  ;;  %v2798_v42 = vpack.c.bf16 %v2236_v46, %v2234_v40 }
  0x48   :  { %3003 = vmatpush1.bf16.msra.mxu1 %v2606_v45  ;;  %v1857_v55 = vmul.f32 %v3852_v9, %v1077_v47  ;;  %v1074_v56 = vcvt.s32.f32 %v306_v48  ;;  %v690_v49 = vunpack.c.2.s8 %v188_v13  ;;  %v2239_v57 = vmul.f32 %v3852_v9, %v1459_v51 }
  0x49   :  { %v2241_v58 = vmul.f32 %v3852_v9, %v1461_v52  ;;  %v1076_v59 = vcvt.s32.f32 %v308_v53  ;;  %v692_v60 = vunpack.c.3.s8 %v188_v13  ;;  %3249 = vmatpush1.bf16.msra.mxu0 %v2798_v42  ;;  %v311_v4 = vunpack.c.0.s8 %v95_v54  ;;  %v190_v13 = vld [vmem:[#allocation2 + $0x340] sm:$0xff] }
  0x4a   :  { %v2609_v62 = vpack.c.bf16 %v1857_v55, %v1855_v50  ;;  %v1854_v63 = vmul.f32 %v3856_v16, %v1074_v56  ;;  %v1458_v0 = vcvt.s32.f32 %v690_v49  ;;  %v313_v10 = vunpack.c.1.s8 %v95_v54  ;;  %v97_v55 = vld [vmem:[#allocation2 + $0x58] sm:$0xff] }
  0x4b   :  { %v2801_v6 = vpack.c.bf16 %v2241_v58, %v2239_v57  ;;  %v1856_v7 = vmul.f32 %v3856_v16, %v1076_v59  ;;  %v1460_v8 = vcvt.s32.f32 %v692_v60  ;;  %v1079_v12 = vcvt.s32.f32 %v311_v4 }
  0x4c   :  { %3004 = vmatprep.subr.bf16.mxu1 %v2609_v62  ;;  %v2238_v11 = vmul.f32 %v3856_v16, %v1458_v0  ;;  %v695_v14 = vunpack.c.0.s8 %v191_v61  ;;  %v697_v15 = vunpack.c.1.s8 %v191_v61  ;;  %v1081_v19 = vcvt.s32.f32 %v313_v10  ;;  %v193_v62 = vld [vmem:[#allocation2 + $0x358] sm:$0xff] }
  0x4d   :  { %3250 = vmatprep.subr.bf16.mxu0 %v2801_v6  ;;  %v2608_v17 = vpack.c.bf16 %v1856_v7, %v1854_v63  ;;  %v2240_v18 = vmul.f32 %v3856_v16, %v1460_v8  ;;  %v310_v20 = vunpack.c.0.s8 %v94_v5  ;;  %v1859_v21 = vmul.f32 %v3852_v9, %v1079_v12  ;;  %v96_v6 = vld [vmem:[#allocation2 + $0x50] sm:$0xff] }
  0x4e   :  { %v1463_v22 = vcvt.s32.f32 %v695_v14  ;;  %v1465_v23 = vcvt.s32.f32 %v697_v15  ;;  %v312_v24 = vunpack.c.1.s8 %v94_v5  ;;  %v1861_v26 = vmul.f32 %v3852_v9, %v1081_v19 }
  0x4f   :  { %3005 = vmatpush1.bf16.msra.mxu1 %v2608_v17  ;;  %v2800_v25 = vpack.c.bf16 %v2240_v18, %v2238_v11  ;;  %v1078_v27 = vcvt.s32.f32 %v310_v20  ;;  %v694_v28 = vunpack.c.0.s8 %v190_v13  ;;  %v696_v32 = vunpack.c.1.s8 %v190_v13 }
  0x50   :  { %v2243_v29 = vmul.f32 %v3852_v9, %v1463_v22  ;;  %v2245_v30 = vmul.f32 %v3852_v9, %v1465_v23  ;;  %v1080_v31 = vcvt.s32.f32 %v312_v24  ;;  %v2611_v33 = vpack.c.bf16 %v1861_v26, %v1859_v21 }
  0x51   :  { %3251 = vmatpush1.bf16.msra.mxu0 %v2800_v25  ;;  %v1858_v34 = vmul.f32 %v3856_v16, %v1078_v27  ;;  %v1462_v35 = vcvt.s32.f32 %v694_v28  ;;  %v315_v36 = vunpack.c.2.s8 %v95_v54  ;;  %v1464_v39 = vcvt.s32.f32 %v696_v32 }
  0x52   :  { %v2803_v37 = vpack.c.bf16 %v2245_v30, %v2243_v29  ;;  %v1860_v38 = vmul.f32 %v3856_v16, %v1080_v31  ;;  %v317_v40 = vunpack.c.3.s8 %v95_v54  ;;  %3006 = vmatprep.subr.bf16.mxu1 %v2611_v33  ;;  %v699_v44 = vunpack.c.2.s8 %v191_v61 }
  0x53   :  { %v2242_v41 = vmul.f32 %v3856_v16, %v1462_v35  ;;  %v1083_v43 = vcvt.s32.f32 %v315_v36  ;;  %v701_v45 = vunpack.c.3.s8 %v191_v61  ;;  %v2244_v47 = vmul.f32 %v3856_v16, %v1464_v39 }
  0x54   :  { %3252 = vmatprep.subr.bf16.mxu0 %v2803_v37  ;;  %v2610_v46 = vpack.c.bf16 %v1860_v38, %v1858_v34  ;;  %v1085_v48 = vcvt.s32.f32 %v317_v40  ;;  %v314_v50 = vunpack.c.2.s8 %v94_v5  ;;  %v1467_v52 = vcvt.s32.f32 %v699_v44 }
  0x55   :  { %v1863_v51 = vmul.f32 %v3852_v9, %v1083_v43  ;;  %v1469_v53 = vcvt.s32.f32 %v701_v45  ;;  %v316_v42 = vunpack.c.3.s8 %v94_v5  ;;  %v2802_v54 = vpack.c.bf16 %v2244_v47, %v2242_v41 }
  0x56   :  { %3007 = vmatpush1.bf16.msra.mxu1 %v2610_v46  ;;  %v1865_v56 = vmul.f32 %v3852_v9, %v1085_v48  ;;  %v1082_v49 = vcvt.s32.f32 %v314_v50  ;;  %v698_v57 = vunpack.c.2.s8 %v190_v13  ;;  %v2247_v58 = vmul.f32 %v3852_v9, %v1467_v52 }
  0x57   :  { %v2249_v59 = vmul.f32 %v3852_v9, %v1469_v53  ;;  %v1084_v60 = vcvt.s32.f32 %v316_v42  ;;  %v700_v61 = vunpack.c.3.s8 %v190_v13  ;;  %3253 = vmatpush1.bf16.msra.mxu0 %v2802_v54  ;;  %v319_v5 = vunpack.c.0.s8 %v97_v55  ;;  %v192_v13 = vld [vmem:[#allocation2 + $0x350] sm:$0xff] }
  0x58   :  { %v2613_v63 = vpack.c.bf16 %v1865_v56, %v1863_v51  ;;  %v1862_v0 = vmul.f32 %v3856_v16, %v1082_v49  ;;  %v1466_v4 = vcvt.s32.f32 %v698_v57  ;;  %v321_v11 = vunpack.c.1.s8 %v97_v55  ;;  %v99_v56 = vld [vmem:[#allocation2 + $0x68] sm:$0xff] }
  0x59   :  { %v2805_v7 = vpack.c.bf16 %v2249_v59, %v2247_v58  ;;  %v1864_v8 = vmul.f32 %v3856_v16, %v1084_v60  ;;  %v1468_v10 = vcvt.s32.f32 %v700_v61  ;;  %v1087_v14 = vcvt.s32.f32 %v319_v5 }
  0x5a   :  { %3008 = vmatprep.subr.bf16.mxu1 %v2613_v63  ;;  %v2246_v12 = vmul.f32 %v3856_v16, %v1466_v4  ;;  %v703_v15 = vunpack.c.0.s8 %v193_v62  ;;  %v705_v17 = vunpack.c.1.s8 %v193_v62  ;;  %v1089_v20 = vcvt.s32.f32 %v321_v11  ;;  %v195_v63 = vld [vmem:[#allocation2 + $0x368] sm:$0xff] }
  0x5b   :  { %3254 = vmatprep.subr.bf16.mxu0 %v2805_v7  ;;  %v2612_v18 = vpack.c.bf16 %v1864_v8, %v1862_v0  ;;  %v2248_v19 = vmul.f32 %v3856_v16, %v1468_v10  ;;  %v318_v21 = vunpack.c.0.s8 %v96_v6  ;;  %v1867_v22 = vmul.f32 %v3852_v9, %v1087_v14  ;;  %v98_v7 = vld [vmem:[#allocation2 + $0x60] sm:$0xff] }
  0x5c   :  { %v1471_v23 = vcvt.s32.f32 %v703_v15  ;;  %v1473_v24 = vcvt.s32.f32 %v705_v17  ;;  %v320_v25 = vunpack.c.1.s8 %v96_v6  ;;  %v1869_v27 = vmul.f32 %v3852_v9, %v1089_v20 }
  0x5d   :  { %3009 = vmatpush1.bf16.msra.mxu1 %v2612_v18  ;;  %v2804_v26 = vpack.c.bf16 %v2248_v19, %v2246_v12  ;;  %v1086_v28 = vcvt.s32.f32 %v318_v21  ;;  %v702_v29 = vunpack.c.0.s8 %v192_v13  ;;  %v704_v33 = vunpack.c.1.s8 %v192_v13 }
  0x5e   :  { %v2251_v30 = vmul.f32 %v3852_v9, %v1471_v23  ;;  %v2253_v31 = vmul.f32 %v3852_v9, %v1473_v24  ;;  %v1088_v32 = vcvt.s32.f32 %v320_v25  ;;  %v2615_v34 = vpack.c.bf16 %v1869_v27, %v1867_v22 }
  0x5f   :  { %3255 = vmatpush1.bf16.msra.mxu0 %v2804_v26  ;;  %v1866_v35 = vmul.f32 %v3856_v16, %v1086_v28  ;;  %v1470_v36 = vcvt.s32.f32 %v702_v29  ;;  %v323_v37 = vunpack.c.2.s8 %v97_v55  ;;  %v1472_v40 = vcvt.s32.f32 %v704_v33 }
  0x60   :  { %v2807_v38 = vpack.c.bf16 %v2253_v31, %v2251_v30  ;;  %v1868_v39 = vmul.f32 %v3856_v16, %v1088_v32  ;;  %v325_v41 = vunpack.c.3.s8 %v97_v55  ;;  %3010 = vmatprep.subr.bf16.mxu1 %v2615_v34  ;;  %v707_v45 = vunpack.c.2.s8 %v193_v62 }
  0x61   :  { %v2250_v43 = vmul.f32 %v3856_v16, %v1470_v36  ;;  %v1091_v44 = vcvt.s32.f32 %v323_v37  ;;  %v709_v46 = vunpack.c.3.s8 %v193_v62  ;;  %v2252_v48 = vmul.f32 %v3856_v16, %v1472_v40 }
  0x62   :  { %3256 = vmatprep.subr.bf16.mxu0 %v2807_v38  ;;  %v2614_v47 = vpack.c.bf16 %v1868_v39, %v1866_v35  ;;  %v1093_v50 = vcvt.s32.f32 %v325_v41  ;;  %v322_v51 = vunpack.c.2.s8 %v96_v6  ;;  %v1475_v53 = vcvt.s32.f32 %v707_v45 }
  0x63   :  { %v1871_v52 = vmul.f32 %v3852_v9, %v1091_v44  ;;  %v1477_v42 = vcvt.s32.f32 %v709_v46  ;;  %v324_v54 = vunpack.c.3.s8 %v96_v6  ;;  %v2806_v55 = vpack.c.bf16 %v2252_v48, %v2250_v43 }
  0x64   :  { %3011 = vmatpush1.bf16.msra.mxu1 %v2614_v47  ;;  %v1873_v49 = vmul.f32 %v3852_v9, %v1093_v50  ;;  %v1090_v57 = vcvt.s32.f32 %v322_v51  ;;  %v706_v58 = vunpack.c.2.s8 %v192_v13  ;;  %v2255_v59 = vmul.f32 %v3852_v9, %v1475_v53 }
  0x65   :  { %v2257_v60 = vmul.f32 %v3852_v9, %v1477_v42  ;;  %v1092_v61 = vcvt.s32.f32 %v324_v54  ;;  %v708_v62 = vunpack.c.3.s8 %v192_v13  ;;  %3257 = vmatpush1.bf16.msra.mxu0 %v2806_v55  ;;  %v327_v6 = vunpack.c.0.s8 %v99_v56  ;;  %v194_v13 = vld [vmem:[#allocation2 + $0x360] sm:$0xff] }
  0x66   :  { %v2617_v0 = vpack.c.bf16 %v1873_v49, %v1871_v52  ;;  %v1870_v4 = vmul.f32 %v3856_v16, %v1090_v57  ;;  %v1474_v5 = vcvt.s32.f32 %v706_v58  ;;  %v329_v12 = vunpack.c.1.s8 %v99_v56  ;;  %v101_v49 = vld [vmem:[#allocation2 + $0x78] sm:$0xff] }
  0x67   :  { %v2809_v8 = vpack.c.bf16 %v2257_v60, %v2255_v59  ;;  %v1872_v10 = vmul.f32 %v3856_v16, %v1092_v61  ;;  %v1476_v11 = vcvt.s32.f32 %v708_v62  ;;  %v1095_v15 = vcvt.s32.f32 %v327_v6 }
  0x68   :  { %3012 = vmatprep.subr.bf16.mxu1 %v2617_v0  ;;  %v2254_v14 = vmul.f32 %v3856_v16, %v1474_v5  ;;  %v711_v17 = vunpack.c.0.s8 %v195_v63  ;;  %v713_v18 = vunpack.c.1.s8 %v195_v63  ;;  %v1097_v21 = vcvt.s32.f32 %v329_v12  ;;  %v197_v0 = vld [vmem:[#allocation2 + $0x378] sm:$0xff] }
  0x69   :  { %3258 = vmatprep.subr.bf16.mxu0 %v2809_v8  ;;  %v2616_v19 = vpack.c.bf16 %v1872_v10, %v1870_v4  ;;  %v2256_v20 = vmul.f32 %v3856_v16, %v1476_v11  ;;  %v326_v22 = vunpack.c.0.s8 %v98_v7  ;;  %v1875_v23 = vmul.f32 %v3852_v9, %v1095_v15  ;;  %v100_v8 = vld [vmem:[#allocation2 + $0x70] sm:$0xff] }
  0x6a   :  { %v1479_v24 = vcvt.s32.f32 %v711_v17  ;;  %v1481_v25 = vcvt.s32.f32 %v713_v18  ;;  %v328_v26 = vunpack.c.1.s8 %v98_v7  ;;  %v1877_v28 = vmul.f32 %v3852_v9, %v1097_v21 }
  0x6b   :  { %3013 = vmatpush1.bf16.msra.mxu1 %v2616_v19  ;;  %v2808_v27 = vpack.c.bf16 %v2256_v20, %v2254_v14  ;;  %v1094_v29 = vcvt.s32.f32 %v326_v22  ;;  %v710_v30 = vunpack.c.0.s8 %v194_v13  ;;  %v712_v34 = vunpack.c.1.s8 %v194_v13 }
  0x6c   :  { %v2259_v31 = vmul.f32 %v3852_v9, %v1479_v24  ;;  %v2261_v32 = vmul.f32 %v3852_v9, %v1481_v25  ;;  %v1096_v33 = vcvt.s32.f32 %v328_v26  ;;  %v2619_v35 = vpack.c.bf16 %v1877_v28, %v1875_v23 }
  0x6d   :  { %3259 = vmatpush1.bf16.msra.mxu0 %v2808_v27  ;;  %v1874_v36 = vmul.f32 %v3856_v16, %v1094_v29  ;;  %v1478_v37 = vcvt.s32.f32 %v710_v30  ;;  %v331_v38 = vunpack.c.2.s8 %v99_v56  ;;  %v1480_v41 = vcvt.s32.f32 %v712_v34 }
  0x6e   :  { %v2811_v39 = vpack.c.bf16 %v2261_v32, %v2259_v31  ;;  %v1876_v40 = vmul.f32 %v3856_v16, %v1096_v33  ;;  %v333_v43 = vunpack.c.3.s8 %v99_v56  ;;  %3014 = vmatprep.subr.bf16.mxu1 %v2619_v35  ;;  %v715_v46 = vunpack.c.2.s8 %v195_v63 }
  0x6f   :  { %v2258_v44 = vmul.f32 %v3856_v16, %v1478_v37  ;;  %v1099_v45 = vcvt.s32.f32 %v331_v38  ;;  %v717_v47 = vunpack.c.3.s8 %v195_v63  ;;  %v2260_v50 = vmul.f32 %v3856_v16, %v1480_v41 }
  0x70   :  { %3260 = vmatprep.subr.bf16.mxu0 %v2811_v39  ;;  %v2618_v48 = vpack.c.bf16 %v1876_v40, %v1874_v36  ;;  %v1101_v51 = vcvt.s32.f32 %v333_v43  ;;  %v330_v52 = vunpack.c.2.s8 %v98_v7  ;;  %v1483_v42 = vcvt.s32.f32 %v715_v46 }
  0x71   :  { %v1879_v53 = vmul.f32 %v3852_v9, %v1099_v45  ;;  %v1485_v54 = vcvt.s32.f32 %v717_v47  ;;  %v332_v55 = vunpack.c.3.s8 %v98_v7  ;;  %v2810_v56 = vpack.c.bf16 %v2260_v50, %v2258_v44 }
  0x72   :  { %3015 = vmatpush1.bf16.msra.mxu1 %v2618_v48  ;;  %v1881_v57 = vmul.f32 %v3852_v9, %v1101_v51  ;;  %v1098_v58 = vcvt.s32.f32 %v330_v52  ;;  %v714_v59 = vunpack.c.2.s8 %v194_v13  ;;  %v2263_v60 = vmul.f32 %v3852_v9, %v1483_v42 }
  0x73   :  { %v2265_v61 = vmul.f32 %v3852_v9, %v1485_v54  ;;  %v1100_v62 = vcvt.s32.f32 %v332_v55  ;;  %v716_v63 = vunpack.c.3.s8 %v194_v13  ;;  %3261 = vmatpush1.bf16.msra.mxu0 %v2810_v56  ;;  %v335_v7 = vunpack.c.0.s8 %v101_v49  ;;  %v196_v13 = vld [vmem:[#allocation2 + $0x370] sm:$0xff] }
  0x74   :  { %v2621_v4 = vpack.c.bf16 %v1881_v57, %v1879_v53  ;;  %v1878_v5 = vmul.f32 %v3856_v16, %v1098_v58  ;;  %v1482_v6 = vcvt.s32.f32 %v714_v59  ;;  %v337_v14 = vunpack.c.1.s8 %v101_v49 }
  0x75   :  { %v2813_v10 = vpack.c.bf16 %v2265_v61, %v2263_v60  ;;  %v1880_v11 = vmul.f32 %v3856_v16, %v1100_v62  ;;  %v1484_v12 = vcvt.s32.f32 %v716_v63  ;;  %v1103_v17 = vcvt.s32.f32 %v335_v7  ;;  %v103_v61 = vld [vmem:[#allocation2 + $0x88] sm:$0xff] }
  0x76   :  { %3016 = vmatprep.subr.bf16.mxu1 %v2621_v4  ;;  %v2262_v15 = vmul.f32 %v3856_v16, %v1482_v6  ;;  %v719_v18 = vunpack.c.0.s8 %v197_v0  ;;  %v721_v19 = vunpack.c.1.s8 %v197_v0  ;;  %v1105_v22 = vcvt.s32.f32 %v337_v14  ;;  %v4000_v6 = vld [vmem:[#allocation2 + $0x388] sm:$0xff] }
  0x77   :  { %3262 = vmatprep.subr.bf16.mxu0 %v2813_v10  ;;  %v2620_v20 = vpack.c.bf16 %v1880_v11, %v1878_v5  ;;  %v2264_v21 = vmul.f32 %v3856_v16, %v1484_v12  ;;  %v334_v23 = vunpack.c.0.s8 %v100_v8  ;;  %v1883_v24 = vmul.f32 %v3852_v9, %v1103_v17  ;;  %v51_v5 = vld [vmem:[%s5035_s0 + $0x68] sm:$0xff] }
  0x78   :  { %v1487_v25 = vcvt.s32.f32 %v719_v18  ;;  %v1489_v26 = vcvt.s32.f32 %v721_v19  ;;  %v336_v27 = vunpack.c.1.s8 %v100_v8  ;;  %v1885_v29 = vmul.f32 %v3852_v9, %v1105_v22  ;;  %v38_v18 = vld [vmem:[%s5035_s0] sm:$0xff] }
  0x79   :  { %3017 = vmatpush1.bf16.msra.mxu1 %v2620_v20  ;;  %v2812_v28 = vpack.c.bf16 %v2264_v21, %v2262_v15  ;;  %v1102_v30 = vcvt.s32.f32 %v334_v23  ;;  %v718_v31 = vunpack.c.0.s8 %v196_v13  ;;  %v720_v35 = vunpack.c.1.s8 %v196_v13  ;;  %v4007_v19 = vld [vmem:[#allocation2 + $0x80] sm:$0xff] }
  0x7a   :  { %v2267_v32 = vmul.f32 %v3852_v9, %v1487_v25  ;;  %v2269_v33 = vmul.f32 %v3852_v9, %v1489_v26  ;;  %v1104_v34 = vcvt.s32.f32 %v336_v27  ;;  %v2623_v36 = vpack.c.bf16 %v1885_v29, %v1883_v24  ;;  %v50_v27 = vld [vmem:[%s5035_s0 + $0x60] sm:$0xff] }
  0x7b   :  { %3263 = vmatpush1.bf16.msra.mxu0 %v2812_v28  ;;  %v1882_v37 = vmul.f32 %v3856_v16, %v1102_v30  ;;  %v1486_v38 = vcvt.s32.f32 %v718_v31  ;;  %v339_v39 = vunpack.c.2.s8 %v101_v49  ;;  %v1488_v43 = vcvt.s32.f32 %v720_v35 }
  0x7c   :  { %v2815_v40 = vpack.c.bf16 %v2269_v33, %v2267_v32  ;;  %v1884_v41 = vmul.f32 %v3856_v16, %v1104_v34  ;;  %v341_v44 = vunpack.c.3.s8 %v101_v49  ;;  %3018 = vmatprep.subr.bf16.mxu1 %v2623_v36  ;;  %v723_v47 = vunpack.c.2.s8 %v197_v0  ;;  %v39_v49 = vld [vmem:[%s5035_s0 + $0x8] sm:$0xff]  ;;  %v198_v32 = vld [vmem:[#allocation2 + $0x380] sm:$0xff] }
  0x7d   :  { %v2266_v45 = vmul.f32 %v3856_v16, %v1486_v38  ;;  %v1107_v46 = vcvt.s32.f32 %v339_v39  ;;  %v725_v48 = vunpack.c.3.s8 %v197_v0  ;;  %v2268_v51 = vmul.f32 %v3856_v16, %v1488_v43 }
  0x7e   :  { %3264 = vmatprep.subr.bf16.mxu0 %v2815_v40  ;;  %v2622_v50 = vpack.c.bf16 %v1884_v41, %v1882_v37  ;;  %v1109_v52 = vcvt.s32.f32 %v341_v44  ;;  %v338_v53 = vunpack.c.2.s8 %v100_v8  ;;  %v1491_v54 = vcvt.s32.f32 %v723_v47 }
  0x7f   :  { %v1887_v42 = vmul.f32 %v3852_v9, %v1107_v46  ;;  %v1493_v55 = vcvt.s32.f32 %v725_v48  ;;  %v340_v56 = vunpack.c.3.s8 %v100_v8  ;;  %v2814_v57 = vpack.c.bf16 %v2268_v51, %v2266_v45 }
  0x80   :  { %3019 = vmatpush1.bf16.msra.mxu1 %v2622_v50  ;;  %v1889_v58 = vmul.f32 %v3852_v9, %v1109_v52  ;;  %v1106_v59 = vcvt.s32.f32 %v338_v53  ;;  %v722_v60 = vunpack.c.2.s8 %v196_v13  ;;  %v2271_v62 = vmul.f32 %v3852_v9, %v1491_v54 }
  0x81   :  { %v2273_v63 = vmul.f32 %v3852_v9, %v1493_v55  ;;  %v1108_v0 = vcvt.s32.f32 %v340_v56  ;;  %v724_v4 = vunpack.c.3.s8 %v196_v13  ;;  %3265 = vmatpush1.bf16.msra.mxu0 %v2814_v57  ;;  %v63_v11 = vpack.c.bf16 %v39_v49, %v39_v49 }
  0x82   :  { %v2625_v7 = vpack.c.bf16 %v1889_v58, %v1887_v42  ;;  %v1886_v8 = vmul.f32 %v3856_v16, %v1106_v59  ;;  %v1490_v10 = vcvt.s32.f32 %v722_v60  ;;  %v343_v17 = vunpack.c.0.s8 %v103_v61 }
  0x83   :  { %v2817_v12 = vpack.c.bf16 %v2273_v63, %v2271_v62  ;;  %v1888_v14 = vmul.f32 %v3856_v16, %v1108_v0  ;;  %v1492_v15 = vcvt.s32.f32 %v724_v4  ;;  %3022 = vmatprep.mubr.bf16.mxu1 %v63_v11  ;;  %v345_v20 = vunpack.c.1.s8 %v103_v61  ;;  %v105_v4 = vld [vmem:[#allocation2 + $0x98] sm:$0xff] }
  0x84   :  { %3020 = vmatprep.subr.bf16.mxu1 %v2625_v7  ;;  %v2270_v13 = vmul.f32 %v3856_v16, %v1490_v10  ;;  %v75_v21 = vpack.c.bf16 %v51_v5, %v51_v5  ;;  %v727_v22 = vunpack.c.0.s8 %v4000_v6  ;;  %v1111_v25 = vcvt.s32.f32 %v343_v17  ;;  %v201_v10 = vld [vmem:[#allocation2 + $0x398] sm:$0xff] }
  0x85   :  { %3266 = vmatprep.subr.bf16.mxu0 %v2817_v12  ;;  %v2624_v23 = vpack.c.bf16 %v1888_v14, %v1886_v8  ;;  %v2272_v24 = vmul.f32 %v3856_v16, %v1492_v15  ;;  %v729_v26 = vunpack.c.1.s8 %v4000_v6  ;;  %v1113_v28 = vcvt.s32.f32 %v345_v20 }
  0x86   :  { %3268 = vmatprep.mubr.bf16.mxu0 %v75_v21  ;;  %v1495_v29 = vcvt.s32.f32 %v727_v22  ;;  %v62_v30 = vpack.c.bf16 %v38_v18, %v38_v18  ;;  %v342_v31 = vunpack.c.0.s8 %v4007_v19  ;;  %v1891_v34 = vmul.f32 %v3852_v9, %v1111_v25  ;;  %v4035_v21 = vld [vmem:[#allocation2 + $0x90] sm:$0xff] }
  0x87   :  { %3021 = vmatpush1.bf16.msra.mxu1 %v2624_v23  ;;  %v2816_v33 = vpack.c.bf16 %v2272_v24, %v2270_v13  ;;  %v1497_v35 = vcvt.s32.f32 %v729_v26  ;;  %v344_v36 = vunpack.c.1.s8 %v4007_v19  ;;  %v1893_v37 = vmul.f32 %v3852_v9, %v1113_v28 }
  0x88   :  { %v2275_v38 = vmul.f32 %v3852_v9, %v1495_v29  ;;  %v1110_v39 = vcvt.s32.f32 %v342_v31  ;;  %v74_v40 = vpack.c.bf16 %v50_v27, %v50_v27  ;;  %v726_v44 = vunpack.c.0.s8 %v198_v32 }
  0x89   :  { %3267 = vmatpush1.bf16.msra.mxu0 %v2816_v33  ;;  %v2277_v41 = vmul.f32 %v3852_v9, %v1497_v35  ;;  %v1112_v43 = vcvt.s32.f32 %v344_v36  ;;  %v728_v45 = vunpack.c.1.s8 %v198_v32  ;;  %v2627_v46 = vpack.c.bf16 %v1893_v37, %v1891_v34  ;;  %v200_v33 = vld [vmem:[#allocation2 + $0x390] sm:$0xff] }
  0x8a   :  { %3023 = vmatmul.mubr.bf16.vlgmr.msra.gmra.mrb[0].mxu1 %v62_v30  ;;  %v1890_v47 = vmul.f32 %v3856_v16, %v1110_v39  ;;  %v347_v48 = vunpack.c.2.s8 %v103_v61  ;;  %v349_v50 = vunpack.c.3.s8 %v103_v61  ;;  %v1494_v53 = vcvt.s32.f32 %v726_v44 }
  0x8b   :  { %v2819_v51 = vpack.c.bf16 %v2277_v41, %v2275_v38  ;;  %v1892_v52 = vmul.f32 %v3856_v16, %v1112_v43  ;;  %v1496_v42 = vcvt.s32.f32 %v728_v45  ;;  %3031 = vmatprep.subr.bf16.mxu1 %v2627_v46  ;;  %v731_v56 = vunpack.c.2.s8 %v4000_v6 }
  0x8c   :  { %3269 = vmatmul.mubr.bf16.vlgmr.msra.gmra.mrb[0].mxu0 %v74_v40  ;;  %v1115_v54 = vcvt.s32.f32 %v347_v48  ;;  %v1117_v55 = vcvt.s32.f32 %v349_v50  ;;  %v733_v49 = vunpack.c.3.s8 %v4000_v6  ;;  %v2274_v58 = vmul.f32 %v3856_v16, %v1494_v53 }
  0x8d   :  { %3277 = vmatprep.subr.bf16.mxu0 %v2819_v51  ;;  %v2626_v57 = vpack.c.bf16 %v1892_v52, %v1890_v47  ;;  %v2276_v59 = vmul.f32 %v3856_v16, %v1496_v42  ;;  %v346_v60 = vunpack.c.2.s8 %v4007_v19  ;;  %v1499_v63 = vcvt.s32.f32 %v731_v56 }
  0x8e   :  { %v1895_v61 = vmul.f32 %v3852_v9, %v1115_v54  ;;  %v1897_v62 = vmul.f32 %v3852_v9, %v1117_v55  ;;  %v1501_v0 = vcvt.s32.f32 %v733_v49  ;;  %v348_v7 = vunpack.c.3.s8 %v4007_v19 }
  0x8f   :  { %3032 = vmatpush1.bf16.msra.mxu1 %v2626_v57  ;;  %v2818_v5 = vpack.c.bf16 %v2276_v59, %v2274_v58  ;;  %v1114_v6 = vcvt.s32.f32 %v346_v60  ;;  %v730_v8 = vunpack.c.2.s8 %v198_v32  ;;  %v2279_v12 = vmul.f32 %v3852_v9, %v1499_v63 }
  0x90   :  { %v2629_v11 = vpack.c.bf16 %v1897_v62, %v1895_v61  ;;  %v2281_v14 = vmul.f32 %v3852_v9, %v1501_v0  ;;  %v732_v15 = vunpack.c.3.s8 %v198_v32  ;;  %v1116_v17 = vcvt.s32.f32 %v348_v7 }
  0x91   :  { %3278 = vmatpush1.bf16.msra.mxu0 %v2818_v5  ;;  %v1894_v18 = vmul.f32 %v3856_v16, %v1114_v6  ;;  %v1498_v13 = vcvt.s32.f32 %v730_v8  ;;  %v351_v20 = vunpack.c.0.s8 %v105_v4  ;;  %v353_v23 = vunpack.c.1.s8 %v105_v4  ;;  %v107_v5 = vld [vmem:[#allocation2 + $0xa8] sm:$0xff] }
  0x92   :  { %3033 = vmatprep.subr.bf16.mxu1 %v2629_v11  ;;  %v2821_v22 = vpack.c.bf16 %v2281_v14, %v2279_v12  ;;  %v1500_v19 = vcvt.s32.f32 %v732_v15  ;;  %v735_v24 = vunpack.c.0.s8 %v201_v10  ;;  %v1896_v25 = vmul.f32 %v3856_v16, %v1116_v17  ;;  %v203_v11 = vld [vmem:[#allocation2 + $0x3a8] sm:$0xff] }
  0x93   :  { %v2278_v26 = vmul.f32 %v3856_v16, %v1498_v13  ;;  %v1119_v27 = vcvt.s32.f32 %v351_v20  ;;  %v737_v28 = vunpack.c.1.s8 %v201_v10  ;;  %v1121_v30 = vcvt.s32.f32 %v353_v23 }
  0x94   :  { %3279 = vmatprep.subr.bf16.mxu0 %v2821_v22  ;;  %v2280_v29 = vmul.f32 %v3856_v16, %v1500_v19  ;;  %v1503_v31 = vcvt.s32.f32 %v735_v24  ;;  %v350_v32 = vunpack.c.0.s8 %v4035_v21  ;;  %v2628_v34 = vpack.c.bf16 %v1896_v25, %v1894_v18  ;;  %v4057_v19 = vld [vmem:[#allocation2 + $0xa0] sm:$0xff] }
  0x95   :  { %v1899_v35 = vmul.f32 %v3852_v9, %v1119_v27  ;;  %v1505_v36 = vcvt.s32.f32 %v737_v28  ;;  %v352_v37 = vunpack.c.1.s8 %v4035_v21  ;;  %v1901_v39 = vmul.f32 %v3852_v9, %v1121_v30 }
  0x96   :  { %v2820_v38 = vpack.c.bf16 %v2280_v29, %v2278_v26  ;;  %v2283_v40 = vmul.f32 %v3852_v9, %v1503_v31  ;;  %v1118_v41 = vcvt.s32.f32 %v350_v32  ;;  %3034 = vmatpush1.bf16.msra.mxu1 %v2628_v34  ;;  %v734_v45 = vunpack.c.0.s8 %v200_v33  ;;  %v202_v34 = vld [vmem:[#allocation2 + $0x3a0] sm:$0xff] }
  0x97   :  { %v2285_v43 = vmul.f32 %v3852_v9, %v1505_v36  ;;  %v1120_v44 = vcvt.s32.f32 %v352_v37  ;;  %v736_v46 = vunpack.c.1.s8 %v200_v33  ;;  %v2631_v47 = vpack.c.bf16 %v1901_v39, %v1899_v35 }
  0x98   :  { %3280 = vmatpush1.bf16.msra.mxu0 %v2820_v38  ;;  %v1898_v48 = vmul.f32 %v3856_v16, %v1118_v41  ;;  %v355_v50 = vunpack.c.2.s8 %v105_v4  ;;  %v357_v51 = vunpack.c.3.s8 %v105_v4  ;;  %v1502_v42 = vcvt.s32.f32 %v734_v45 }
  0x99   :  { %v2823_v52 = vpack.c.bf16 %v2285_v43, %v2283_v40  ;;  %v1900_v53 = vmul.f32 %v3856_v16, %v1120_v44  ;;  %v1504_v54 = vcvt.s32.f32 %v736_v46  ;;  %3035 = vmatprep.subr.bf16.mxu1 %v2631_v47  ;;  %v739_v49 = vunpack.c.2.s8 %v201_v10 }
  0x9a   :  { %v1123_v55 = vcvt.s32.f32 %v355_v50  ;;  %v1125_v56 = vcvt.s32.f32 %v357_v51  ;;  %v741_v57 = vunpack.c.3.s8 %v201_v10  ;;  %v2282_v59 = vmul.f32 %v3856_v16, %v1502_v42 }
  0x9b   :  { %3281 = vmatprep.subr.bf16.mxu0 %v2823_v52  ;;  %v2630_v58 = vpack.c.bf16 %v1900_v53, %v1898_v48  ;;  %v2284_v60 = vmul.f32 %v3856_v16, %v1504_v54  ;;  %v354_v61 = vunpack.c.2.s8 %v4035_v21  ;;  %v1507_v0 = vcvt.s32.f32 %v739_v49 }
  0x9c   :  { %v1903_v62 = vmul.f32 %v3852_v9, %v1123_v55  ;;  %v1905_v63 = vmul.f32 %v3852_v9, %v1125_v56  ;;  %v1509_v4 = vcvt.s32.f32 %v741_v57  ;;  %v356_v6 = vunpack.c.3.s8 %v4035_v21 }
  0x9d   :  { %3036 = vmatpush1.bf16.msra.mxu1 %v2630_v58  ;;  %v2822_v7 = vpack.c.bf16 %v2284_v60, %v2282_v59  ;;  %v1122_v8 = vcvt.s32.f32 %v354_v61  ;;  %v738_v10 = vunpack.c.2.s8 %v200_v33  ;;  %v2287_v14 = vmul.f32 %v3852_v9, %v1507_v0 }
  0x9e   :  { %v2633_v12 = vpack.c.bf16 %v1905_v63, %v1903_v62  ;;  %v2289_v15 = vmul.f32 %v3852_v9, %v1509_v4  ;;  %v740_v17 = vunpack.c.3.s8 %v200_v33  ;;  %v1124_v18 = vcvt.s32.f32 %v356_v6 }
  0x9f   :  { %3282 = vmatpush1.bf16.msra.mxu0 %v2822_v7  ;;  %v1902_v13 = vmul.f32 %v3856_v16, %v1122_v8  ;;  %v1506_v20 = vcvt.s32.f32 %v738_v10  ;;  %v359_v22 = vunpack.c.0.s8 %v107_v5  ;;  %v361_v24 = vunpack.c.1.s8 %v107_v5  ;;  %v109_v7 = vld [vmem:[#allocation2 + $0xb8] sm:$0xff] }
  0xa0   :  { %3037 = vmatprep.subr.bf16.mxu1 %v2633_v12  ;;  %v2825_v23 = vpack.c.bf16 %v2289_v15, %v2287_v14  ;;  %v1508_v21 = vcvt.s32.f32 %v740_v17  ;;  %v743_v25 = vunpack.c.0.s8 %v203_v11  ;;  %v1904_v26 = vmul.f32 %v3856_v16, %v1124_v18  ;;  %v205_v12 = vld [vmem:[#allocation2 + $0x3b8] sm:$0xff] }
  0xa1   :  { %v2286_v27 = vmul.f32 %v3856_v16, %v1506_v20  ;;  %v1127_v28 = vcvt.s32.f32 %v359_v22  ;;  %v745_v29 = vunpack.c.1.s8 %v203_v11  ;;  %v1129_v31 = vcvt.s32.f32 %v361_v24 }
  0xa2   :  { %3283 = vmatprep.subr.bf16.mxu0 %v2825_v23  ;;  %v2288_v30 = vmul.f32 %v3856_v16, %v1508_v21  ;;  %v1511_v32 = vcvt.s32.f32 %v743_v25  ;;  %v358_v33 = vunpack.c.0.s8 %v4057_v19  ;;  %v2632_v35 = vpack.c.bf16 %v1904_v26, %v1902_v13  ;;  %v4079_v21 = vld [vmem:[#allocation2 + $0xb0] sm:$0xff] }
  0xa3   :  { %v1907_v36 = vmul.f32 %v3852_v9, %v1127_v28  ;;  %v1513_v37 = vcvt.s32.f32 %v745_v29  ;;  %v360_v38 = vunpack.c.1.s8 %v4057_v19  ;;  %v1909_v40 = vmul.f32 %v3852_v9, %v1129_v31 }
  0xa4   :  { %v2824_v39 = vpack.c.bf16 %v2288_v30, %v2286_v27  ;;  %v2291_v41 = vmul.f32 %v3852_v9, %v1511_v32  ;;  %v1126_v43 = vcvt.s32.f32 %v358_v33  ;;  %3038 = vmatpush1.bf16.msra.mxu1 %v2632_v35  ;;  %v742_v46 = vunpack.c.0.s8 %v202_v34  ;;  %v204_v35 = vld [vmem:[#allocation2 + $0x3b0] sm:$0xff] }
  0xa5   :  { %v2293_v44 = vmul.f32 %v3852_v9, %v1513_v37  ;;  %v1128_v45 = vcvt.s32.f32 %v360_v38  ;;  %v744_v47 = vunpack.c.1.s8 %v202_v34  ;;  %v2635_v48 = vpack.c.bf16 %v1909_v40, %v1907_v36 }
  0xa6   :  { %3284 = vmatpush1.bf16.msra.mxu0 %v2824_v39  ;;  %v1906_v50 = vmul.f32 %v3856_v16, %v1126_v43  ;;  %v363_v51 = vunpack.c.2.s8 %v107_v5  ;;  %v365_v52 = vunpack.c.3.s8 %v107_v5  ;;  %v1510_v54 = vcvt.s32.f32 %v742_v46 }
  0xa7   :  { %v2827_v53 = vpack.c.bf16 %v2293_v44, %v2291_v41  ;;  %v1908_v42 = vmul.f32 %v3856_v16, %v1128_v45  ;;  %v1512_v55 = vcvt.s32.f32 %v744_v47  ;;  %3039 = vmatprep.subr.bf16.mxu1 %v2635_v48  ;;  %v747_v57 = vunpack.c.2.s8 %v203_v11 }
  0xa8   :  { %v1131_v56 = vcvt.s32.f32 %v363_v51  ;;  %v1133_v49 = vcvt.s32.f32 %v365_v52  ;;  %v749_v58 = vunpack.c.3.s8 %v203_v11  ;;  %v2290_v60 = vmul.f32 %v3856_v16, %v1510_v54 }
  0xa9   :  { %3285 = vmatprep.subr.bf16.mxu0 %v2827_v53  ;;  %v2634_v59 = vpack.c.bf16 %v1908_v42, %v1906_v50  ;;  %v2292_v61 = vmul.f32 %v3856_v16, %v1512_v55  ;;  %v362_v62 = vunpack.c.2.s8 %v4057_v19  ;;  %v1515_v4 = vcvt.s32.f32 %v747_v57 }
  0xaa   :  { %v1911_v63 = vmul.f32 %v3852_v9, %v1131_v56  ;;  %v1913_v0 = vmul.f32 %v3852_v9, %v1133_v49  ;;  %v1517_v5 = vcvt.s32.f32 %v749_v58  ;;  %v364_v8 = vunpack.c.3.s8 %v4057_v19 }
  0xab   :  { %3040 = vmatpush1.bf16.msra.mxu1 %v2634_v59  ;;  %v2826_v6 = vpack.c.bf16 %v2292_v61, %v2290_v60  ;;  %v1130_v10 = vcvt.s32.f32 %v362_v62  ;;  %v746_v11 = vunpack.c.2.s8 %v202_v34  ;;  %v2295_v15 = vmul.f32 %v3852_v9, %v1515_v4 }
  0xac   :  { %v2637_v14 = vpack.c.bf16 %v1913_v0, %v1911_v63  ;;  %v2297_v17 = vmul.f32 %v3852_v9, %v1517_v5  ;;  %v748_v18 = vunpack.c.3.s8 %v202_v34  ;;  %v1132_v13 = vcvt.s32.f32 %v364_v8 }
  0xad   :  { %3286 = vmatpush1.bf16.msra.mxu0 %v2826_v6  ;;  %v1910_v20 = vmul.f32 %v3856_v16, %v1130_v10  ;;  %v1514_v22 = vcvt.s32.f32 %v746_v11  ;;  %v367_v23 = vunpack.c.0.s8 %v109_v7  ;;  %v369_v25 = vunpack.c.1.s8 %v109_v7  ;;  %v111_v6 = vld [vmem:[#allocation2 + $0xc8] sm:$0xff] }
  0xae   :  { %3041 = vmatprep.subr.bf16.mxu1 %v2637_v14  ;;  %v2829_v24 = vpack.c.bf16 %v2297_v17, %v2295_v15  ;;  %v1516_v19 = vcvt.s32.f32 %v748_v18  ;;  %v751_v26 = vunpack.c.0.s8 %v205_v12  ;;  %v1912_v27 = vmul.f32 %v3856_v16, %v1132_v13  ;;  %v207_v14 = vld [vmem:[#allocation2 + $0x3c8] sm:$0xff] }
  0xaf   :  { %v2294_v28 = vmul.f32 %v3856_v16, %v1514_v22  ;;  %v1135_v29 = vcvt.s32.f32 %v367_v23  ;;  %v753_v30 = vunpack.c.1.s8 %v205_v12  ;;  %v1137_v32 = vcvt.s32.f32 %v369_v25 }
  0xb0   :  { %3287 = vmatprep.subr.bf16.mxu0 %v2829_v24  ;;  %v2296_v31 = vmul.f32 %v3856_v16, %v1516_v19  ;;  %v1519_v33 = vcvt.s32.f32 %v751_v26  ;;  %v366_v34 = vunpack.c.0.s8 %v4079_v21  ;;  %v2636_v36 = vpack.c.bf16 %v1912_v27, %v1910_v20  ;;  %v4101_v19 = vld [vmem:[#allocation2 + $0xc0] sm:$0xff] }
  0xb1   :  { %v1915_v37 = vmul.f32 %v3852_v9, %v1135_v29  ;;  %v1521_v38 = vcvt.s32.f32 %v753_v30  ;;  %v368_v39 = vunpack.c.1.s8 %v4079_v21  ;;  %v1917_v41 = vmul.f32 %v3852_v9, %v1137_v32 }
  0xb2   :  { %v2828_v40 = vpack.c.bf16 %v2296_v31, %v2294_v28  ;;  %v2299_v43 = vmul.f32 %v3852_v9, %v1519_v33  ;;  %v1134_v44 = vcvt.s32.f32 %v366_v34  ;;  %3042 = vmatpush1.bf16.msra.mxu1 %v2636_v36  ;;  %v750_v47 = vunpack.c.0.s8 %v204_v35  ;;  %v206_v36 = vld [vmem:[#allocation2 + $0x3c0] sm:$0xff] }
  0xb3   :  { %v2301_v45 = vmul.f32 %v3852_v9, %v1521_v38  ;;  %v1136_v46 = vcvt.s32.f32 %v368_v39  ;;  %v752_v48 = vunpack.c.1.s8 %v204_v35  ;;  %v2639_v50 = vpack.c.bf16 %v1917_v41, %v1915_v37 }
  0xb4   :  { %3288 = vmatpush1.bf16.msra.mxu0 %v2828_v40  ;;  %v1914_v51 = vmul.f32 %v3856_v16, %v1134_v44  ;;  %v371_v52 = vunpack.c.2.s8 %v109_v7  ;;  %v373_v53 = vunpack.c.3.s8 %v109_v7  ;;  %v1518_v55 = vcvt.s32.f32 %v750_v47 }
  0xb5   :  { %v2831_v42 = vpack.c.bf16 %v2301_v45, %v2299_v43  ;;  %v1916_v54 = vmul.f32 %v3856_v16, %v1136_v46  ;;  %v1520_v56 = vcvt.s32.f32 %v752_v48  ;;  %3043 = vmatprep.subr.bf16.mxu1 %v2639_v50  ;;  %v755_v58 = vunpack.c.2.s8 %v205_v12 }
  0xb6   :  { %v1139_v49 = vcvt.s32.f32 %v371_v52  ;;  %v1141_v57 = vcvt.s32.f32 %v373_v53  ;;  %v757_v59 = vunpack.c.3.s8 %v205_v12  ;;  %v2298_v61 = vmul.f32 %v3856_v16, %v1518_v55 }
  0xb7   :  { %3289 = vmatprep.subr.bf16.mxu0 %v2831_v42  ;;  %v2638_v60 = vpack.c.bf16 %v1916_v54, %v1914_v51  ;;  %v2300_v62 = vmul.f32 %v3856_v16, %v1520_v56  ;;  %v370_v63 = vunpack.c.2.s8 %v4079_v21  ;;  %v1523_v5 = vcvt.s32.f32 %v755_v58 }
  0xb8   :  { %v1919_v0 = vmul.f32 %v3852_v9, %v1139_v49  ;;  %v1921_v4 = vmul.f32 %v3852_v9, %v1141_v57  ;;  %v1525_v7 = vcvt.s32.f32 %v757_v59  ;;  %v372_v10 = vunpack.c.3.s8 %v4079_v21 }
  0xb9   :  { %3044 = vmatpush1.bf16.msra.mxu1 %v2638_v60  ;;  %v2830_v8 = vpack.c.bf16 %v2300_v62, %v2298_v61  ;;  %v1138_v11 = vcvt.s32.f32 %v370_v63  ;;  %v754_v12 = vunpack.c.2.s8 %v204_v35  ;;  %v2303_v17 = vmul.f32 %v3852_v9, %v1523_v5 }
  0xba   :  { %v2641_v15 = vpack.c.bf16 %v1921_v4, %v1919_v0  ;;  %v2305_v18 = vmul.f32 %v3852_v9, %v1525_v7  ;;  %v756_v13 = vunpack.c.3.s8 %v204_v35  ;;  %v1140_v20 = vcvt.s32.f32 %v372_v10 }
  0xbb   :  { %3290 = vmatpush1.bf16.msra.mxu0 %v2830_v8  ;;  %v1918_v22 = vmul.f32 %v3856_v16, %v1138_v11  ;;  %v1522_v23 = vcvt.s32.f32 %v754_v12  ;;  %v375_v24 = vunpack.c.0.s8 %v111_v6  ;;  %v377_v26 = vunpack.c.1.s8 %v111_v6  ;;  %v113_v8 = vld [vmem:[#allocation2 + $0xd8] sm:$0xff] }
  0xbc   :  { %3045 = vmatprep.subr.bf16.mxu1 %v2641_v15  ;;  %v2833_v25 = vpack.c.bf16 %v2305_v18, %v2303_v17  ;;  %v1524_v21 = vcvt.s32.f32 %v756_v13  ;;  %v759_v27 = vunpack.c.0.s8 %v207_v14  ;;  %v1920_v28 = vmul.f32 %v3856_v16, %v1140_v20  ;;  %v209_v15 = vld [vmem:[#allocation2 + $0x3d8] sm:$0xff] }
  0xbd   :  { %v2302_v29 = vmul.f32 %v3856_v16, %v1522_v23  ;;  %v1143_v30 = vcvt.s32.f32 %v375_v24  ;;  %v761_v31 = vunpack.c.1.s8 %v207_v14  ;;  %v1145_v33 = vcvt.s32.f32 %v377_v26 }
  0xbe   :  { %3291 = vmatprep.subr.bf16.mxu0 %v2833_v25  ;;  %v2304_v32 = vmul.f32 %v3856_v16, %v1524_v21  ;;  %v1527_v34 = vcvt.s32.f32 %v759_v27  ;;  %v374_v35 = vunpack.c.0.s8 %v4101_v19  ;;  %v2640_v37 = vpack.c.bf16 %v1920_v28, %v1918_v22  ;;  %v4123_v21 = vld [vmem:[#allocation2 + $0xd0] sm:$0xff] }
  0xbf   :  { %v1923_v38 = vmul.f32 %v3852_v9, %v1143_v30  ;;  %v1529_v39 = vcvt.s32.f32 %v761_v31  ;;  %v376_v40 = vunpack.c.1.s8 %v4101_v19  ;;  %v1925_v43 = vmul.f32 %v3852_v9, %v1145_v33 }
  0xc0   :  { %v2832_v41 = vpack.c.bf16 %v2304_v32, %v2302_v29  ;;  %v2307_v44 = vmul.f32 %v3852_v9, %v1527_v34  ;;  %v1142_v45 = vcvt.s32.f32 %v374_v35  ;;  %3046 = vmatpush1.bf16.msra.mxu1 %v2640_v37  ;;  %v758_v48 = vunpack.c.0.s8 %v206_v36  ;;  %v208_v37 = vld [vmem:[#allocation2 + $0x3d0] sm:$0xff] }
  0xc1   :  { %v2309_v46 = vmul.f32 %v3852_v9, %v1529_v39  ;;  %v1144_v47 = vcvt.s32.f32 %v376_v40  ;;  %v760_v50 = vunpack.c.1.s8 %v206_v36  ;;  %v2643_v51 = vpack.c.bf16 %v1925_v43, %v1923_v38 }
  0xc2   :  { %3292 = vmatpush1.bf16.msra.mxu0 %v2832_v41  ;;  %v1922_v52 = vmul.f32 %v3856_v16, %v1142_v45  ;;  %v379_v53 = vunpack.c.2.s8 %v111_v6  ;;  %v381_v42 = vunpack.c.3.s8 %v111_v6  ;;  %v1526_v56 = vcvt.s32.f32 %v758_v48 }
  0xc3   :  { %v2835_v54 = vpack.c.bf16 %v2309_v46, %v2307_v44  ;;  %v1924_v55 = vmul.f32 %v3856_v16, %v1144_v47  ;;  %v1528_v49 = vcvt.s32.f32 %v760_v50  ;;  %3047 = vmatprep.subr.bf16.mxu1 %v2643_v51  ;;  %v763_v59 = vunpack.c.2.s8 %v207_v14 }
  0xc4   :  { %v1147_v57 = vcvt.s32.f32 %v379_v53  ;;  %v1149_v58 = vcvt.s32.f32 %v381_v42  ;;  %v765_v60 = vunpack.c.3.s8 %v207_v14  ;;  %v2306_v62 = vmul.f32 %v3856_v16, %v1526_v56 }
  0xc5   :  { %3293 = vmatprep.subr.bf16.mxu0 %v2835_v54  ;;  %v2642_v61 = vpack.c.bf16 %v1924_v55, %v1922_v52  ;;  %v2308_v63 = vmul.f32 %v3856_v16, %v1528_v49  ;;  %v378_v0 = vunpack.c.2.s8 %v4101_v19  ;;  %v1531_v7 = vcvt.s32.f32 %v763_v59 }
  0xc6   :  { %v1927_v4 = vmul.f32 %v3852_v9, %v1147_v57  ;;  %v1929_v5 = vmul.f32 %v3852_v9, %v1149_v58  ;;  %v1533_v6 = vcvt.s32.f32 %v765_v60  ;;  %v380_v11 = vunpack.c.3.s8 %v4101_v19 }
  0xc7   :  { %3048 = vmatpush1.bf16.msra.mxu1 %v2642_v61  ;;  %v2834_v10 = vpack.c.bf16 %v2308_v63, %v2306_v62  ;;  %v1146_v12 = vcvt.s32.f32 %v378_v0  ;;  %v762_v14 = vunpack.c.2.s8 %v206_v36  ;;  %v2311_v18 = vmul.f32 %v3852_v9, %v1531_v7 }
  0xc8   :  { %v2645_v17 = vpack.c.bf16 %v1929_v5, %v1927_v4  ;;  %v2313_v13 = vmul.f32 %v3852_v9, %v1533_v6  ;;  %v764_v20 = vunpack.c.3.s8 %v206_v36  ;;  %v1148_v22 = vcvt.s32.f32 %v380_v11 }
  0xc9   :  { %3294 = vmatpush1.bf16.msra.mxu0 %v2834_v10  ;;  %v1926_v23 = vmul.f32 %v3856_v16, %v1146_v12  ;;  %v1530_v24 = vcvt.s32.f32 %v762_v14  ;;  %v383_v25 = vunpack.c.0.s8 %v113_v8  ;;  %v385_v27 = vunpack.c.1.s8 %v113_v8  ;;  %v115_v10 = vld [vmem:[#allocation2 + $0xe8] sm:$0xff] }
  0xca   :  { %3049 = vmatprep.subr.bf16.mxu1 %v2645_v17  ;;  %v2837_v26 = vpack.c.bf16 %v2313_v13, %v2311_v18  ;;  %v1532_v19 = vcvt.s32.f32 %v764_v20  ;;  %v767_v28 = vunpack.c.0.s8 %v209_v15  ;;  %v1928_v29 = vmul.f32 %v3856_v16, %v1148_v22  ;;  %v211_v17 = vld [vmem:[#allocation2 + $0x3e8] sm:$0xff] }
  0xcb   :  { %v2310_v30 = vmul.f32 %v3856_v16, %v1530_v24  ;;  %v1151_v31 = vcvt.s32.f32 %v383_v25  ;;  %v769_v32 = vunpack.c.1.s8 %v209_v15  ;;  %v1153_v34 = vcvt.s32.f32 %v385_v27 }
  0xcc   :  { %3295 = vmatprep.subr.bf16.mxu0 %v2837_v26  ;;  %v2312_v33 = vmul.f32 %v3856_v16, %v1532_v19  ;;  %v1535_v35 = vcvt.s32.f32 %v767_v28  ;;  %v382_v36 = vunpack.c.0.s8 %v4123_v21  ;;  %v2644_v38 = vpack.c.bf16 %v1928_v29, %v1926_v23  ;;  %v4145_v19 = vld [vmem:[#allocation2 + $0xe0] sm:$0xff] }
  0xcd   :  { %v1931_v39 = vmul.f32 %v3852_v9, %v1151_v31  ;;  %v1537_v40 = vcvt.s32.f32 %v769_v32  ;;  %v384_v41 = vunpack.c.1.s8 %v4123_v21  ;;  %v1933_v44 = vmul.f32 %v3852_v9, %v1153_v34 }
  0xce   :  { %v2836_v43 = vpack.c.bf16 %v2312_v33, %v2310_v30  ;;  %v2315_v45 = vmul.f32 %v3852_v9, %v1535_v35  ;;  %v1150_v46 = vcvt.s32.f32 %v382_v36  ;;  %3050 = vmatpush1.bf16.msra.mxu1 %v2644_v38  ;;  %v766_v50 = vunpack.c.0.s8 %v208_v37  ;;  %v210_v38 = vld [vmem:[#allocation2 + $0x3e0] sm:$0xff] }
  0xcf   :  { %v2317_v47 = vmul.f32 %v3852_v9, %v1537_v40  ;;  %v1152_v48 = vcvt.s32.f32 %v384_v41  ;;  %v768_v51 = vunpack.c.1.s8 %v208_v37  ;;  %v2647_v52 = vpack.c.bf16 %v1933_v44, %v1931_v39 }
  0xd0   :  { %3296 = vmatpush1.bf16.msra.mxu0 %v2836_v43  ;;  %v1930_v53 = vmul.f32 %v3856_v16, %v1150_v46  ;;  %v387_v42 = vunpack.c.2.s8 %v113_v8  ;;  %v389_v54 = vunpack.c.3.s8 %v113_v8  ;;  %v1534_v49 = vcvt.s32.f32 %v766_v50 }
  0xd1   :  { %v2839_v55 = vpack.c.bf16 %v2317_v47, %v2315_v45  ;;  %v1932_v56 = vmul.f32 %v3856_v16, %v1152_v48  ;;  %v1536_v57 = vcvt.s32.f32 %v768_v51  ;;  %3051 = vmatprep.subr.bf16.mxu1 %v2647_v52  ;;  %v771_v60 = vunpack.c.2.s8 %v209_v15 }
  0xd2   :  { %v1155_v58 = vcvt.s32.f32 %v387_v42  ;;  %v1157_v59 = vcvt.s32.f32 %v389_v54  ;;  %v773_v61 = vunpack.c.3.s8 %v209_v15  ;;  %v2314_v63 = vmul.f32 %v3856_v16, %v1534_v49 }
  0xd3   :  { %3297 = vmatprep.subr.bf16.mxu0 %v2839_v55  ;;  %v2646_v62 = vpack.c.bf16 %v1932_v56, %v1930_v53  ;;  %v2316_v0 = vmul.f32 %v3856_v16, %v1536_v57  ;;  %v386_v4 = vunpack.c.2.s8 %v4123_v21  ;;  %v1539_v6 = vcvt.s32.f32 %v771_v60 }
  0xd4   :  { %v1935_v5 = vmul.f32 %v3852_v9, %v1155_v58  ;;  %v1937_v7 = vmul.f32 %v3852_v9, %v1157_v59  ;;  %v1541_v8 = vcvt.s32.f32 %v773_v61  ;;  %v388_v12 = vunpack.c.3.s8 %v4123_v21 }
  0xd5   :  { %3052 = vmatpush1.bf16.msra.mxu1 %v2646_v62  ;;  %v2838_v11 = vpack.c.bf16 %v2316_v0, %v2314_v63  ;;  %v1154_v14 = vcvt.s32.f32 %v386_v4  ;;  %v770_v15 = vunpack.c.2.s8 %v208_v37  ;;  %v2319_v13 = vmul.f32 %v3852_v9, %v1539_v6 }
  0xd6   :  { %v2649_v18 = vpack.c.bf16 %v1937_v7, %v1935_v5  ;;  %v2321_v20 = vmul.f32 %v3852_v9, %v1541_v8  ;;  %v772_v22 = vunpack.c.3.s8 %v208_v37  ;;  %v1156_v23 = vcvt.s32.f32 %v388_v12 }
  0xd7   :  { %3298 = vmatpush1.bf16.msra.mxu0 %v2838_v11  ;;  %v1934_v24 = vmul.f32 %v3856_v16, %v1154_v14  ;;  %v1538_v25 = vcvt.s32.f32 %v770_v15  ;;  %v391_v26 = vunpack.c.0.s8 %v115_v10  ;;  %v393_v28 = vunpack.c.1.s8 %v115_v10  ;;  %v117_v11 = vld [vmem:[#allocation2 + $0xf8] sm:$0xff] }
  0xd8   :  { %3053 = vmatprep.subr.bf16.mxu1 %v2649_v18  ;;  %v2841_v27 = vpack.c.bf16 %v2321_v20, %v2319_v13  ;;  %v1540_v21 = vcvt.s32.f32 %v772_v22  ;;  %v775_v29 = vunpack.c.0.s8 %v211_v17  ;;  %v1936_v30 = vmul.f32 %v3856_v16, %v1156_v23  ;;  %v213_v18 = vld [vmem:[#allocation2 + $0x3f8] sm:$0xff] }
  0xd9   :  { %v2318_v31 = vmul.f32 %v3856_v16, %v1538_v25  ;;  %v1159_v32 = vcvt.s32.f32 %v391_v26  ;;  %v777_v33 = vunpack.c.1.s8 %v211_v17  ;;  %v1161_v35 = vcvt.s32.f32 %v393_v28 }
  0xda   :  { %3299 = vmatprep.subr.bf16.mxu0 %v2841_v27  ;;  %v2320_v34 = vmul.f32 %v3856_v16, %v1540_v21  ;;  %v1543_v36 = vcvt.s32.f32 %v775_v29  ;;  %v390_v37 = vunpack.c.0.s8 %v4145_v19  ;;  %v2648_v39 = vpack.c.bf16 %v1936_v30, %v1934_v24  ;;  %v4167_v21 = vld [vmem:[#allocation2 + $0xf0] sm:$0xff] }
  0xdb   :  { %v1939_v40 = vmul.f32 %v3852_v9, %v1159_v32  ;;  %v1545_v41 = vcvt.s32.f32 %v777_v33  ;;  %v392_v43 = vunpack.c.1.s8 %v4145_v19  ;;  %v1941_v45 = vmul.f32 %v3852_v9, %v1161_v35 }
  0xdc   :  { %v2840_v44 = vpack.c.bf16 %v2320_v34, %v2318_v31  ;;  %v2323_v46 = vmul.f32 %v3852_v9, %v1543_v36  ;;  %v1158_v47 = vcvt.s32.f32 %v390_v37  ;;  %3054 = vmatpush1.bf16.msra.mxu1 %v2648_v39  ;;  %v774_v51 = vunpack.c.0.s8 %v210_v38  ;;  %v212_v39 = vld [vmem:[#allocation2 + $0x3f0] sm:$0xff] }
  0xdd   :  { %v2325_v48 = vmul.f32 %v3852_v9, %v1545_v41  ;;  %v1160_v50 = vcvt.s32.f32 %v392_v43  ;;  %v776_v52 = vunpack.c.1.s8 %v210_v38  ;;  %v2651_v53 = vpack.c.bf16 %v1941_v45, %v1939_v40 }
  0xde   :  { %3300 = vmatpush1.bf16.msra.mxu0 %v2840_v44  ;;  %v1938_v42 = vmul.f32 %v3856_v16, %v1158_v47  ;;  %v395_v54 = vunpack.c.2.s8 %v115_v10  ;;  %v397_v55 = vunpack.c.3.s8 %v115_v10  ;;  %v1542_v57 = vcvt.s32.f32 %v774_v51 }
  0xdf   :  { %v2843_v56 = vpack.c.bf16 %v2325_v48, %v2323_v46  ;;  %v1940_v49 = vmul.f32 %v3856_v16, %v1160_v50  ;;  %v1544_v58 = vcvt.s32.f32 %v776_v52  ;;  %3055 = vmatprep.subr.bf16.mxu1 %v2651_v53  ;;  %v779_v61 = vunpack.c.2.s8 %v211_v17 }
  0xe0   :  { %v1163_v59 = vcvt.s32.f32 %v395_v54  ;;  %v1165_v60 = vcvt.s32.f32 %v397_v55  ;;  %v781_v62 = vunpack.c.3.s8 %v211_v17  ;;  %v2322_v0 = vmul.f32 %v3856_v16, %v1542_v57 }
  0xe1   :  { %3301 = vmatprep.subr.bf16.mxu0 %v2843_v56  ;;  %v2650_v63 = vpack.c.bf16 %v1940_v49, %v1938_v42  ;;  %v2324_v4 = vmul.f32 %v3856_v16, %v1544_v58  ;;  %v394_v5 = vunpack.c.2.s8 %v4145_v19  ;;  %v1547_v8 = vcvt.s32.f32 %v779_v61 }
  0xe2   :  { %v1943_v7 = vmul.f32 %v3852_v9, %v1163_v59  ;;  %v1945_v6 = vmul.f32 %v3852_v9, %v1165_v60  ;;  %v1549_v10 = vcvt.s32.f32 %v781_v62  ;;  %v396_v14 = vunpack.c.3.s8 %v4145_v19 }
  0xe3   :  { %3056 = vmatpush1.bf16.msra.mxu1 %v2650_v63  ;;  %v2842_v12 = vpack.c.bf16 %v2324_v4, %v2322_v0  ;;  %v1162_v15 = vcvt.s32.f32 %v394_v5  ;;  %v778_v17 = vunpack.c.2.s8 %v210_v38  ;;  %v2327_v20 = vmul.f32 %v3852_v9, %v1547_v8 }
  0xe4   :  { %v2653_v13 = vpack.c.bf16 %v1945_v6, %v1943_v7  ;;  %v2329_v22 = vmul.f32 %v3852_v9, %v1549_v10  ;;  %v780_v23 = vunpack.c.3.s8 %v210_v38  ;;  %v1164_v24 = vcvt.s32.f32 %v396_v14 }
  0xe5   :  { %3302 = vmatpush1.bf16.msra.mxu0 %v2842_v12  ;;  %v1942_v25 = vmul.f32 %v3856_v16, %v1162_v15  ;;  %v1546_v26 = vcvt.s32.f32 %v778_v17  ;;  %v399_v27 = vunpack.c.0.s8 %v117_v11  ;;  %v401_v29 = vunpack.c.1.s8 %v117_v11  ;;  %v41_v12 = vld [vmem:[%s5035_s0 + $0x18] sm:$0xff] }
  0xe6   :  { %3057 = vmatprep.subr.bf16.mxu1 %v2653_v13  ;;  %v2845_v28 = vpack.c.bf16 %v2329_v22, %v2327_v20  ;;  %v1548_v19 = vcvt.s32.f32 %v780_v23  ;;  %v783_v30 = vunpack.c.0.s8 %v213_v18  ;;  %v1944_v31 = vmul.f32 %v3856_v16, %v1164_v24  ;;  %v4189_v13 = vld [vmem:[#allocation2 + $0x108] sm:$0xff] }
  0xe7   :  { %v2326_v32 = vmul.f32 %v3856_v16, %v1546_v26  ;;  %v1167_v33 = vcvt.s32.f32 %v399_v27  ;;  %v785_v34 = vunpack.c.1.s8 %v213_v18  ;;  %v1169_v36 = vcvt.s32.f32 %v401_v29  ;;  %v4196_v26 = vld [vmem:[#allocation2 + $0x408] sm:$0xff] }
  0xe8   :  { %3303 = vmatprep.subr.bf16.mxu0 %v2845_v28  ;;  %v2328_v35 = vmul.f32 %v3856_v16, %v1548_v19  ;;  %v1551_v37 = vcvt.s32.f32 %v783_v30  ;;  %v398_v38 = vunpack.c.0.s8 %v4167_v21  ;;  %v2652_v40 = vpack.c.bf16 %v1944_v31, %v1942_v25  ;;  %v53_v25 = vld [vmem:[%s5035_s0 + $0x78] sm:$0xff] }
  0xe9   :  { %v1947_v41 = vmul.f32 %v3852_v9, %v1167_v33  ;;  %v1553_v43 = vcvt.s32.f32 %v785_v34  ;;  %v400_v44 = vunpack.c.1.s8 %v4167_v21  ;;  %v1949_v46 = vmul.f32 %v3852_v9, %v1169_v36  ;;  %v40_v33 = vld [vmem:[%s5035_s0 + $0x10] sm:$0xff]  ;;  %v4204_v34 = vld [vmem:[#allocation2 + $0x100] sm:$0xff] }
  0xea   :  { %v2844_v45 = vpack.c.bf16 %v2328_v35, %v2326_v32  ;;  %v2331_v47 = vmul.f32 %v3852_v9, %v1551_v37  ;;  %v1166_v48 = vcvt.s32.f32 %v398_v38  ;;  %3058 = vmatpush1.bf16.msra.mxu1 %v2652_v40  ;;  %v782_v52 = vunpack.c.0.s8 %v212_v39 }
  0xeb   :  { %v2333_v50 = vmul.f32 %v3852_v9, %v1553_v43  ;;  %v1168_v51 = vcvt.s32.f32 %v400_v44  ;;  %v784_v53 = vunpack.c.1.s8 %v212_v39  ;;  %v2655_v42 = vpack.c.bf16 %v1949_v46, %v1947_v41  ;;  %v52_v44 = vld [vmem:[%s5035_s0 + $0x70] sm:$0xff] }
  0xec   :  { %3304 = vmatpush1.bf16.msra.mxu0 %v2844_v45  ;;  %v1946_v54 = vmul.f32 %v3856_v16, %v1166_v48  ;;  %v403_v55 = vunpack.c.2.s8 %v117_v11  ;;  %v405_v56 = vunpack.c.3.s8 %v117_v11  ;;  %v1550_v58 = vcvt.s32.f32 %v782_v52 }
  0xed   :  { %v2847_v49 = vpack.c.bf16 %v2333_v50, %v2331_v47  ;;  %v1948_v57 = vmul.f32 %v3856_v16, %v1168_v51  ;;  %v1552_v59 = vcvt.s32.f32 %v784_v53  ;;  %3059 = vmatprep.subr.bf16.mxu1 %v2655_v42  ;;  %v787_v62 = vunpack.c.2.s8 %v213_v18  ;;  %v214_v50 = vld [vmem:[#allocation2 + $0x400] sm:$0xff] }
  0xee   :  { %v1171_v60 = vcvt.s32.f32 %v403_v55  ;;  %v1173_v61 = vcvt.s32.f32 %v405_v56  ;;  %v789_v63 = vunpack.c.3.s8 %v213_v18  ;;  %v2330_v4 = vmul.f32 %v3856_v16, %v1550_v58 }
  0xef   :  { %3305 = vmatprep.subr.bf16.mxu0 %v2847_v49  ;;  %v2654_v0 = vpack.c.bf16 %v1948_v57, %v1946_v54  ;;  %v2332_v5 = vmul.f32 %v3856_v16, %v1552_v59  ;;  %v402_v7 = vunpack.c.2.s8 %v4167_v21  ;;  %v1555_v10 = vcvt.s32.f32 %v787_v62 }
  0xf0   :  { %v1951_v6 = vmul.f32 %v3852_v9, %v1171_v60  ;;  %v1953_v8 = vmul.f32 %v3852_v9, %v1173_v61  ;;  %v1557_v11 = vcvt.s32.f32 %v789_v63  ;;  %v404_v15 = vunpack.c.3.s8 %v4167_v21 }
  0xf1   :  { %3060 = vmatpush1.bf16.msra.mxu1 %v2654_v0  ;;  %v2846_v14 = vpack.c.bf16 %v2332_v5, %v2330_v4  ;;  %v1170_v17 = vcvt.s32.f32 %v402_v7  ;;  %v786_v18 = vunpack.c.2.s8 %v212_v39  ;;  %v2335_v22 = vmul.f32 %v3852_v9, %v1555_v10 }
  0xf2   :  { %v2657_v20 = vpack.c.bf16 %v1953_v8, %v1951_v6  ;;  %v2337_v23 = vmul.f32 %v3852_v9, %v1557_v11  ;;  %v788_v24 = vunpack.c.3.s8 %v212_v39  ;;  %v1172_v27 = vcvt.s32.f32 %v404_v15 }
  0xf3   :  { %3306 = vmatpush1.bf16.msra.mxu0 %v2846_v14  ;;  %v1950_v21 = vmul.f32 %v3856_v16, %v1170_v17  ;;  %v1554_v28 = vcvt.s32.f32 %v786_v18  ;;  %v65_v19 = vpack.c.bf16 %v41_v12, %v41_v12  ;;  %v407_v31 = vunpack.c.0.s8 %v4189_v13 }
  0xf4   :  { %3061 = vmatprep.subr.bf16.mxu1 %v2657_v20  ;;  %v2849_v29 = vpack.c.bf16 %v2337_v23, %v2335_v22  ;;  %v1556_v30 = vcvt.s32.f32 %v788_v24  ;;  %v409_v32 = vunpack.c.1.s8 %v4189_v13  ;;  %v1952_v35 = vmul.f32 %v3856_v16, %v1172_v27  ;;  %v121_v24 = vld [vmem:[#allocation2 + $0x118] sm:$0xff] }
  0xf5   :  { %v2334_v36 = vmul.f32 %v3856_v16, %v1554_v28  ;;  %3063 = vmatprep.mubr.bf16.mxu1 %v65_v19  ;;  %v77_v37 = vpack.c.bf16 %v53_v25, %v53_v25  ;;  %v791_v38 = vunpack.c.0.s8 %v4196_v26  ;;  %v1175_v40 = vcvt.s32.f32 %v407_v31  ;;  %v217_v28 = vld [vmem:[#allocation2 + $0x418] sm:$0xff] }
  0xf6   :  { %3307 = vmatprep.subr.bf16.mxu0 %v2849_v29  ;;  %v2336_v39 = vmul.f32 %v3856_v16, %v1556_v30  ;;  %v1177_v41 = vcvt.s32.f32 %v409_v32  ;;  %v793_v43 = vunpack.c.1.s8 %v4196_v26  ;;  %v2656_v45 = vpack.c.bf16 %v1952_v35, %v1950_v21 }
  0xf7   :  { %3309 = vmatprep.mubr.bf16.mxu0 %v77_v37  ;;  %v1559_v46 = vcvt.s32.f32 %v791_v38  ;;  %v64_v47 = vpack.c.bf16 %v40_v33, %v40_v33  ;;  %v406_v48 = vunpack.c.0.s8 %v4204_v34  ;;  %v1955_v52 = vmul.f32 %v3852_v9, %v1175_v40  ;;  %v4235_v37 = vld [vmem:[#allocation2 + $0x110] sm:$0xff] }
  0xf8   :  { %v2848_v51 = vpack.c.bf16 %v2336_v39, %v2334_v36  ;;  %v1957_v53 = vmul.f32 %v3852_v9, %v1177_v41  ;;  %v1561_v42 = vcvt.s32.f32 %v793_v43  ;;  %3062 = vmatpush1.bf16.msra.mxu1 %v2656_v45  ;;  %v408_v55 = vunpack.c.1.s8 %v4204_v34 }
  0xf9   :  { %v2339_v54 = vmul.f32 %v3852_v9, %v1559_v46  ;;  %v1174_v56 = vcvt.s32.f32 %v406_v48  ;;  %v76_v49 = vpack.c.bf16 %v52_v44, %v52_v44  ;;  %v790_v59 = vunpack.c.0.s8 %v214_v50 }
  0xfa   :  { %3308 = vmatpush1.bf16.msra.mxu0 %v2848_v51  ;;  %v2659_v57 = vpack.c.bf16 %v1957_v53, %v1955_v52  ;;  %v2341_v58 = vmul.f32 %v3852_v9, %v1561_v42  ;;  %v792_v60 = vunpack.c.1.s8 %v214_v50  ;;  %v1176_v61 = vcvt.s32.f32 %v408_v55  ;;  %v216_v51 = vld [vmem:[#allocation2 + $0x410] sm:$0xff] }
  0xfb   :  { %v1954_v62 = vmul.f32 %v3856_v16, %v1174_v56  ;;  %v411_v63 = vunpack.c.2.s8 %v4189_v13  ;;  %v413_v0 = vunpack.c.3.s8 %v4189_v13  ;;  %3064 = vmatmul.mubr.bf16.vlgmr.msra.gmra.mrb[0].mxu1 %v64_v47  ;;  %v1558_v5 = vcvt.s32.f32 %v790_v59 }
  0xfc   :  { %3072 = vmatprep.subr.bf16.mxu1 %v2659_v57  ;;  %v2851_v4 = vpack.c.bf16 %v2341_v58, %v2339_v54  ;;  %v1560_v7 = vcvt.s32.f32 %v792_v60  ;;  %v795_v6 = vunpack.c.2.s8 %v4196_v26  ;;  %v1956_v8 = vmul.f32 %v3856_v16, %v1176_v61 }
  0xfd   :  { %3310 = vmatmul.mubr.bf16.vlgmr.msra.gmra.mrb[0].mxu0 %v76_v49  ;;  %v1179_v10 = vcvt.s32.f32 %v411_v63  ;;  %v1181_v11 = vcvt.s32.f32 %v413_v0  ;;  %v797_v12 = vunpack.c.3.s8 %v4196_v26  ;;  %v2338_v14 = vmul.f32 %v3856_v16, %v1558_v5 }
  0xfe   :  { %3318 = vmatprep.subr.bf16.mxu0 %v2851_v4  ;;  %v2340_v15 = vmul.f32 %v3856_v16, %v1560_v7  ;;  %v1563_v17 = vcvt.s32.f32 %v795_v6  ;;  %v410_v18 = vunpack.c.2.s8 %v4204_v34  ;;  %v2658_v13 = vpack.c.bf16 %v1956_v8, %v1954_v62 }
  0xff   :  { %v1959_v20 = vmul.f32 %v3852_v9, %v1179_v10  ;;  %v1961_v22 = vmul.f32 %v3852_v9, %v1181_v11  ;;  %v1565_v23 = vcvt.s32.f32 %v797_v12  ;;  %v412_v26 = vunpack.c.3.s8 %v4204_v34 }
 0x100   :  { %v2850_v25 = vpack.c.bf16 %v2340_v15, %v2338_v14  ;;  %v2343_v27 = vmul.f32 %v3852_v9, %v1563_v17  ;;  %v1178_v21 = vcvt.s32.f32 %v410_v18  ;;  %3073 = vmatpush1.bf16.msra.mxu1 %v2658_v13  ;;  %v794_v30 = vunpack.c.2.s8 %v214_v50 }
 0x101   :  { %v2661_v19 = vpack.c.bf16 %v1961_v22, %v1959_v20  ;;  %v2345_v29 = vmul.f32 %v3852_v9, %v1565_v23  ;;  %v796_v31 = vunpack.c.3.s8 %v214_v50  ;;  %v1180_v32 = vcvt.s32.f32 %v412_v26 }
 0x102   :  { %3319 = vmatpush1.bf16.msra.mxu0 %v2850_v25  ;;  %v1958_v33 = vmul.f32 %v3856_v16, %v1178_v21  ;;  %v415_v35 = vunpack.c.0.s8 %v121_v24  ;;  %v417_v36 = vunpack.c.1.s8 %v121_v24  ;;  %v1562_v39 = vcvt.s32.f32 %v794_v30  ;;  %v123_v25 = vld [vmem:[#allocation2 + $0x128] sm:$0xff] }
 0x103   :  { %3074 = vmatprep.subr.bf16.mxu1 %v2661_v19  ;;  %v2853_v38 = vpack.c.bf16 %v2345_v29, %v2343_v27  ;;  %v1564_v34 = vcvt.s32.f32 %v796_v31  ;;  %v799_v40 = vunpack.c.0.s8 %v217_v28  ;;  %v1960_v41 = vmul.f32 %v3856_v16, %v1180_v32  ;;  %v219_v19 = vld [vmem:[#allocation2 + $0x428] sm:$0xff] }
 0x104   :  { %v1183_v43 = vcvt.s32.f32 %v415_v35  ;;  %v1185_v44 = vcvt.s32.f32 %v417_v36  ;;  %v801_v45 = vunpack.c.1.s8 %v217_v28  ;;  %v2342_v46 = vmul.f32 %v3856_v16, %v1562_v39  ;;  %v4257_v39 = vld [vmem:[#allocation2 + $0x120] sm:$0xff] }
 0x105   :  { %3320 = vmatprep.subr.bf16.mxu0 %v2853_v38  ;;  %v2344_v47 = vmul.f32 %v3856_v16, %v1564_v34  ;;  %v1567_v48 = vcvt.s32.f32 %v799_v40  ;;  %v414_v50 = vunpack.c.0.s8 %v4235_v37  ;;  %v2660_v52 = vpack.c.bf16 %v1960_v41, %v1958_v33 }
 0x106   :  { %v1963_v53 = vmul.f32 %v3852_v9, %v1183_v43  ;;  %v1965_v42 = vmul.f32 %v3852_v9, %v1185_v44  ;;  %v1569_v54 = vcvt.s32.f32 %v801_v45  ;;  %v416_v49 = vunpack.c.1.s8 %v4235_v37 }
 0x107   :  { %v2852_v55 = vpack.c.bf16 %v2344_v47, %v2342_v46  ;;  %v2347_v56 = vmul.f32 %v3852_v9, %v1567_v48  ;;  %v1182_v57 = vcvt.s32.f32 %v414_v50  ;;  %3075 = vmatpush1.bf16.msra.mxu1 %v2660_v52  ;;  %v798_v60 = vunpack.c.0.s8 %v216_v51  ;;  %v218_v52 = vld [vmem:[#allocation2 + $0x420] sm:$0xff] }
 0x108   :  { %v2663_v58 = vpack.c.bf16 %v1965_v42, %v1963_v53  ;;  %v2349_v59 = vmul.f32 %v3852_v9, %v1569_v54  ;;  %v800_v61 = vunpack.c.1.s8 %v216_v51  ;;  %v1184_v62 = vcvt.s32.f32 %v416_v49 }
 0x109   :  { %3321 = vmatpush1.bf16.msra.mxu0 %v2852_v55  ;;  %v1962_v63 = vmul.f32 %v3856_v16, %v1182_v57  ;;  %v419_v0 = vunpack.c.2.s8 %v121_v24  ;;  %v421_v4 = vunpack.c.3.s8 %v121_v24  ;;  %v1566_v7 = vcvt.s32.f32 %v798_v60 }
 0x10a   :  { %3076 = vmatprep.subr.bf16.mxu1 %v2663_v58  ;;  %v2855_v5 = vpack.c.bf16 %v2349_v59, %v2347_v56  ;;  %v1568_v6 = vcvt.s32.f32 %v800_v61  ;;  %v803_v8 = vunpack.c.2.s8 %v217_v28  ;;  %v1964_v10 = vmul.f32 %v3856_v16, %v1184_v62 }
 0x10b   :  { %v1187_v11 = vcvt.s32.f32 %v419_v0  ;;  %v1189_v12 = vcvt.s32.f32 %v421_v4  ;;  %v805_v14 = vunpack.c.3.s8 %v217_v28  ;;  %v2346_v15 = vmul.f32 %v3856_v16, %v1566_v7 }
 0x10c   :  { %3322 = vmatprep.subr.bf16.mxu0 %v2855_v5  ;;  %v2348_v17 = vmul.f32 %v3856_v16, %v1568_v6  ;;  %v1571_v18 = vcvt.s32.f32 %v803_v8  ;;  %v418_v13 = vunpack.c.2.s8 %v4235_v37  ;;  %v2662_v20 = vpack.c.bf16 %v1964_v10, %v1962_v63 }
 0x10d   :  { %v1967_v22 = vmul.f32 %v3852_v9, %v1187_v11  ;;  %v1969_v23 = vmul.f32 %v3852_v9, %v1189_v12  ;;  %v1573_v24 = vcvt.s32.f32 %v805_v14  ;;  %v420_v21 = vunpack.c.3.s8 %v4235_v37 }
 0x10e   :  { %v2854_v27 = vpack.c.bf16 %v2348_v17, %v2346_v15  ;;  %v2351_v26 = vmul.f32 %v3852_v9, %v1571_v18  ;;  %v1186_v28 = vcvt.s32.f32 %v418_v13  ;;  %3077 = vmatpush1.bf16.msra.mxu1 %v2662_v20  ;;  %v802_v31 = vunpack.c.2.s8 %v216_v51 }
 0x10f   :  { %v2665_v29 = vpack.c.bf16 %v1969_v23, %v1967_v22  ;;  %v2353_v30 = vmul.f32 %v3852_v9, %v1573_v24  ;;  %v804_v32 = vunpack.c.3.s8 %v216_v51  ;;  %v1188_v33 = vcvt.s32.f32 %v420_v21 }
 0x110   :  { %3323 = vmatpush1.bf16.msra.mxu0 %v2854_v27  ;;  %v1966_v35 = vmul.f32 %v3856_v16, %v1186_v28  ;;  %v423_v36 = vunpack.c.0.s8 %v123_v25  ;;  %v425_v38 = vunpack.c.1.s8 %v123_v25  ;;  %v1570_v40 = vcvt.s32.f32 %v802_v31  ;;  %v125_v27 = vld [vmem:[#allocation2 + $0x138] sm:$0xff] }
 0x111   :  { %3078 = vmatprep.subr.bf16.mxu1 %v2665_v29  ;;  %v2857_v34 = vpack.c.bf16 %v2353_v30, %v2351_v26  ;;  %v1572_v37 = vcvt.s32.f32 %v804_v32  ;;  %v807_v41 = vunpack.c.0.s8 %v219_v19  ;;  %v1968_v43 = vmul.f32 %v3856_v16, %v1188_v33  ;;  %v221_v29 = vld [vmem:[#allocation2 + $0x438] sm:$0xff] }
 0x112   :  { %v1191_v44 = vcvt.s32.f32 %v423_v36  ;;  %v1193_v45 = vcvt.s32.f32 %v425_v38  ;;  %v809_v46 = vunpack.c.1.s8 %v219_v19  ;;  %v2350_v47 = vmul.f32 %v3856_v16, %v1570_v40  ;;  %v4279_v40 = vld [vmem:[#allocation2 + $0x130] sm:$0xff] }
 0x113   :  { %3324 = vmatprep.subr.bf16.mxu0 %v2857_v34  ;;  %v2352_v48 = vmul.f32 %v3856_v16, %v1572_v37  ;;  %v1575_v50 = vcvt.s32.f32 %v807_v41  ;;  %v422_v51 = vunpack.c.0.s8 %v4257_v39  ;;  %v2664_v53 = vpack.c.bf16 %v1968_v43, %v1966_v35 }
 0x114   :  { %v1971_v42 = vmul.f32 %v3852_v9, %v1191_v44  ;;  %v1973_v54 = vmul.f32 %v3852_v9, %v1193_v45  ;;  %v1577_v55 = vcvt.s32.f32 %v809_v46  ;;  %v424_v57 = vunpack.c.1.s8 %v4257_v39 }
 0x115   :  { %v2856_v56 = vpack.c.bf16 %v2352_v48, %v2350_v47  ;;  %v2355_v49 = vmul.f32 %v3852_v9, %v1575_v50  ;;  %v1190_v58 = vcvt.s32.f32 %v422_v51  ;;  %3079 = vmatpush1.bf16.msra.mxu1 %v2664_v53  ;;  %v806_v61 = vunpack.c.0.s8 %v218_v52  ;;  %v220_v53 = vld [vmem:[#allocation2 + $0x430] sm:$0xff] }
 0x116   :  { %v2667_v59 = vpack.c.bf16 %v1973_v54, %v1971_v42  ;;  %v2357_v60 = vmul.f32 %v3852_v9, %v1577_v55  ;;  %v808_v62 = vunpack.c.1.s8 %v218_v52  ;;  %v1192_v63 = vcvt.s32.f32 %v424_v57 }
 0x117   :  { %3325 = vmatpush1.bf16.msra.mxu0 %v2856_v56  ;;  %v1970_v0 = vmul.f32 %v3856_v16, %v1190_v58  ;;  %v427_v4 = vunpack.c.2.s8 %v123_v25  ;;  %v429_v5 = vunpack.c.3.s8 %v123_v25  ;;  %v1574_v6 = vcvt.s32.f32 %v806_v61 }
 0x118   :  { %3080 = vmatprep.subr.bf16.mxu1 %v2667_v59  ;;  %v2859_v7 = vpack.c.bf16 %v2357_v60, %v2355_v49  ;;  %v1576_v8 = vcvt.s32.f32 %v808_v62  ;;  %v811_v10 = vunpack.c.2.s8 %v219_v19  ;;  %v1972_v11 = vmul.f32 %v3856_v16, %v1192_v63 }
 0x119   :  { %v1195_v12 = vcvt.s32.f32 %v427_v4  ;;  %v1197_v14 = vcvt.s32.f32 %v429_v5  ;;  %v813_v15 = vunpack.c.3.s8 %v219_v19  ;;  %v2354_v17 = vmul.f32 %v3856_v16, %v1574_v6 }
 0x11a   :  { %3326 = vmatprep.subr.bf16.mxu0 %v2859_v7  ;;  %v2356_v18 = vmul.f32 %v3856_v16, %v1576_v8  ;;  %v1579_v13 = vcvt.s32.f32 %v811_v10  ;;  %v426_v20 = vunpack.c.2.s8 %v4257_v39  ;;  %v2666_v22 = vpack.c.bf16 %v1972_v11, %v1970_v0 }
 0x11b   :  { %v1975_v23 = vmul.f32 %v3852_v9, %v1195_v12  ;;  %v1977_v24 = vmul.f32 %v3852_v9, %v1197_v14  ;;  %v1581_v25 = vcvt.s32.f32 %v813_v15  ;;  %v428_v28 = vunpack.c.3.s8 %v4257_v39 }
 0x11c   :  { %v2858_v26 = vpack.c.bf16 %v2356_v18, %v2354_v17  ;;  %v2359_v21 = vmul.f32 %v3852_v9, %v1579_v13  ;;  %v1194_v19 = vcvt.s32.f32 %v426_v20  ;;  %3081 = vmatpush1.bf16.msra.mxu1 %v2666_v22  ;;  %v810_v32 = vunpack.c.2.s8 %v218_v52 }
 0x11d   :  { %v2669_v30 = vpack.c.bf16 %v1977_v24, %v1975_v23  ;;  %v2361_v31 = vmul.f32 %v3852_v9, %v1581_v25  ;;  %v812_v33 = vunpack.c.3.s8 %v218_v52  ;;  %v1196_v35 = vcvt.s32.f32 %v428_v28 }
 0x11e   :  { %3327 = vmatpush1.bf16.msra.mxu0 %v2858_v26  ;;  %v1974_v36 = vmul.f32 %v3856_v16, %v1194_v19  ;;  %v431_v38 = vunpack.c.0.s8 %v125_v27  ;;  %v433_v34 = vunpack.c.1.s8 %v125_v27  ;;  %v1578_v41 = vcvt.s32.f32 %v810_v32  ;;  %v127_v26 = vld [vmem:[#allocation2 + $0x148] sm:$0xff] }
 0x11f   :  { %3082 = vmatprep.subr.bf16.mxu1 %v2669_v30  ;;  %v2861_v37 = vpack.c.bf16 %v2361_v31, %v2359_v21  ;;  %v1580_v39 = vcvt.s32.f32 %v812_v33  ;;  %v815_v43 = vunpack.c.0.s8 %v221_v29  ;;  %v1976_v44 = vmul.f32 %v3856_v16, %v1196_v35  ;;  %v223_v30 = vld [vmem:[#allocation2 + $0x448] sm:$0xff] }
 0x120   :  { %v1199_v45 = vcvt.s32.f32 %v431_v38  ;;  %v1201_v46 = vcvt.s32.f32 %v433_v34  ;;  %v817_v47 = vunpack.c.1.s8 %v221_v29  ;;  %v2358_v48 = vmul.f32 %v3856_v16, %v1578_v41  ;;  %v4301_v41 = vld [vmem:[#allocation2 + $0x140] sm:$0xff] }
 0x121   :  { %3328 = vmatprep.subr.bf16.mxu0 %v2861_v37  ;;  %v2360_v50 = vmul.f32 %v3856_v16, %v1580_v39  ;;  %v1583_v51 = vcvt.s32.f32 %v815_v43  ;;  %v430_v52 = vunpack.c.0.s8 %v4279_v40  ;;  %v2668_v42 = vpack.c.bf16 %v1976_v44, %v1974_v36 }
 0x122   :  { %v1979_v54 = vmul.f32 %v3852_v9, %v1199_v45  ;;  %v1981_v55 = vmul.f32 %v3852_v9, %v1201_v46  ;;  %v1585_v56 = vcvt.s32.f32 %v817_v47  ;;  %v432_v58 = vunpack.c.1.s8 %v4279_v40 }
 0x123   :  { %v2860_v49 = vpack.c.bf16 %v2360_v50, %v2358_v48  ;;  %v2363_v57 = vmul.f32 %v3852_v9, %v1583_v51  ;;  %v1198_v59 = vcvt.s32.f32 %v430_v52  ;;  %3083 = vmatpush1.bf16.msra.mxu1 %v2668_v42  ;;  %v814_v62 = vunpack.c.0.s8 %v220_v53  ;;  %v222_v42 = vld [vmem:[#allocation2 + $0x440] sm:$0xff] }
 0x124   :  { %v2671_v60 = vpack.c.bf16 %v1981_v55, %v1979_v54  ;;  %v2365_v61 = vmul.f32 %v3852_v9, %v1585_v56  ;;  %v816_v63 = vunpack.c.1.s8 %v220_v53  ;;  %v1200_v0 = vcvt.s32.f32 %v432_v58 }
 0x125   :  { %3329 = vmatpush1.bf16.msra.mxu0 %v2860_v49  ;;  %v1978_v4 = vmul.f32 %v3856_v16, %v1198_v59  ;;  %v435_v5 = vunpack.c.2.s8 %v125_v27  ;;  %v437_v7 = vunpack.c.3.s8 %v125_v27  ;;  %v1582_v8 = vcvt.s32.f32 %v814_v62 }
 0x126   :  { %3084 = vmatprep.subr.bf16.mxu1 %v2671_v60  ;;  %v2863_v6 = vpack.c.bf16 %v2365_v61, %v2363_v57  ;;  %v1584_v10 = vcvt.s32.f32 %v816_v63  ;;  %v819_v11 = vunpack.c.2.s8 %v221_v29  ;;  %v1980_v12 = vmul.f32 %v3856_v16, %v1200_v0 }
 0x127   :  { %v1203_v14 = vcvt.s32.f32 %v435_v5  ;;  %v1205_v15 = vcvt.s32.f32 %v437_v7  ;;  %v821_v17 = vunpack.c.3.s8 %v221_v29  ;;  %v2362_v18 = vmul.f32 %v3856_v16, %v1582_v8 }
 0x128   :  { %3330 = vmatprep.subr.bf16.mxu0 %v2863_v6  ;;  %v2364_v13 = vmul.f32 %v3856_v16, %v1584_v10  ;;  %v1587_v20 = vcvt.s32.f32 %v819_v11  ;;  %v434_v22 = vunpack.c.2.s8 %v4279_v40  ;;  %v2670_v23 = vpack.c.bf16 %v1980_v12, %v1978_v4 }
 0x129   :  { %v1983_v24 = vmul.f32 %v3852_v9, %v1203_v14  ;;  %v1985_v25 = vmul.f32 %v3852_v9, %v1205_v15  ;;  %v1589_v27 = vcvt.s32.f32 %v821_v17  ;;  %v436_v19 = vunpack.c.3.s8 %v4279_v40 }
 0x12a   :  { %v2862_v21 = vpack.c.bf16 %v2364_v13, %v2362_v18  ;;  %v2367_v28 = vmul.f32 %v3852_v9, %v1587_v20  ;;  %v1202_v29 = vcvt.s32.f32 %v434_v22  ;;  %3085 = vmatpush1.bf16.msra.mxu1 %v2670_v23  ;;  %v818_v33 = vunpack.c.2.s8 %v220_v53 }
 0x12b   :  { %v2673_v31 = vpack.c.bf16 %v1985_v25, %v1983_v24  ;;  %v2369_v32 = vmul.f32 %v3852_v9, %v1589_v27  ;;  %v820_v35 = vunpack.c.3.s8 %v220_v53  ;;  %v1204_v36 = vcvt.s32.f32 %v436_v19 }
 0x12c   :  { %3331 = vmatpush1.bf16.msra.mxu0 %v2862_v21  ;;  %v1982_v38 = vmul.f32 %v3856_v16, %v1202_v29  ;;  %v439_v34 = vunpack.c.0.s8 %v127_v26  ;;  %v441_v37 = vunpack.c.1.s8 %v127_v26  ;;  %v1586_v43 = vcvt.s32.f32 %v818_v33  ;;  %v129_v21 = vld [vmem:[#allocation2 + $0x158] sm:$0xff] }
 0x12d   :  { %3086 = vmatprep.subr.bf16.mxu1 %v2673_v31  ;;  %v2865_v39 = vpack.c.bf16 %v2369_v32, %v2367_v28  ;;  %v1588_v40 = vcvt.s32.f32 %v820_v35  ;;  %v823_v44 = vunpack.c.0.s8 %v223_v30  ;;  %v1984_v45 = vmul.f32 %v3856_v16, %v1204_v36  ;;  %v225_v31 = vld [vmem:[#allocation2 + $0x458] sm:$0xff] }
 0x12e   :  { %v1207_v46 = vcvt.s32.f32 %v439_v34  ;;  %v1209_v47 = vcvt.s32.f32 %v441_v37  ;;  %v825_v48 = vunpack.c.1.s8 %v223_v30  ;;  %v2366_v50 = vmul.f32 %v3856_v16, %v1586_v43  ;;  %v4323_v43 = vld [vmem:[#allocation2 + $0x150] sm:$0xff] }
 0x12f   :  { %3332 = vmatprep.subr.bf16.mxu0 %v2865_v39  ;;  %v2368_v51 = vmul.f32 %v3856_v16, %v1588_v40  ;;  %v1591_v52 = vcvt.s32.f32 %v823_v44  ;;  %v438_v53 = vunpack.c.0.s8 %v4301_v41  ;;  %v2672_v54 = vpack.c.bf16 %v1984_v45, %v1982_v38 }
 0x130   :  { %v1987_v55 = vmul.f32 %v3852_v9, %v1207_v46  ;;  %v1989_v56 = vmul.f32 %v3852_v9, %v1209_v47  ;;  %v1593_v49 = vcvt.s32.f32 %v825_v48  ;;  %v440_v59 = vunpack.c.1.s8 %v4301_v41 }
 0x131   :  { %v2864_v57 = vpack.c.bf16 %v2368_v51, %v2366_v50  ;;  %v2371_v58 = vmul.f32 %v3852_v9, %v1591_v52  ;;  %v1206_v60 = vcvt.s32.f32 %v438_v53  ;;  %3087 = vmatpush1.bf16.msra.mxu1 %v2672_v54  ;;  %v822_v63 = vunpack.c.0.s8 %v222_v42  ;;  %v224_v54 = vld [vmem:[#allocation2 + $0x450] sm:$0xff] }
 0x132   :  { %v2675_v61 = vpack.c.bf16 %v1989_v56, %v1987_v55  ;;  %v2373_v62 = vmul.f32 %v3852_v9, %v1593_v49  ;;  %v824_v0 = vunpack.c.1.s8 %v222_v42  ;;  %v1208_v4 = vcvt.s32.f32 %v440_v59 }
 0x133   :  { %3333 = vmatpush1.bf16.msra.mxu0 %v2864_v57  ;;  %v1986_v5 = vmul.f32 %v3856_v16, %v1206_v60  ;;  %v443_v7 = vunpack.c.2.s8 %v127_v26  ;;  %v445_v6 = vunpack.c.3.s8 %v127_v26  ;;  %v1590_v10 = vcvt.s32.f32 %v822_v63 }
 0x134   :  { %3088 = vmatprep.subr.bf16.mxu1 %v2675_v61  ;;  %v2867_v8 = vpack.c.bf16 %v2373_v62, %v2371_v58  ;;  %v1592_v11 = vcvt.s32.f32 %v824_v0  ;;  %v827_v12 = vunpack.c.2.s8 %v223_v30  ;;  %v1988_v14 = vmul.f32 %v3856_v16, %v1208_v4 }
 0x135   :  { %v1211_v15 = vcvt.s32.f32 %v443_v7  ;;  %v1213_v17 = vcvt.s32.f32 %v445_v6  ;;  %v829_v18 = vunpack.c.3.s8 %v223_v30  ;;  %v2370_v13 = vmul.f32 %v3856_v16, %v1590_v10 }
 0x136   :  { %3334 = vmatprep.subr.bf16.mxu0 %v2867_v8  ;;  %v2372_v20 = vmul.f32 %v3856_v16, %v1592_v11  ;;  %v1595_v22 = vcvt.s32.f32 %v827_v12  ;;  %v442_v23 = vunpack.c.2.s8 %v4301_v41  ;;  %v2674_v24 = vpack.c.bf16 %v1988_v14, %v1986_v5 }
 0x137   :  { %v1991_v25 = vmul.f32 %v3852_v9, %v1211_v15  ;;  %v1993_v27 = vmul.f32 %v3852_v9, %v1213_v17  ;;  %v1597_v26 = vcvt.s32.f32 %v829_v18  ;;  %v444_v29 = vunpack.c.3.s8 %v4301_v41 }
 0x138   :  { %v2866_v28 = vpack.c.bf16 %v2372_v20, %v2370_v13  ;;  %v2375_v19 = vmul.f32 %v3852_v9, %v1595_v22  ;;  %v1210_v30 = vcvt.s32.f32 %v442_v23  ;;  %3089 = vmatpush1.bf16.msra.mxu1 %v2674_v24  ;;  %v826_v35 = vunpack.c.2.s8 %v222_v42 }
 0x139   :  { %v2677_v32 = vpack.c.bf16 %v1993_v27, %v1991_v25  ;;  %v2377_v33 = vmul.f32 %v3852_v9, %v1597_v26  ;;  %v828_v36 = vunpack.c.3.s8 %v222_v42  ;;  %v1212_v38 = vcvt.s32.f32 %v444_v29 }
 0x13a   :  { %3335 = vmatpush1.bf16.msra.mxu0 %v2866_v28  ;;  %v1990_v34 = vmul.f32 %v3856_v16, %v1210_v30  ;;  %v447_v37 = vunpack.c.0.s8 %v129_v21  ;;  %v449_v39 = vunpack.c.1.s8 %v129_v21  ;;  %v1594_v44 = vcvt.s32.f32 %v826_v35  ;;  %v131_v28 = vld [vmem:[#allocation2 + $0x168] sm:$0xff] }
 0x13b   :  { %3090 = vmatprep.subr.bf16.mxu1 %v2677_v32  ;;  %v2869_v40 = vpack.c.bf16 %v2377_v33, %v2375_v19  ;;  %v1596_v41 = vcvt.s32.f32 %v828_v36  ;;  %v831_v45 = vunpack.c.0.s8 %v225_v31  ;;  %v1992_v46 = vmul.f32 %v3856_v16, %v1212_v38  ;;  %v227_v32 = vld [vmem:[#allocation2 + $0x468] sm:$0xff] }
 0x13c   :  { %v1215_v47 = vcvt.s32.f32 %v447_v37  ;;  %v1217_v48 = vcvt.s32.f32 %v449_v39  ;;  %v833_v50 = vunpack.c.1.s8 %v225_v31  ;;  %v2374_v51 = vmul.f32 %v3856_v16, %v1594_v44  ;;  %v4345_v44 = vld [vmem:[#allocation2 + $0x160] sm:$0xff] }
 0x13d   :  { %3336 = vmatprep.subr.bf16.mxu0 %v2869_v40  ;;  %v2376_v52 = vmul.f32 %v3856_v16, %v1596_v41  ;;  %v1599_v53 = vcvt.s32.f32 %v831_v45  ;;  %v446_v42 = vunpack.c.0.s8 %v4323_v43  ;;  %v2676_v55 = vpack.c.bf16 %v1992_v46, %v1990_v34 }
 0x13e   :  { %v1995_v56 = vmul.f32 %v3852_v9, %v1215_v47  ;;  %v1997_v49 = vmul.f32 %v3852_v9, %v1217_v48  ;;  %v1601_v57 = vcvt.s32.f32 %v833_v50  ;;  %v448_v60 = vunpack.c.1.s8 %v4323_v43 }
 0x13f   :  { %v2868_v58 = vpack.c.bf16 %v2376_v52, %v2374_v51  ;;  %v2379_v59 = vmul.f32 %v3852_v9, %v1599_v53  ;;  %v1214_v61 = vcvt.s32.f32 %v446_v42  ;;  %3091 = vmatpush1.bf16.msra.mxu1 %v2676_v55  ;;  %v830_v0 = vunpack.c.0.s8 %v224_v54  ;;  %v226_v55 = vld [vmem:[#allocation2 + $0x460] sm:$0xff] }
 0x140   :  { %v2679_v62 = vpack.c.bf16 %v1997_v49, %v1995_v56  ;;  %v2381_v63 = vmul.f32 %v3852_v9, %v1601_v57  ;;  %v832_v4 = vunpack.c.1.s8 %v224_v54  ;;  %v1216_v5 = vcvt.s32.f32 %v448_v60 }
 0x141   :  { %3337 = vmatpush1.bf16.msra.mxu0 %v2868_v58  ;;  %v1994_v7 = vmul.f32 %v3856_v16, %v1214_v61  ;;  %v451_v6 = vunpack.c.2.s8 %v129_v21  ;;  %v453_v8 = vunpack.c.3.s8 %v129_v21  ;;  %v1598_v11 = vcvt.s32.f32 %v830_v0 }
 0x142   :  { %3092 = vmatprep.subr.bf16.mxu1 %v2679_v62  ;;  %v2871_v10 = vpack.c.bf16 %v2381_v63, %v2379_v59  ;;  %v1600_v12 = vcvt.s32.f32 %v832_v4  ;;  %v835_v14 = vunpack.c.2.s8 %v225_v31  ;;  %v1996_v15 = vmul.f32 %v3856_v16, %v1216_v5 }
 0x143   :  { %v1219_v17 = vcvt.s32.f32 %v451_v6  ;;  %v1221_v18 = vcvt.s32.f32 %v453_v8  ;;  %v837_v13 = vunpack.c.3.s8 %v225_v31  ;;  %v2378_v20 = vmul.f32 %v3856_v16, %v1598_v11 }
 0x144   :  { %3338 = vmatprep.subr.bf16.mxu0 %v2871_v10  ;;  %v2380_v22 = vmul.f32 %v3856_v16, %v1600_v12  ;;  %v1603_v23 = vcvt.s32.f32 %v835_v14  ;;  %v450_v24 = vunpack.c.2.s8 %v4323_v43  ;;  %v2678_v25 = vpack.c.bf16 %v1996_v15, %v1994_v7 }
 0x145   :  { %v1999_v27 = vmul.f32 %v3852_v9, %v1219_v17  ;;  %v2001_v26 = vmul.f32 %v3852_v9, %v1221_v18  ;;  %v1605_v21 = vcvt.s32.f32 %v837_v13  ;;  %v452_v30 = vunpack.c.3.s8 %v4323_v43 }
 0x146   :  { %v2870_v19 = vpack.c.bf16 %v2380_v22, %v2378_v20  ;;  %v2383_v29 = vmul.f32 %v3852_v9, %v1603_v23  ;;  %v1218_v31 = vcvt.s32.f32 %v450_v24  ;;  %3093 = vmatpush1.bf16.msra.mxu1 %v2678_v25  ;;  %v834_v36 = vunpack.c.2.s8 %v224_v54 }
 0x147   :  { %v2681_v33 = vpack.c.bf16 %v2001_v26, %v1999_v27  ;;  %v2385_v35 = vmul.f32 %v3852_v9, %v1605_v21  ;;  %v836_v38 = vunpack.c.3.s8 %v224_v54  ;;  %v1220_v34 = vcvt.s32.f32 %v452_v30 }
 0x148   :  { %3339 = vmatpush1.bf16.msra.mxu0 %v2870_v19  ;;  %v1998_v37 = vmul.f32 %v3856_v16, %v1218_v31  ;;  %v455_v39 = vunpack.c.0.s8 %v131_v28  ;;  %v457_v40 = vunpack.c.1.s8 %v131_v28  ;;  %v1602_v45 = vcvt.s32.f32 %v834_v36  ;;  %v133_v19 = vld [vmem:[#allocation2 + $0x178] sm:$0xff] }
 0x149   :  { %3094 = vmatprep.subr.bf16.mxu1 %v2681_v33  ;;  %v2873_v41 = vpack.c.bf16 %v2385_v35, %v2383_v29  ;;  %v1604_v43 = vcvt.s32.f32 %v836_v38  ;;  %v839_v46 = vunpack.c.0.s8 %v227_v32  ;;  %v2000_v47 = vmul.f32 %v3856_v16, %v1220_v34  ;;  %v229_v33 = vld [vmem:[#allocation2 + $0x478] sm:$0xff] }
 0x14a   :  { %v1223_v48 = vcvt.s32.f32 %v455_v39  ;;  %v1225_v50 = vcvt.s32.f32 %v457_v40  ;;  %v841_v51 = vunpack.c.1.s8 %v227_v32  ;;  %v2382_v52 = vmul.f32 %v3856_v16, %v1602_v45  ;;  %v4367_v45 = vld [vmem:[#allocation2 + $0x170] sm:$0xff] }
 0x14b   :  { %3340 = vmatprep.subr.bf16.mxu0 %v2873_v41  ;;  %v2384_v53 = vmul.f32 %v3856_v16, %v1604_v43  ;;  %v1607_v42 = vcvt.s32.f32 %v839_v46  ;;  %v454_v54 = vunpack.c.0.s8 %v4345_v44  ;;  %v2680_v56 = vpack.c.bf16 %v2000_v47, %v1998_v37 }
 0x14c   :  { %v2003_v49 = vmul.f32 %v3852_v9, %v1223_v48  ;;  %v2005_v57 = vmul.f32 %v3852_v9, %v1225_v50  ;;  %v1609_v58 = vcvt.s32.f32 %v841_v51  ;;  %v456_v61 = vunpack.c.1.s8 %v4345_v44 }
 0x14d   :  { %v2872_v59 = vpack.c.bf16 %v2384_v53, %v2382_v52  ;;  %v2387_v60 = vmul.f32 %v3852_v9, %v1607_v42  ;;  %v1222_v62 = vcvt.s32.f32 %v454_v54  ;;  %3095 = vmatpush1.bf16.msra.mxu1 %v2680_v56  ;;  %v838_v4 = vunpack.c.0.s8 %v226_v55  ;;  %v228_v56 = vld [vmem:[#allocation2 + $0x470] sm:$0xff] }
 0x14e   :  { %v2683_v63 = vpack.c.bf16 %v2005_v57, %v2003_v49  ;;  %v2389_v0 = vmul.f32 %v3852_v9, %v1609_v58  ;;  %v840_v5 = vunpack.c.1.s8 %v226_v55  ;;  %v1224_v7 = vcvt.s32.f32 %v456_v61 }
 0x14f   :  { %3341 = vmatpush1.bf16.msra.mxu0 %v2872_v59  ;;  %v2002_v6 = vmul.f32 %v3856_v16, %v1222_v62  ;;  %v459_v8 = vunpack.c.2.s8 %v131_v28  ;;  %v461_v10 = vunpack.c.3.s8 %v131_v28  ;;  %v1606_v12 = vcvt.s32.f32 %v838_v4 }
 0x150   :  { %3096 = vmatprep.subr.bf16.mxu1 %v2683_v63  ;;  %v2875_v11 = vpack.c.bf16 %v2389_v0, %v2387_v60  ;;  %v1608_v14 = vcvt.s32.f32 %v840_v5  ;;  %v843_v15 = vunpack.c.2.s8 %v227_v32  ;;  %v2004_v17 = vmul.f32 %v3856_v16, %v1224_v7 }
 0x151   :  { %v1227_v18 = vcvt.s32.f32 %v459_v8  ;;  %v1229_v13 = vcvt.s32.f32 %v461_v10  ;;  %v845_v20 = vunpack.c.3.s8 %v227_v32  ;;  %v2386_v22 = vmul.f32 %v3856_v16, %v1606_v12 }
 0x152   :  { %3342 = vmatprep.subr.bf16.mxu0 %v2875_v11  ;;  %v2388_v23 = vmul.f32 %v3856_v16, %v1608_v14  ;;  %v1611_v24 = vcvt.s32.f32 %v843_v15  ;;  %v458_v25 = vunpack.c.2.s8 %v4345_v44  ;;  %v2682_v27 = vpack.c.bf16 %v2004_v17, %v2002_v6 }
 0x153   :  { %v2007_v26 = vmul.f32 %v3852_v9, %v1227_v18  ;;  %v2009_v21 = vmul.f32 %v3852_v9, %v1229_v13  ;;  %v1613_v28 = vcvt.s32.f32 %v845_v20  ;;  %v460_v31 = vunpack.c.3.s8 %v4345_v44 }
 0x154   :  { %v2874_v29 = vpack.c.bf16 %v2388_v23, %v2386_v22  ;;  %v2391_v30 = vmul.f32 %v3852_v9, %v1611_v24  ;;  %v1226_v32 = vcvt.s32.f32 %v458_v25  ;;  %3097 = vmatpush1.bf16.msra.mxu1 %v2682_v27  ;;  %v842_v38 = vunpack.c.2.s8 %v226_v55 }
 0x155   :  { %v2685_v35 = vpack.c.bf16 %v2009_v21, %v2007_v26  ;;  %v2393_v36 = vmul.f32 %v3852_v9, %v1613_v28  ;;  %v844_v34 = vunpack.c.3.s8 %v226_v55  ;;  %v1228_v37 = vcvt.s32.f32 %v460_v31 }
 0x156   :  { %3343 = vmatpush1.bf16.msra.mxu0 %v2874_v29  ;;  %v2006_v39 = vmul.f32 %v3856_v16, %v1226_v32  ;;  %v463_v40 = vunpack.c.0.s8 %v133_v19  ;;  %v465_v41 = vunpack.c.1.s8 %v133_v19  ;;  %v1610_v46 = vcvt.s32.f32 %v842_v38  ;;  %v43_v29 = vld [vmem:[%s5035_s0 + $0x28] sm:$0xff] }
 0x157   :  { %3098 = vmatprep.subr.bf16.mxu1 %v2685_v35  ;;  %v2877_v43 = vpack.c.bf16 %v2393_v36, %v2391_v30  ;;  %v1612_v44 = vcvt.s32.f32 %v844_v34  ;;  %v847_v47 = vunpack.c.0.s8 %v229_v33  ;;  %v2008_v48 = vmul.f32 %v3856_v16, %v1228_v37  ;;  %v4388_v30 = vld [vmem:[#allocation2 + $0x188] sm:$0xff] }
 0x158   :  { %v1231_v50 = vcvt.s32.f32 %v463_v40  ;;  %v1233_v51 = vcvt.s32.f32 %v465_v41  ;;  %v849_v52 = vunpack.c.1.s8 %v229_v33  ;;  %v2390_v53 = vmul.f32 %v3856_v16, %v1610_v46  ;;  %v4396_v40 = vld [vmem:[#allocation2 + $0x488] sm:$0xff] }
 0x159   :  { %3344 = vmatprep.subr.bf16.mxu0 %v2877_v43  ;;  %v2392_v42 = vmul.f32 %v3856_v16, %v1612_v44  ;;  %v1615_v54 = vcvt.s32.f32 %v847_v47  ;;  %v462_v55 = vunpack.c.0.s8 %v4367_v45  ;;  %v2684_v49 = vpack.c.bf16 %v2008_v48, %v2006_v39  ;;  %v55_v39 = vld [vmem:[%s5035_s0 + $0x88] sm:$0xff] }
 0x15a   :  { %v2011_v57 = vmul.f32 %v3852_v9, %v1231_v50  ;;  %v2013_v58 = vmul.f32 %v3852_v9, %v1233_v51  ;;  %v1617_v59 = vcvt.s32.f32 %v849_v52  ;;  %v464_v62 = vunpack.c.1.s8 %v4367_v45  ;;  %v42_v51 = vld [vmem:[%s5035_s0 + $0x20] sm:$0xff] }
 0x15b   :  { %v2876_v60 = vpack.c.bf16 %v2392_v42, %v2390_v53  ;;  %v2395_v61 = vmul.f32 %v3852_v9, %v1615_v54  ;;  %v1230_v63 = vcvt.s32.f32 %v462_v55  ;;  %3099 = vmatpush1.bf16.msra.mxu1 %v2684_v49  ;;  %v846_v5 = vunpack.c.0.s8 %v228_v56  ;;  %v134_v55 = vld [vmem:[#allocation2 + $0x180] sm:$0xff] }
 0x15c   :  { %v2687_v0 = vpack.c.bf16 %v2013_v58, %v2011_v57  ;;  %v2397_v4 = vmul.f32 %v3852_v9, %v1617_v59  ;;  %v848_v7 = vunpack.c.1.s8 %v228_v56  ;;  %v1232_v6 = vcvt.s32.f32 %v464_v62  ;;  %v54_v59 = vld [vmem:[%s5035_s0 + $0x80] sm:$0xff] }
 0x15d   :  { %3345 = vmatpush1.bf16.msra.mxu0 %v2876_v60  ;;  %v2010_v8 = vmul.f32 %v3856_v16, %v1230_v63  ;;  %v467_v10 = vunpack.c.2.s8 %v133_v19  ;;  %v469_v11 = vunpack.c.3.s8 %v133_v19  ;;  %v1614_v14 = vcvt.s32.f32 %v846_v5  ;;  %v4412_v60 = vld [vmem:[#allocation2 + $0x480] sm:$0xff] }
 0x15e   :  { %3100 = vmatprep.subr.bf16.mxu1 %v2687_v0  ;;  %v2879_v12 = vpack.c.bf16 %v2397_v4, %v2395_v61  ;;  %v1616_v15 = vcvt.s32.f32 %v848_v7  ;;  %v851_v17 = vunpack.c.2.s8 %v229_v33  ;;  %v2012_v18 = vmul.f32 %v3856_v16, %v1232_v6 }
 0x15f   :  { %v1235_v13 = vcvt.s32.f32 %v467_v10  ;;  %v1237_v20 = vcvt.s32.f32 %v469_v11  ;;  %v853_v22 = vunpack.c.3.s8 %v229_v33  ;;  %v2394_v23 = vmul.f32 %v3856_v16, %v1614_v14 }
 0x160   :  { %3346 = vmatprep.subr.bf16.mxu0 %v2879_v12  ;;  %v2396_v24 = vmul.f32 %v3856_v16, %v1616_v15  ;;  %v1619_v25 = vcvt.s32.f32 %v851_v17  ;;  %v466_v27 = vunpack.c.2.s8 %v4367_v45  ;;  %v2686_v26 = vpack.c.bf16 %v2012_v18, %v2010_v8 }
 0x161   :  { %v2015_v21 = vmul.f32 %v3852_v9, %v1235_v13  ;;  %v2017_v28 = vmul.f32 %v3852_v9, %v1237_v20  ;;  %v1621_v19 = vcvt.s32.f32 %v853_v22  ;;  %v468_v33 = vunpack.c.3.s8 %v4367_v45 }
 0x162   :  { %v2878_v31 = vpack.c.bf16 %v2396_v24, %v2394_v23  ;;  %v2399_v32 = vmul.f32 %v3852_v9, %v1619_v25  ;;  %v1234_v35 = vcvt.s32.f32 %v466_v27  ;;  %3101 = vmatpush1.bf16.msra.mxu1 %v2686_v26  ;;  %v850_v34 = vunpack.c.2.s8 %v228_v56 }
 0x163   :  { %v2689_v36 = vpack.c.bf16 %v2017_v28, %v2015_v21  ;;  %v2401_v38 = vmul.f32 %v3852_v9, %v1621_v19  ;;  %v852_v37 = vunpack.c.3.s8 %v228_v56  ;;  %v1236_v41 = vcvt.s32.f32 %v468_v33 }
 0x164   :  { %3347 = vmatpush1.bf16.msra.mxu0 %v2878_v31  ;;  %v2014_v43 = vmul.f32 %v3856_v16, %v1234_v35  ;;  %v67_v46 = vpack.c.bf16 %v43_v29, %v43_v29  ;;  %v471_v45 = vunpack.c.0.s8 %v4388_v30  ;;  %v1618_v47 = vcvt.s32.f32 %v850_v34 }
 0x165   :  { %3102 = vmatprep.subr.bf16.mxu1 %v2689_v36  ;;  %v2881_v44 = vpack.c.bf16 %v2401_v38, %v2399_v32  ;;  %v1620_v48 = vcvt.s32.f32 %v852_v37  ;;  %v473_v50 = vunpack.c.1.s8 %v4388_v30  ;;  %v2016_v52 = vmul.f32 %v3856_v16, %v1236_v41  ;;  %v137_v37 = vld [vmem:[#allocation2 + $0x198] sm:$0xff] }
 0x166   :  { %3104 = vmatprep.mubr.bf16.mxu1 %v67_v46  ;;  %v1239_v53 = vcvt.s32.f32 %v471_v45  ;;  %v79_v42 = vpack.c.bf16 %v55_v39, %v55_v39  ;;  %v855_v54 = vunpack.c.0.s8 %v4396_v40  ;;  %v2398_v56 = vmul.f32 %v3856_v16, %v1618_v47  ;;  %v4431_v45 = vld [vmem:[#allocation2 + $0x498] sm:$0xff] }
 0x167   :  { %3348 = vmatprep.subr.bf16.mxu0 %v2881_v44  ;;  %v2400_v49 = vmul.f32 %v3856_v16, %v1620_v48  ;;  %v1241_v57 = vcvt.s32.f32 %v473_v50  ;;  %v857_v58 = vunpack.c.1.s8 %v4396_v40  ;;  %v2688_v61 = vpack.c.bf16 %v2016_v52, %v2014_v43 }
 0x168   :  { %v2019_v62 = vmul.f32 %v3852_v9, %v1239_v53  ;;  %3350 = vmatprep.mubr.bf16.mxu0 %v79_v42  ;;  %v1623_v63 = vcvt.s32.f32 %v855_v54  ;;  %v66_v0 = vpack.c.bf16 %v42_v51, %v42_v51  ;;  %v470_v6 = vunpack.c.0.s8 %v134_v55 }
 0x169   :  { %v2880_v4 = vpack.c.bf16 %v2400_v49, %v2398_v56  ;;  %v2021_v5 = vmul.f32 %v3852_v9, %v1241_v57  ;;  %v1625_v7 = vcvt.s32.f32 %v857_v58  ;;  %3103 = vmatpush1.bf16.msra.mxu1 %v2688_v61  ;;  %v472_v10 = vunpack.c.1.s8 %v134_v55  ;;  %v136_v49 = vld [vmem:[#allocation2 + $0x190] sm:$0xff] }
 0x16a   :  { %v2403_v8 = vmul.f32 %v3852_v9, %v1623_v63  ;;  %v78_v11 = vpack.c.bf16 %v54_v59, %v54_v59  ;;  %v854_v12 = vunpack.c.0.s8 %v4412_v60  ;;  %v1238_v17 = vcvt.s32.f32 %v470_v6  ;;  %v232_v61 = vld [vmem:[#allocation2 + $0x490] sm:$0xff] }
 0x16b   :  { %3349 = vmatpush1.bf16.msra.mxu0 %v2880_v4  ;;  %v2691_v14 = vpack.c.bf16 %v2021_v5, %v2019_v62  ;;  %v2405_v15 = vmul.f32 %v3852_v9, %v1625_v7  ;;  %v856_v18 = vunpack.c.1.s8 %v4412_v60  ;;  %v1240_v13 = vcvt.s32.f32 %v472_v10 }
 0x16c   :  { %v1622_v20 = vcvt.s32.f32 %v854_v12  ;;  %v475_v22 = vunpack.c.2.s8 %v4388_v30  ;;  %v477_v23 = vunpack.c.3.s8 %v4388_v30  ;;  %3105 = vmatmul.mubr.bf16.vlgmr.msra.gmra.mrb[0].mxu1 %v66_v0  ;;  %v2018_v25 = vmul.f32 %v3856_v16, %v1238_v17 }
 0x16d   :  { %3113 = vmatprep.subr.bf16.mxu1 %v2691_v14  ;;  %v2883_v24 = vpack.c.bf16 %v2405_v15, %v2403_v8  ;;  %v1624_v27 = vcvt.s32.f32 %v856_v18  ;;  %v859_v26 = vunpack.c.2.s8 %v4396_v40  ;;  %v2020_v21 = vmul.f32 %v3856_v16, %v1240_v13 }
 0x16e   :  { %3351 = vmatmul.mubr.bf16.vlgmr.msra.gmra.mrb[0].mxu0 %v78_v11  ;;  %v2402_v28 = vmul.f32 %v3856_v16, %v1622_v20  ;;  %v1243_v19 = vcvt.s32.f32 %v475_v22  ;;  %v1245_v29 = vcvt.s32.f32 %v477_v23  ;;  %v861_v30 = vunpack.c.3.s8 %v4396_v40 }
 0x16f   :  { %3359 = vmatprep.subr.bf16.mxu0 %v2883_v24  ;;  %v2404_v31 = vmul.f32 %v3856_v16, %v1624_v27  ;;  %v1627_v32 = vcvt.s32.f32 %v859_v26  ;;  %v474_v33 = vunpack.c.2.s8 %v134_v55  ;;  %v2690_v35 = vpack.c.bf16 %v2020_v21, %v2018_v25 }
 0x170   :  { %v2023_v36 = vmul.f32 %v3852_v9, %v1243_v19  ;;  %v2025_v38 = vmul.f32 %v3852_v9, %v1245_v29  ;;  %v476_v34 = vunpack.c.3.s8 %v134_v55  ;;  %v1629_v41 = vcvt.s32.f32 %v861_v30 }
 0x171   :  { %v2882_v39 = vpack.c.bf16 %v2404_v31, %v2402_v28  ;;  %v2407_v43 = vmul.f32 %v3852_v9, %v1627_v32  ;;  %v1242_v46 = vcvt.s32.f32 %v474_v33  ;;  %3114 = vmatpush1.bf16.msra.mxu1 %v2690_v35  ;;  %v858_v40 = vunpack.c.2.s8 %v4412_v60 }
 0x172   :  { %v2693_v44 = vpack.c.bf16 %v2025_v38, %v2023_v36  ;;  %v1244_v47 = vcvt.s32.f32 %v476_v34  ;;  %v860_v48 = vunpack.c.3.s8 %v4412_v60  ;;  %v2409_v50 = vmul.f32 %v3852_v9, %v1629_v41 }
 0x173   :  { %3360 = vmatpush1.bf16.msra.mxu0 %v2882_v39  ;;  %v2022_v51 = vmul.f32 %v3856_v16, %v1242_v46  ;;  %v479_v52 = vunpack.c.0.s8 %v137_v37  ;;  %v481_v53 = vunpack.c.1.s8 %v137_v37  ;;  %v1626_v54 = vcvt.s32.f32 %v858_v40  ;;  %v139_v39 = vld [vmem:[#allocation2 + $0x1a8] sm:$0xff] }
 0x174   :  { %3115 = vmatprep.subr.bf16.mxu1 %v2693_v44  ;;  %v2024_v42 = vmul.f32 %v3856_v16, %v1244_v47  ;;  %v1628_v55 = vcvt.s32.f32 %v860_v48  ;;  %v863_v56 = vunpack.c.0.s8 %v4431_v45  ;;  %v2885_v57 = vpack.c.bf16 %v2409_v50, %v2407_v43  ;;  %v4455_v47 = vld [vmem:[#allocation2 + $0x4a8] sm:$0xff] }
 0x175   :  { %v1247_v58 = vcvt.s32.f32 %v479_v52  ;;  %v1249_v59 = vcvt.s32.f32 %v481_v53  ;;  %v865_v60 = vunpack.c.1.s8 %v4431_v45  ;;  %v2406_v63 = vmul.f32 %v3856_v16, %v1626_v54 }
 0x176   :  { %v2692_v62 = vpack.c.bf16 %v2024_v42, %v2022_v51  ;;  %v2408_v0 = vmul.f32 %v3856_v16, %v1628_v55  ;;  %v1631_v4 = vcvt.s32.f32 %v863_v56  ;;  %3361 = vmatprep.subr.bf16.mxu0 %v2885_v57  ;;  %v478_v8 = vunpack.c.0.s8 %v136_v49  ;;  %v138_v57 = vld [vmem:[#allocation2 + $0x1a0] sm:$0xff] }
 0x177   :  { %v2027_v5 = vmul.f32 %v3852_v9, %v1247_v58  ;;  %v2029_v7 = vmul.f32 %v3852_v9, %v1249_v59  ;;  %v1633_v6 = vcvt.s32.f32 %v865_v60  ;;  %v480_v12 = vunpack.c.1.s8 %v136_v49 }
 0x178   :  { %3116 = vmatpush1.bf16.msra.mxu1 %v2692_v62  ;;  %v2884_v10 = vpack.c.bf16 %v2408_v0, %v2406_v63  ;;  %v2411_v11 = vmul.f32 %v3852_v9, %v1631_v4  ;;  %v862_v14 = vunpack.c.0.s8 %v232_v61  ;;  %v1246_v18 = vcvt.s32.f32 %v478_v8  ;;  %v234_v62 = vld [vmem:[#allocation2 + $0x4a0] sm:$0xff] }
 0x179   :  { %v2695_v15 = vpack.c.bf16 %v2029_v7, %v2027_v5  ;;  %v2413_v17 = vmul.f32 %v3852_v9, %v1633_v6  ;;  %v864_v13 = vunpack.c.1.s8 %v232_v61  ;;  %v1248_v20 = vcvt.s32.f32 %v480_v12 }
 0x17a   :  { %3362 = vmatpush1.bf16.msra.mxu0 %v2884_v10  ;;  %v1630_v22 = vcvt.s32.f32 %v862_v14  ;;  %v483_v23 = vunpack.c.2.s8 %v137_v37  ;;  %v485_v24 = vunpack.c.3.s8 %v137_v37  ;;  %v2026_v27 = vmul.f32 %v3856_v16, %v1246_v18 }
 0x17b   :  { %3117 = vmatprep.subr.bf16.mxu1 %v2695_v15  ;;  %v2887_v25 = vpack.c.bf16 %v2413_v17, %v2411_v11  ;;  %v1632_v26 = vcvt.s32.f32 %v864_v13  ;;  %v867_v21 = vunpack.c.2.s8 %v4431_v45  ;;  %v2028_v28 = vmul.f32 %v3856_v16, %v1248_v20 }
 0x17c   :  { %v2410_v19 = vmul.f32 %v3856_v16, %v1630_v22  ;;  %v1251_v29 = vcvt.s32.f32 %v483_v23  ;;  %v1253_v31 = vcvt.s32.f32 %v485_v24  ;;  %v869_v32 = vunpack.c.3.s8 %v4431_v45 }
 0x17d   :  { %3363 = vmatprep.subr.bf16.mxu0 %v2887_v25  ;;  %v2412_v30 = vmul.f32 %v3856_v16, %v1632_v26  ;;  %v1635_v33 = vcvt.s32.f32 %v867_v21  ;;  %v482_v35 = vunpack.c.2.s8 %v136_v49  ;;  %v2694_v36 = vpack.c.bf16 %v2028_v28, %v2026_v27 }
 0x17e   :  { %v2031_v38 = vmul.f32 %v3852_v9, %v1251_v29  ;;  %v2033_v34 = vmul.f32 %v3852_v9, %v1253_v31  ;;  %v484_v37 = vunpack.c.3.s8 %v136_v49  ;;  %v1637_v43 = vcvt.s32.f32 %v869_v32 }
 0x17f   :  { %v2886_v41 = vpack.c.bf16 %v2412_v30, %v2410_v19  ;;  %v2415_v46 = vmul.f32 %v3852_v9, %v1635_v33  ;;  %v1250_v44 = vcvt.s32.f32 %v482_v35  ;;  %3118 = vmatpush1.bf16.msra.mxu1 %v2694_v36  ;;  %v866_v45 = vunpack.c.2.s8 %v232_v61 }
 0x180   :  { %v2697_v40 = vpack.c.bf16 %v2033_v34, %v2031_v38  ;;  %v1252_v48 = vcvt.s32.f32 %v484_v37  ;;  %v868_v50 = vunpack.c.3.s8 %v232_v61  ;;  %v2417_v51 = vmul.f32 %v3852_v9, %v1637_v43 }
 0x181   :  { %3364 = vmatpush1.bf16.msra.mxu0 %v2886_v41  ;;  %v2030_v52 = vmul.f32 %v3856_v16, %v1250_v44  ;;  %v487_v53 = vunpack.c.0.s8 %v139_v39  ;;  %v489_v42 = vunpack.c.1.s8 %v139_v39  ;;  %v1634_v55 = vcvt.s32.f32 %v866_v45  ;;  %v141_v41 = vld [vmem:[#allocation2 + $0x1b8] sm:$0xff] }
 0x182   :  { %3119 = vmatprep.subr.bf16.mxu1 %v2697_v40  ;;  %v2032_v54 = vmul.f32 %v3856_v16, %v1252_v48  ;;  %v1636_v56 = vcvt.s32.f32 %v868_v50  ;;  %v871_v49 = vunpack.c.0.s8 %v4455_v47  ;;  %v2889_v58 = vpack.c.bf16 %v2417_v51, %v2415_v46  ;;  %v4477_v48 = vld [vmem:[#allocation2 + $0x4b8] sm:$0xff] }
 0x183   :  { %v1255_v59 = vcvt.s32.f32 %v487_v53  ;;  %v1257_v60 = vcvt.s32.f32 %v489_v42  ;;  %v873_v61 = vunpack.c.1.s8 %v4455_v47  ;;  %v2414_v0 = vmul.f32 %v3856_v16, %v1634_v55 }
 0x184   :  { %v2696_v63 = vpack.c.bf16 %v2032_v54, %v2030_v52  ;;  %v2416_v4 = vmul.f32 %v3856_v16, %v1636_v56  ;;  %v1639_v5 = vcvt.s32.f32 %v871_v49  ;;  %3365 = vmatprep.subr.bf16.mxu0 %v2889_v58  ;;  %v486_v10 = vunpack.c.0.s8 %v138_v57  ;;  %v140_v58 = vld [vmem:[#allocation2 + $0x1b0] sm:$0xff] }
 0x185   :  { %v2035_v7 = vmul.f32 %v3852_v9, %v1255_v59  ;;  %v2037_v6 = vmul.f32 %v3852_v9, %v1257_v60  ;;  %v1641_v8 = vcvt.s32.f32 %v873_v61  ;;  %v488_v14 = vunpack.c.1.s8 %v138_v57 }
 0x186   :  { %3120 = vmatpush1.bf16.msra.mxu1 %v2696_v63  ;;  %v2888_v11 = vpack.c.bf16 %v2416_v4, %v2414_v0  ;;  %v2419_v12 = vmul.f32 %v3852_v9, %v1639_v5  ;;  %v870_v15 = vunpack.c.0.s8 %v234_v62  ;;  %v1254_v13 = vcvt.s32.f32 %v486_v10  ;;  %v236_v63 = vld [vmem:[#allocation2 + $0x4b0] sm:$0xff] }
 0x187   :  { %v2699_v17 = vpack.c.bf16 %v2037_v6, %v2035_v7  ;;  %v2421_v18 = vmul.f32 %v3852_v9, %v1641_v8  ;;  %v872_v20 = vunpack.c.1.s8 %v234_v62  ;;  %v1256_v22 = vcvt.s32.f32 %v488_v14 }
 0x188   :  { %3366 = vmatpush1.bf16.msra.mxu0 %v2888_v11  ;;  %v1638_v23 = vcvt.s32.f32 %v870_v15  ;;  %v491_v24 = vunpack.c.2.s8 %v139_v39  ;;  %v493_v25 = vunpack.c.3.s8 %v139_v39  ;;  %v2034_v26 = vmul.f32 %v3856_v16, %v1254_v13 }
 0x189   :  { %3121 = vmatprep.subr.bf16.mxu1 %v2699_v17  ;;  %v2891_v27 = vpack.c.bf16 %v2421_v18, %v2419_v12  ;;  %v1640_v21 = vcvt.s32.f32 %v872_v20  ;;  %v875_v28 = vunpack.c.2.s8 %v4455_v47  ;;  %v2036_v19 = vmul.f32 %v3856_v16, %v1256_v22 }
 0x18a   :  { %v2418_v29 = vmul.f32 %v3856_v16, %v1638_v23  ;;  %v1259_v31 = vcvt.s32.f32 %v491_v24  ;;  %v1261_v30 = vcvt.s32.f32 %v493_v25  ;;  %v877_v33 = vunpack.c.3.s8 %v4455_v47 }
 0x18b   :  { %3367 = vmatprep.subr.bf16.mxu0 %v2891_v27  ;;  %v2420_v32 = vmul.f32 %v3856_v16, %v1640_v21  ;;  %v1643_v35 = vcvt.s32.f32 %v875_v28  ;;  %v490_v36 = vunpack.c.2.s8 %v138_v57  ;;  %v2698_v38 = vpack.c.bf16 %v2036_v19, %v2034_v26 }
 0x18c   :  { %v2039_v34 = vmul.f32 %v3852_v9, %v1259_v31  ;;  %v2041_v37 = vmul.f32 %v3852_v9, %v1261_v30  ;;  %v492_v39 = vunpack.c.3.s8 %v138_v57  ;;  %v1645_v46 = vcvt.s32.f32 %v877_v33 }
 0x18d   :  { %v2890_v43 = vpack.c.bf16 %v2420_v32, %v2418_v29  ;;  %v2423_v44 = vmul.f32 %v3852_v9, %v1643_v35  ;;  %v1258_v40 = vcvt.s32.f32 %v490_v36  ;;  %3122 = vmatpush1.bf16.msra.mxu1 %v2698_v38  ;;  %v874_v47 = vunpack.c.2.s8 %v234_v62 }
 0x18e   :  { %v2701_v45 = vpack.c.bf16 %v2041_v37, %v2039_v34  ;;  %v1260_v50 = vcvt.s32.f32 %v492_v39  ;;  %v876_v51 = vunpack.c.3.s8 %v234_v62  ;;  %v2425_v52 = vmul.f32 %v3852_v9, %v1645_v46 }
 0x18f   :  { %3368 = vmatpush1.bf16.msra.mxu0 %v2890_v43  ;;  %v2038_v53 = vmul.f32 %v3856_v16, %v1258_v40  ;;  %v495_v42 = vunpack.c.0.s8 %v141_v41  ;;  %v497_v54 = vunpack.c.1.s8 %v141_v41  ;;  %v1642_v56 = vcvt.s32.f32 %v874_v47  ;;  %v143_v43 = vld [vmem:[#allocation2 + $0x1c8] sm:$0xff] }
 0x190   :  { %3123 = vmatprep.subr.bf16.mxu1 %v2701_v45  ;;  %v2040_v55 = vmul.f32 %v3856_v16, %v1260_v50  ;;  %v1644_v49 = vcvt.s32.f32 %v876_v51  ;;  %v879_v57 = vunpack.c.0.s8 %v4477_v48  ;;  %v2893_v59 = vpack.c.bf16 %v2425_v52, %v2423_v44  ;;  %v4499_v50 = vld [vmem:[#allocation2 + $0x4c8] sm:$0xff] }
 0x191   :  { %v1263_v60 = vcvt.s32.f32 %v495_v42  ;;  %v1265_v61 = vcvt.s32.f32 %v497_v54  ;;  %v881_v62 = vunpack.c.1.s8 %v4477_v48  ;;  %v2422_v4 = vmul.f32 %v3856_v16, %v1642_v56 }
 0x192   :  { %v2700_v0 = vpack.c.bf16 %v2040_v55, %v2038_v53  ;;  %v2424_v5 = vmul.f32 %v3856_v16, %v1644_v49  ;;  %v1647_v7 = vcvt.s32.f32 %v879_v57  ;;  %3369 = vmatprep.subr.bf16.mxu0 %v2893_v59  ;;  %v494_v11 = vunpack.c.0.s8 %v140_v58  ;;  %v142_v59 = vld [vmem:[#allocation2 + $0x1c0] sm:$0xff] }
 0x193   :  { %v2043_v6 = vmul.f32 %v3852_v9, %v1263_v60  ;;  %v2045_v8 = vmul.f32 %v3852_v9, %v1265_v61  ;;  %v1649_v10 = vcvt.s32.f32 %v881_v62  ;;  %v496_v15 = vunpack.c.1.s8 %v140_v58 }
 0x194   :  { %3124 = vmatpush1.bf16.msra.mxu1 %v2700_v0  ;;  %v2892_v12 = vpack.c.bf16 %v2424_v5, %v2422_v4  ;;  %v2427_v14 = vmul.f32 %v3852_v9, %v1647_v7  ;;  %v878_v17 = vunpack.c.0.s8 %v236_v63  ;;  %v1262_v20 = vcvt.s32.f32 %v494_v11  ;;  %v238_v0 = vld [vmem:[#allocation2 + $0x4c0] sm:$0xff] }
 0x195   :  { %v2703_v18 = vpack.c.bf16 %v2045_v8, %v2043_v6  ;;  %v2429_v13 = vmul.f32 %v3852_v9, %v1649_v10  ;;  %v880_v22 = vunpack.c.1.s8 %v236_v63  ;;  %v1264_v23 = vcvt.s32.f32 %v496_v15 }
 0x196   :  { %3370 = vmatpush1.bf16.msra.mxu0 %v2892_v12  ;;  %v1646_v24 = vcvt.s32.f32 %v878_v17  ;;  %v499_v25 = vunpack.c.2.s8 %v141_v41  ;;  %v501_v27 = vunpack.c.3.s8 %v141_v41  ;;  %v2042_v21 = vmul.f32 %v3856_v16, %v1262_v20 }
 0x197   :  { %3125 = vmatprep.subr.bf16.mxu1 %v2703_v18  ;;  %v2895_v26 = vpack.c.bf16 %v2429_v13, %v2427_v14  ;;  %v1648_v28 = vcvt.s32.f32 %v880_v22  ;;  %v883_v19 = vunpack.c.2.s8 %v4477_v48  ;;  %v2044_v29 = vmul.f32 %v3856_v16, %v1264_v23 }
 0x198   :  { %v2426_v31 = vmul.f32 %v3856_v16, %v1646_v24  ;;  %v1267_v30 = vcvt.s32.f32 %v499_v25  ;;  %v1269_v32 = vcvt.s32.f32 %v501_v27  ;;  %v885_v35 = vunpack.c.3.s8 %v4477_v48 }
 0x199   :  { %3371 = vmatprep.subr.bf16.mxu0 %v2895_v26  ;;  %v2428_v33 = vmul.f32 %v3856_v16, %v1648_v28  ;;  %v1651_v36 = vcvt.s32.f32 %v883_v19  ;;  %v498_v38 = vunpack.c.2.s8 %v140_v58  ;;  %v2702_v34 = vpack.c.bf16 %v2044_v29, %v2042_v21 }
 0x19a   :  { %v2047_v37 = vmul.f32 %v3852_v9, %v1267_v30  ;;  %v2049_v39 = vmul.f32 %v3852_v9, %v1269_v32  ;;  %v500_v41 = vunpack.c.3.s8 %v140_v58  ;;  %v1653_v44 = vcvt.s32.f32 %v885_v35 }
 0x19b   :  { %v2894_v46 = vpack.c.bf16 %v2428_v33, %v2426_v31  ;;  %v2431_v40 = vmul.f32 %v3852_v9, %v1651_v36  ;;  %v1266_v45 = vcvt.s32.f32 %v498_v38  ;;  %3126 = vmatpush1.bf16.msra.mxu1 %v2702_v34  ;;  %v882_v48 = vunpack.c.2.s8 %v236_v63 }
 0x19c   :  { %v2705_v47 = vpack.c.bf16 %v2049_v39, %v2047_v37  ;;  %v1268_v51 = vcvt.s32.f32 %v500_v41  ;;  %v884_v52 = vunpack.c.3.s8 %v236_v63  ;;  %v2433_v53 = vmul.f32 %v3852_v9, %v1653_v44 }
 0x19d   :  { %3372 = vmatpush1.bf16.msra.mxu0 %v2894_v46  ;;  %v2046_v42 = vmul.f32 %v3856_v16, %v1266_v45  ;;  %v503_v54 = vunpack.c.0.s8 %v143_v43  ;;  %v505_v55 = vunpack.c.1.s8 %v143_v43  ;;  %v1650_v49 = vcvt.s32.f32 %v882_v48  ;;  %v145_v46 = vld [vmem:[#allocation2 + $0x1d8] sm:$0xff] }
 0x19e   :  { %3127 = vmatprep.subr.bf16.mxu1 %v2705_v47  ;;  %v2048_v56 = vmul.f32 %v3856_v16, %v1268_v51  ;;  %v1652_v57 = vcvt.s32.f32 %v884_v52  ;;  %v887_v58 = vunpack.c.0.s8 %v4499_v50  ;;  %v2897_v60 = vpack.c.bf16 %v2433_v53, %v2431_v40  ;;  %v4521_v51 = vld [vmem:[#allocation2 + $0x4d8] sm:$0xff] }
 0x19f   :  { %v1271_v61 = vcvt.s32.f32 %v503_v54  ;;  %v1273_v62 = vcvt.s32.f32 %v505_v55  ;;  %v889_v63 = vunpack.c.1.s8 %v4499_v50  ;;  %v2430_v5 = vmul.f32 %v3856_v16, %v1650_v49 }
 0x1a0   :  { %v2704_v4 = vpack.c.bf16 %v2048_v56, %v2046_v42  ;;  %v2432_v7 = vmul.f32 %v3856_v16, %v1652_v57  ;;  %v1655_v6 = vcvt.s32.f32 %v887_v58  ;;  %3373 = vmatprep.subr.bf16.mxu0 %v2897_v60  ;;  %v502_v12 = vunpack.c.0.s8 %v142_v59  ;;  %v144_v60 = vld [vmem:[#allocation2 + $0x1d0] sm:$0xff] }
 0x1a1   :  { %v2051_v8 = vmul.f32 %v3852_v9, %v1271_v61  ;;  %v2053_v10 = vmul.f32 %v3852_v9, %v1273_v62  ;;  %v1657_v11 = vcvt.s32.f32 %v889_v63  ;;  %v504_v17 = vunpack.c.1.s8 %v142_v59 }
 0x1a2   :  { %3128 = vmatpush1.bf16.msra.mxu1 %v2704_v4  ;;  %v2896_v14 = vpack.c.bf16 %v2432_v7, %v2430_v5  ;;  %v2435_v15 = vmul.f32 %v3852_v9, %v1655_v6  ;;  %v886_v18 = vunpack.c.0.s8 %v238_v0  ;;  %v1270_v22 = vcvt.s32.f32 %v502_v12  ;;  %v240_v4 = vld [vmem:[#allocation2 + $0x4d0] sm:$0xff] }
 0x1a3   :  { %v2707_v13 = vpack.c.bf16 %v2053_v10, %v2051_v8  ;;  %v2437_v20 = vmul.f32 %v3852_v9, %v1657_v11  ;;  %v888_v23 = vunpack.c.1.s8 %v238_v0  ;;  %v1272_v24 = vcvt.s32.f32 %v504_v17 }
 0x1a4   :  { %3374 = vmatpush1.bf16.msra.mxu0 %v2896_v14  ;;  %v1654_v25 = vcvt.s32.f32 %v886_v18  ;;  %v507_v27 = vunpack.c.2.s8 %v143_v43  ;;  %v509_v26 = vunpack.c.3.s8 %v143_v43  ;;  %v2050_v28 = vmul.f32 %v3856_v16, %v1270_v22 }
 0x1a5   :  { %3129 = vmatprep.subr.bf16.mxu1 %v2707_v13  ;;  %v2899_v21 = vpack.c.bf16 %v2437_v20, %v2435_v15  ;;  %v1656_v19 = vcvt.s32.f32 %v888_v23  ;;  %v891_v29 = vunpack.c.2.s8 %v4499_v50  ;;  %v2052_v31 = vmul.f32 %v3856_v16, %v1272_v24 }
 0x1a6   :  { %v2434_v30 = vmul.f32 %v3856_v16, %v1654_v25  ;;  %v1275_v32 = vcvt.s32.f32 %v507_v27  ;;  %v1277_v33 = vcvt.s32.f32 %v509_v26  ;;  %v893_v36 = vunpack.c.3.s8 %v4499_v50 }
 0x1a7   :  { %3375 = vmatprep.subr.bf16.mxu0 %v2899_v21  ;;  %v2436_v35 = vmul.f32 %v3856_v16, %v1656_v19  ;;  %v1659_v38 = vcvt.s32.f32 %v891_v29  ;;  %v506_v34 = vunpack.c.2.s8 %v142_v59  ;;  %v2706_v37 = vpack.c.bf16 %v2052_v31, %v2050_v28 }
 0x1a8   :  { %v2055_v39 = vmul.f32 %v3852_v9, %v1275_v32  ;;  %v2057_v41 = vmul.f32 %v3852_v9, %v1277_v33  ;;  %v508_v43 = vunpack.c.3.s8 %v142_v59  ;;  %v1661_v40 = vcvt.s32.f32 %v893_v36 }
 0x1a9   :  { %v2898_v44 = vpack.c.bf16 %v2436_v35, %v2434_v30  ;;  %v2439_v45 = vmul.f32 %v3852_v9, %v1659_v38  ;;  %v1274_v47 = vcvt.s32.f32 %v506_v34  ;;  %3130 = vmatpush1.bf16.msra.mxu1 %v2706_v37  ;;  %v890_v50 = vunpack.c.2.s8 %v238_v0 }
 0x1aa   :  { %v2709_v48 = vpack.c.bf16 %v2057_v41, %v2055_v39  ;;  %v1276_v52 = vcvt.s32.f32 %v508_v43  ;;  %v892_v53 = vunpack.c.3.s8 %v238_v0  ;;  %v2441_v42 = vmul.f32 %v3852_v9, %v1661_v40 }
 0x1ab   :  { %3376 = vmatpush1.bf16.msra.mxu0 %v2898_v44  ;;  %v2054_v54 = vmul.f32 %v3856_v16, %v1274_v47  ;;  %v511_v55 = vunpack.c.0.s8 %v145_v46  ;;  %v513_v56 = vunpack.c.1.s8 %v145_v46  ;;  %v1658_v57 = vcvt.s32.f32 %v890_v50  ;;  %v147_v44 = vld [vmem:[#allocation2 + $0x1e8] sm:$0xff] }
 0x1ac   :  { %3131 = vmatprep.subr.bf16.mxu1 %v2709_v48  ;;  %v2056_v49 = vmul.f32 %v3856_v16, %v1276_v52  ;;  %v1660_v58 = vcvt.s32.f32 %v892_v53  ;;  %v895_v59 = vunpack.c.0.s8 %v4521_v51  ;;  %v2901_v61 = vpack.c.bf16 %v2441_v42, %v2439_v45  ;;  %v4543_v52 = vld [vmem:[#allocation2 + $0x4e8] sm:$0xff] }
 0x1ad   :  { %v1279_v62 = vcvt.s32.f32 %v511_v55  ;;  %v1281_v63 = vcvt.s32.f32 %v513_v56  ;;  %v897_v0 = vunpack.c.1.s8 %v4521_v51  ;;  %v2438_v7 = vmul.f32 %v3856_v16, %v1658_v57 }
 0x1ae   :  { %v2708_v5 = vpack.c.bf16 %v2056_v49, %v2054_v54  ;;  %v2440_v6 = vmul.f32 %v3856_v16, %v1660_v58  ;;  %v1663_v8 = vcvt.s32.f32 %v895_v59  ;;  %3377 = vmatprep.subr.bf16.mxu0 %v2901_v61  ;;  %v510_v14 = vunpack.c.0.s8 %v144_v60  ;;  %v146_v61 = vld [vmem:[#allocation2 + $0x1e0] sm:$0xff] }
 0x1af   :  { %v2059_v10 = vmul.f32 %v3852_v9, %v1279_v62  ;;  %v2061_v11 = vmul.f32 %v3852_v9, %v1281_v63  ;;  %v1665_v12 = vcvt.s32.f32 %v897_v0  ;;  %v512_v18 = vunpack.c.1.s8 %v144_v60 }
 0x1b0   :  { %3132 = vmatpush1.bf16.msra.mxu1 %v2708_v5  ;;  %v2900_v15 = vpack.c.bf16 %v2440_v6, %v2438_v7  ;;  %v2443_v17 = vmul.f32 %v3852_v9, %v1663_v8  ;;  %v894_v13 = vunpack.c.0.s8 %v240_v4  ;;  %v1278_v23 = vcvt.s32.f32 %v510_v14  ;;  %v242_v5 = vld [vmem:[#allocation2 + $0x4e0] sm:$0xff] }
 0x1b1   :  { %v2711_v20 = vpack.c.bf16 %v2061_v11, %v2059_v10  ;;  %v2445_v22 = vmul.f32 %v3852_v9, %v1665_v12  ;;  %v896_v24 = vunpack.c.1.s8 %v240_v4  ;;  %v1280_v25 = vcvt.s32.f32 %v512_v18 }
 0x1b2   :  { %3378 = vmatpush1.bf16.msra.mxu0 %v2900_v15  ;;  %v1662_v27 = vcvt.s32.f32 %v894_v13  ;;  %v515_v26 = vunpack.c.2.s8 %v145_v46  ;;  %v517_v21 = vunpack.c.3.s8 %v145_v46  ;;  %v2058_v19 = vmul.f32 %v3856_v16, %v1278_v23 }
 0x1b3   :  { %3133 = vmatprep.subr.bf16.mxu1 %v2711_v20  ;;  %v2903_v28 = vpack.c.bf16 %v2445_v22, %v2443_v17  ;;  %v1664_v29 = vcvt.s32.f32 %v896_v24  ;;  %v899_v31 = vunpack.c.2.s8 %v4521_v51  ;;  %v2060_v30 = vmul.f32 %v3856_v16, %v1280_v25 }
 0x1b4   :  { %v2442_v32 = vmul.f32 %v3856_v16, %v1662_v27  ;;  %v1283_v33 = vcvt.s32.f32 %v515_v26  ;;  %v1285_v35 = vcvt.s32.f32 %v517_v21  ;;  %v901_v38 = vunpack.c.3.s8 %v4521_v51 }
 0x1b5   :  { %3379 = vmatprep.subr.bf16.mxu0 %v2903_v28  ;;  %v2444_v36 = vmul.f32 %v3856_v16, %v1664_v29  ;;  %v1667_v34 = vcvt.s32.f32 %v899_v31  ;;  %v514_v37 = vunpack.c.2.s8 %v144_v60  ;;  %v2710_v39 = vpack.c.bf16 %v2060_v30, %v2058_v19 }
 0x1b6   :  { %v2063_v41 = vmul.f32 %v3852_v9, %v1283_v33  ;;  %v2065_v43 = vmul.f32 %v3852_v9, %v1285_v35  ;;  %v516_v46 = vunpack.c.3.s8 %v144_v60  ;;  %v1669_v45 = vcvt.s32.f32 %v901_v38 }
 0x1b7   :  { %v2902_v40 = vpack.c.bf16 %v2444_v36, %v2442_v32  ;;  %v2447_v47 = vmul.f32 %v3852_v9, %v1667_v34  ;;  %v1282_v48 = vcvt.s32.f32 %v514_v37  ;;  %3134 = vmatpush1.bf16.msra.mxu1 %v2710_v39  ;;  %v898_v51 = vunpack.c.2.s8 %v240_v4 }
 0x1b8   :  { %v2713_v50 = vpack.c.bf16 %v2065_v43, %v2063_v41  ;;  %v1284_v53 = vcvt.s32.f32 %v516_v46  ;;  %v900_v42 = vunpack.c.3.s8 %v240_v4  ;;  %v2449_v54 = vmul.f32 %v3852_v9, %v1669_v45 }
 0x1b9   :  { %3380 = vmatpush1.bf16.msra.mxu0 %v2902_v40  ;;  %v2062_v55 = vmul.f32 %v3856_v16, %v1282_v48  ;;  %v519_v56 = vunpack.c.0.s8 %v147_v44  ;;  %v521_v49 = vunpack.c.1.s8 %v147_v44  ;;  %v1666_v58 = vcvt.s32.f32 %v898_v51  ;;  %v149_v40 = vld [vmem:[#allocation2 + $0x1f8] sm:$0xff] }
 0x1ba   :  { %3135 = vmatprep.subr.bf16.mxu1 %v2713_v50  ;;  %v2064_v57 = vmul.f32 %v3856_v16, %v1284_v53  ;;  %v1668_v59 = vcvt.s32.f32 %v900_v42  ;;  %v903_v60 = vunpack.c.0.s8 %v4543_v52  ;;  %v2905_v62 = vpack.c.bf16 %v2449_v54, %v2447_v47  ;;  %v4565_v53 = vld [vmem:[#allocation2 + $0x4f8] sm:$0xff] }
 0x1bb   :  { %v1287_v63 = vcvt.s32.f32 %v519_v56  ;;  %v1289_v0 = vcvt.s32.f32 %v521_v49  ;;  %v905_v4 = vunpack.c.1.s8 %v4543_v52  ;;  %v2446_v6 = vmul.f32 %v3856_v16, %v1666_v58 }
 0x1bc   :  { %v2712_v7 = vpack.c.bf16 %v2064_v57, %v2062_v55  ;;  %v2448_v8 = vmul.f32 %v3856_v16, %v1668_v59  ;;  %v1671_v10 = vcvt.s32.f32 %v903_v60  ;;  %3381 = vmatprep.subr.bf16.mxu0 %v2905_v62  ;;  %v518_v15 = vunpack.c.0.s8 %v146_v61  ;;  %v148_v62 = vld [vmem:[#allocation2 + $0x1f0] sm:$0xff] }
 0x1bd   :  { %v2067_v11 = vmul.f32 %v3852_v9, %v1287_v63  ;;  %v2069_v12 = vmul.f32 %v3852_v9, %v1289_v0  ;;  %v1673_v14 = vcvt.s32.f32 %v905_v4  ;;  %v520_v13 = vunpack.c.1.s8 %v146_v61 }
 0x1be   :  { %3136 = vmatpush1.bf16.msra.mxu1 %v2712_v7  ;;  %v2904_v17 = vpack.c.bf16 %v2448_v8, %v2446_v6  ;;  %v2451_v18 = vmul.f32 %v3852_v9, %v1671_v10  ;;  %v902_v20 = vunpack.c.0.s8 %v242_v5  ;;  %v1286_v24 = vcvt.s32.f32 %v518_v15  ;;  %v4572_v7 = vld [vmem:[#allocation2 + $0x4f0] sm:$0xff] }
 0x1bf   :  { %v2715_v22 = vpack.c.bf16 %v2069_v12, %v2067_v11  ;;  %v2453_v23 = vmul.f32 %v3852_v9, %v1673_v14  ;;  %v904_v25 = vunpack.c.1.s8 %v242_v5  ;;  %v1288_v27 = vcvt.s32.f32 %v520_v13 }
 0x1c0   :  { %3382 = vmatpush1.bf16.msra.mxu0 %v2904_v17  ;;  %v1670_v26 = vcvt.s32.f32 %v902_v20  ;;  %v523_v21 = vunpack.c.2.s8 %v147_v44  ;;  %v525_v28 = vunpack.c.3.s8 %v147_v44  ;;  %v2066_v29 = vmul.f32 %v3856_v16, %v1286_v24 }
 0x1c1   :  { %3137 = vmatprep.subr.bf16.mxu1 %v2715_v22  ;;  %v2907_v19 = vpack.c.bf16 %v2453_v23, %v2451_v18  ;;  %v1672_v31 = vcvt.s32.f32 %v904_v25  ;;  %v907_v30 = vunpack.c.2.s8 %v4543_v52  ;;  %v2068_v32 = vmul.f32 %v3856_v16, %v1288_v27 }
 0x1c2   :  { %v2450_v33 = vmul.f32 %v3856_v16, %v1670_v26  ;;  %v1291_v35 = vcvt.s32.f32 %v523_v21  ;;  %v1293_v36 = vcvt.s32.f32 %v525_v28  ;;  %v909_v34 = vunpack.c.3.s8 %v4543_v52 }
 0x1c3   :  { %3383 = vmatprep.subr.bf16.mxu0 %v2907_v19  ;;  %v2452_v38 = vmul.f32 %v3856_v16, %v1672_v31  ;;  %v1675_v37 = vcvt.s32.f32 %v907_v30  ;;  %v522_v39 = vunpack.c.2.s8 %v146_v61  ;;  %v2714_v41 = vpack.c.bf16 %v2068_v32, %v2066_v29 }
 0x1c4   :  { %v2071_v43 = vmul.f32 %v3852_v9, %v1291_v35  ;;  %v2073_v46 = vmul.f32 %v3852_v9, %v1293_v36  ;;  %v524_v44 = vunpack.c.3.s8 %v146_v61  ;;  %v1677_v47 = vcvt.s32.f32 %v909_v34 }
 0x1c5   :  { %v2906_v45 = vpack.c.bf16 %v2452_v38, %v2450_v33  ;;  %v2455_v48 = vmul.f32 %v3852_v9, %v1675_v37  ;;  %v1290_v50 = vcvt.s32.f32 %v522_v39  ;;  %3138 = vmatpush1.bf16.msra.mxu1 %v2714_v41  ;;  %v906_v52 = vunpack.c.2.s8 %v242_v5 }
 0x1c6   :  { %v2717_v51 = vpack.c.bf16 %v2073_v46, %v2071_v43  ;;  %v1292_v42 = vcvt.s32.f32 %v524_v44  ;;  %v908_v54 = vunpack.c.3.s8 %v242_v5  ;;  %v2457_v55 = vmul.f32 %v3852_v9, %v1677_v47  ;;  %v4593_v47 = vld [vmem:[#allocation2 + $0x208] sm:$0xff] }
 0x1c7   :  { %3384 = vmatpush1.bf16.msra.mxu0 %v2906_v45  ;;  %v2070_v56 = vmul.f32 %v3856_v16, %v1290_v50  ;;  %v527_v49 = vunpack.c.0.s8 %v149_v40  ;;  %v529_v57 = vunpack.c.1.s8 %v149_v40  ;;  %v1674_v59 = vcvt.s32.f32 %v906_v52  ;;  %v45_v45 = vld [vmem:[%s5035_s0 + $0x38] sm:$0xff] }
 0x1c8   :  { %3139 = vmatprep.subr.bf16.mxu1 %v2717_v51  ;;  %v2072_v58 = vmul.f32 %v3856_v16, %v1292_v42  ;;  %v1676_v60 = vcvt.s32.f32 %v908_v54  ;;  %v911_v61 = vunpack.c.0.s8 %v4565_v53  ;;  %v2909_v63 = vpack.c.bf16 %v2457_v55, %v2455_v48 }
 0x1c9   :  { %v1295_v0 = vcvt.s32.f32 %v527_v49  ;;  %v1297_v4 = vcvt.s32.f32 %v529_v57  ;;  %v913_v5 = vunpack.c.1.s8 %v4565_v53  ;;  %v2454_v8 = vmul.f32 %v3856_v16, %v1674_v59  ;;  %v4601_v49 = vld [vmem:[#allocation2 + $0x508] sm:$0xff] }
 0x1ca   :  { %v2716_v6 = vpack.c.bf16 %v2072_v58, %v2070_v56  ;;  %v2456_v10 = vmul.f32 %v3856_v16, %v1676_v60  ;;  %v1679_v11 = vcvt.s32.f32 %v911_v61  ;;  %3385 = vmatprep.subr.bf16.mxu0 %v2909_v63  ;;  %v526_v17 = vunpack.c.0.s8 %v148_v62  ;;  %v57_v56 = vld [vmem:[%s5035_s0 + $0x98] sm:$0xff] }
 0x1cb   :  { %v2075_v12 = vmul.f32 %v3852_v9, %v1295_v0  ;;  %v2077_v14 = vmul.f32 %v3852_v9, %v1297_v4  ;;  %v1681_v15 = vcvt.s32.f32 %v913_v5  ;;  %v528_v20 = vunpack.c.1.s8 %v148_v62  ;;  %v44_v4 = vld [vmem:[%s5035_s0 + $0x30] sm:$0xff] }
 0x1cc   :  { %3140 = vmatpush1.bf16.msra.mxu1 %v2716_v6  ;;  %v2908_v18 = vpack.c.bf16 %v2456_v10, %v2454_v8  ;;  %v2459_v13 = vmul.f32 %v3852_v9, %v1679_v11  ;;  %v910_v22 = vunpack.c.0.s8 %v4572_v7  ;;  %v1294_v25 = vcvt.s32.f32 %v526_v17  ;;  %v150_v10 = vld [vmem:[#allocation2 + $0x200] sm:$0xff]  ;;  %v56_v17 = vld [vmem:[%s5035_s0 + $0x90] sm:$0xff] }
 0x1cd   :  { %v2719_v23 = vpack.c.bf16 %v2077_v14, %v2075_v12  ;;  %v2461_v24 = vmul.f32 %v3852_v9, %v1681_v15  ;;  %v912_v27 = vunpack.c.1.s8 %v4572_v7  ;;  %v1296_v26 = vcvt.s32.f32 %v528_v20 }
 0x1ce   :  { %3386 = vmatpush1.bf16.msra.mxu0 %v2908_v18  ;;  %v1678_v21 = vcvt.s32.f32 %v910_v22  ;;  %v531_v28 = vunpack.c.2.s8 %v149_v40  ;;  %v533_v19 = vunpack.c.3.s8 %v149_v40  ;;  %v2074_v31 = vmul.f32 %v3856_v16, %v1294_v25  ;;  %v4617_v18 = vld [vmem:[#allocation2 + $0x500] sm:$0xff] }
 0x1cf   :  { %3141 = vmatprep.subr.bf16.mxu1 %v2719_v23  ;;  %v2911_v29 = vpack.c.bf16 %v2461_v24, %v2459_v13  ;;  %v1680_v30 = vcvt.s32.f32 %v912_v27  ;;  %v915_v32 = vunpack.c.2.s8 %v4565_v53  ;;  %v2076_v33 = vmul.f32 %v3856_v16, %v1296_v26 }
 0x1d0   :  { %v2458_v35 = vmul.f32 %v3856_v16, %v1678_v21  ;;  %v1299_v36 = vcvt.s32.f32 %v531_v28  ;;  %v1301_v38 = vcvt.s32.f32 %v533_v19  ;;  %v917_v37 = vunpack.c.3.s8 %v4565_v53 }
 0x1d1   :  { %3387 = vmatprep.subr.bf16.mxu0 %v2911_v29  ;;  %v2460_v34 = vmul.f32 %v3856_v16, %v1680_v30  ;;  %v1683_v39 = vcvt.s32.f32 %v915_v32  ;;  %v530_v41 = vunpack.c.2.s8 %v148_v62  ;;  %v2718_v43 = vpack.c.bf16 %v2076_v33, %v2074_v31 }
 0x1d2   :  { %v2079_v46 = vmul.f32 %v3852_v9, %v1299_v36  ;;  %v2081_v44 = vmul.f32 %v3852_v9, %v1301_v38  ;;  %v532_v40 = vunpack.c.3.s8 %v148_v62  ;;  %v1685_v50 = vcvt.s32.f32 %v917_v37 }
 0x1d3   :  { %v2910_v48 = vpack.c.bf16 %v2460_v34, %v2458_v35  ;;  %v2463_v51 = vmul.f32 %v3852_v9, %v1683_v39  ;;  %v1298_v42 = vcvt.s32.f32 %v530_v41  ;;  %3142 = vmatpush1.bf16.msra.mxu1 %v2718_v43  ;;  %v914_v54 = vunpack.c.2.s8 %v4572_v7 }
 0x1d4   :  { %v2721_v53 = vpack.c.bf16 %v2081_v44, %v2079_v46  ;;  %v1300_v52 = vcvt.s32.f32 %v532_v40  ;;  %v916_v55 = vunpack.c.3.s8 %v4572_v7  ;;  %v2465_v57 = vmul.f32 %v3852_v9, %v1685_v50 }
 0x1d5   :  { %3388 = vmatpush1.bf16.msra.mxu0 %v2910_v48  ;;  %v2078_v58 = vmul.f32 %v3856_v16, %v1298_v42  ;;  %v69_v59 = vpack.c.bf16 %v45_v45, %v45_v45  ;;  %v535_v60 = vunpack.c.0.s8 %v4593_v47  ;;  %v1682_v62 = vcvt.s32.f32 %v914_v54 }
 0x1d6   :  { %3143 = vmatprep.subr.bf16.mxu1 %v2721_v53  ;;  %v2080_v61 = vmul.f32 %v3856_v16, %v1300_v52  ;;  %v1684_v63 = vcvt.s32.f32 %v916_v55  ;;  %v537_v0 = vunpack.c.1.s8 %v4593_v47  ;;  %v2913_v5 = vpack.c.bf16 %v2465_v57, %v2463_v51  ;;  %v153_v55 = vld [vmem:[#allocation2 + $0x218] sm:$0xff] }
 0x1d7   :  { %3145 = vmatprep.mubr.bf16.mxu1 %v69_v59  ;;  %v1303_v7 = vcvt.s32.f32 %v535_v60  ;;  %v81_v6 = vpack.c.bf16 %v57_v56, %v57_v56  ;;  %v919_v8 = vunpack.c.0.s8 %v4601_v49  ;;  %v2462_v12 = vmul.f32 %v3856_v16, %v1682_v62  ;;  %v4638_v60 = vld [vmem:[#allocation2 + $0x518] sm:$0xff] }
 0x1d8   :  { %v2720_v11 = vpack.c.bf16 %v2080_v61, %v2078_v58  ;;  %v2464_v14 = vmul.f32 %v3856_v16, %v1684_v63  ;;  %v1305_v15 = vcvt.s32.f32 %v537_v0  ;;  %3389 = vmatprep.subr.bf16.mxu0 %v2913_v5  ;;  %v921_v20 = vunpack.c.1.s8 %v4601_v49 }
 0x1d9   :  { %v2083_v13 = vmul.f32 %v3852_v9, %v1303_v7  ;;  %3391 = vmatprep.mubr.bf16.mxu0 %v81_v6  ;;  %v1687_v22 = vcvt.s32.f32 %v919_v8  ;;  %v68_v23 = vpack.c.bf16 %v44_v4, %v44_v4  ;;  %v534_v27 = vunpack.c.0.s8 %v150_v10 }
 0x1da   :  { %3144 = vmatpush1.bf16.msra.mxu1 %v2720_v11  ;;  %v2912_v24 = vpack.c.bf16 %v2464_v14, %v2462_v12  ;;  %v2085_v25 = vmul.f32 %v3852_v9, %v1305_v15  ;;  %v536_v26 = vunpack.c.1.s8 %v150_v10  ;;  %v1689_v21 = vcvt.s32.f32 %v921_v20  ;;  %v152_v12 = vld [vmem:[#allocation2 + $0x210] sm:$0xff] }
 0x1db   :  { %v2467_v28 = vmul.f32 %v3852_v9, %v1687_v22  ;;  %v80_v19 = vpack.c.bf16 %v56_v17, %v56_v17  ;;  %v918_v29 = vunpack.c.0.s8 %v4617_v18  ;;  %v1302_v30 = vcvt.s32.f32 %v534_v27 }
 0x1dc   :  { %3390 = vmatpush1.bf16.msra.mxu0 %v2912_v24  ;;  %v2723_v31 = vpack.c.bf16 %v2085_v25, %v2083_v13  ;;  %v1304_v32 = vcvt.s32.f32 %v536_v26  ;;  %v920_v33 = vunpack.c.1.s8 %v4617_v18  ;;  %v2469_v35 = vmul.f32 %v3852_v9, %v1689_v21  ;;  %v248_v13 = vld [vmem:[#allocation2 + $0x510] sm:$0xff] }
 0x1dd   :  { %3146 = vmatmul.mubr.bf16.vlgmr.msra.gmra.mrb[0].mxu1 %v68_v23  ;;  %v1686_v36 = vcvt.s32.f32 %v918_v29  ;;  %v539_v38 = vunpack.c.2.s8 %v4593_v47  ;;  %v541_v34 = vunpack.c.3.s8 %v4593_v47  ;;  %v2082_v37 = vmul.f32 %v3856_v16, %v1302_v30 }
 0x1de   :  { %3154 = vmatprep.subr.bf16.mxu1 %v2723_v31  ;;  %v2084_v39 = vmul.f32 %v3856_v16, %v1304_v32  ;;  %v1688_v41 = vcvt.s32.f32 %v920_v33  ;;  %v923_v43 = vunpack.c.2.s8 %v4601_v49  ;;  %v2915_v46 = vpack.c.bf16 %v2469_v35, %v2467_v28 }
 0x1df   :  { %3392 = vmatmul.mubr.bf16.vlgmr.msra.gmra.mrb[0].mxu0 %v80_v19  ;;  %v2466_v44 = vmul.f32 %v3856_v16, %v1686_v36  ;;  %v1307_v40 = vcvt.s32.f32 %v539_v38  ;;  %v1309_v45 = vcvt.s32.f32 %v541_v34  ;;  %v925_v51 = vunpack.c.3.s8 %v4601_v49 }
 0x1e0   :  { %v2722_v48 = vpack.c.bf16 %v2084_v39, %v2082_v37  ;;  %v2468_v50 = vmul.f32 %v3856_v16, %v1688_v41  ;;  %v1691_v47 = vcvt.s32.f32 %v923_v43  ;;  %3400 = vmatprep.subr.bf16.mxu0 %v2915_v46  ;;  %v538_v52 = vunpack.c.2.s8 %v150_v10 }
 0x1e1   :  { %v2087_v42 = vmul.f32 %v3852_v9, %v1307_v40  ;;  %v2089_v53 = vmul.f32 %v3852_v9, %v1309_v45  ;;  %v540_v54 = vunpack.c.3.s8 %v150_v10  ;;  %v1693_v57 = vcvt.s32.f32 %v925_v51 }
 0x1e2   :  { %3155 = vmatpush1.bf16.msra.mxu1 %v2722_v48  ;;  %v2914_v56 = vpack.c.bf16 %v2468_v50, %v2466_v44  ;;  %v2471_v58 = vmul.f32 %v3852_v9, %v1691_v47  ;;  %v922_v59 = vunpack.c.2.s8 %v4617_v18  ;;  %v1306_v49 = vcvt.s32.f32 %v538_v52 }
 0x1e3   :  { %v2725_v61 = vpack.c.bf16 %v2089_v53, %v2087_v42  ;;  %v1308_v62 = vcvt.s32.f32 %v540_v54  ;;  %v924_v63 = vunpack.c.3.s8 %v4617_v18  ;;  %v2473_v0 = vmul.f32 %v3852_v9, %v1693_v57 }
 0x1e4   :  { %3401 = vmatpush1.bf16.msra.mxu0 %v2914_v56  ;;  %v1690_v4 = vcvt.s32.f32 %v922_v59  ;;  %v543_v5 = vunpack.c.0.s8 %v153_v55  ;;  %v545_v7 = vunpack.c.1.s8 %v153_v55  ;;  %v2086_v6 = vmul.f32 %v3856_v16, %v1306_v49  ;;  %v155_v56 = vld [vmem:[#allocation2 + $0x228] sm:$0xff] }
 0x1e5   :  { %3156 = vmatprep.subr.bf16.mxu1 %v2725_v61  ;;  %v2088_v8 = vmul.f32 %v3856_v16, %v1308_v62  ;;  %v1692_v10 = vcvt.s32.f32 %v924_v63  ;;  %v927_v11 = vunpack.c.0.s8 %v4638_v60  ;;  %v2917_v14 = vpack.c.bf16 %v2473_v0, %v2471_v58  ;;  %v4661_v49 = vld [vmem:[#allocation2 + $0x528] sm:$0xff] }
 0x1e6   :  { %v2470_v15 = vmul.f32 %v3856_v16, %v1690_v4  ;;  %v1311_v17 = vcvt.s32.f32 %v543_v5  ;;  %v1313_v18 = vcvt.s32.f32 %v545_v7  ;;  %v929_v23 = vunpack.c.1.s8 %v4638_v60 }
 0x1e7   :  { %v2724_v20 = vpack.c.bf16 %v2088_v8, %v2086_v6  ;;  %v2472_v22 = vmul.f32 %v3856_v16, %v1692_v10  ;;  %v1695_v24 = vcvt.s32.f32 %v927_v11  ;;  %3402 = vmatprep.subr.bf16.mxu0 %v2917_v14  ;;  %v542_v26 = vunpack.c.0.s8 %v152_v12  ;;  %v154_v14 = vld [vmem:[#allocation2 + $0x220] sm:$0xff] }
 0x1e8   :  { %v2091_v25 = vmul.f32 %v3852_v9, %v1311_v17  ;;  %v2093_v27 = vmul.f32 %v3852_v9, %v1313_v18  ;;  %v544_v21 = vunpack.c.1.s8 %v152_v12  ;;  %v1697_v19 = vcvt.s32.f32 %v929_v23 }
 0x1e9   :  { %3157 = vmatpush1.bf16.msra.mxu1 %v2724_v20  ;;  %v2916_v28 = vpack.c.bf16 %v2472_v22, %v2470_v15  ;;  %v2475_v29 = vmul.f32 %v3852_v9, %v1695_v24  ;;  %v926_v31 = vunpack.c.0.s8 %v248_v13  ;;  %v1310_v32 = vcvt.s32.f32 %v542_v26  ;;  %v250_v20 = vld [vmem:[#allocation2 + $0x520] sm:$0xff] }
 0x1ea   :  { %v2727_v30 = vpack.c.bf16 %v2093_v27, %v2091_v25  ;;  %v1312_v33 = vcvt.s32.f32 %v544_v21  ;;  %v928_v35 = vunpack.c.1.s8 %v248_v13  ;;  %v2477_v36 = vmul.f32 %v3852_v9, %v1697_v19 }
 0x1eb   :  { %3403 = vmatpush1.bf16.msra.mxu0 %v2916_v28  ;;  %v1694_v38 = vcvt.s32.f32 %v926_v31  ;;  %v547_v34 = vunpack.c.2.s8 %v153_v55  ;;  %v549_v37 = vunpack.c.3.s8 %v153_v55  ;;  %v2090_v39 = vmul.f32 %v3856_v16, %v1310_v32 }
 0x1ec   :  { %3158 = vmatprep.subr.bf16.mxu1 %v2727_v30  ;;  %v2092_v41 = vmul.f32 %v3856_v16, %v1312_v33  ;;  %v1696_v43 = vcvt.s32.f32 %v928_v35  ;;  %v931_v46 = vunpack.c.2.s8 %v4638_v60  ;;  %v2919_v44 = vpack.c.bf16 %v2477_v36, %v2475_v29 }
 0x1ed   :  { %v2474_v40 = vmul.f32 %v3856_v16, %v1694_v38  ;;  %v1315_v45 = vcvt.s32.f32 %v547_v34  ;;  %v1317_v48 = vcvt.s32.f32 %v549_v37  ;;  %v933_v47 = vunpack.c.3.s8 %v4638_v60 }
 0x1ee   :  { %v2726_v50 = vpack.c.bf16 %v2092_v41, %v2090_v39  ;;  %v2476_v51 = vmul.f32 %v3856_v16, %v1696_v43  ;;  %v1699_v42 = vcvt.s32.f32 %v931_v46  ;;  %3404 = vmatprep.subr.bf16.mxu0 %v2919_v44  ;;  %v546_v54 = vunpack.c.2.s8 %v152_v12 }
 0x1ef   :  { %v2095_v53 = vmul.f32 %v3852_v9, %v1315_v45  ;;  %v2097_v52 = vmul.f32 %v3852_v9, %v1317_v48  ;;  %v548_v55 = vunpack.c.3.s8 %v152_v12  ;;  %v1701_v58 = vcvt.s32.f32 %v933_v47 }
 0x1f0   :  { %3159 = vmatpush1.bf16.msra.mxu1 %v2726_v50  ;;  %v2918_v57 = vpack.c.bf16 %v2476_v51, %v2474_v40  ;;  %v2479_v59 = vmul.f32 %v3852_v9, %v1699_v42  ;;  %v930_v61 = vunpack.c.2.s8 %v248_v13  ;;  %v1314_v63 = vcvt.s32.f32 %v546_v54 }
 0x1f1   :  { %v2729_v62 = vpack.c.bf16 %v2097_v52, %v2095_v53  ;;  %v1316_v60 = vcvt.s32.f32 %v548_v55  ;;  %v932_v0 = vunpack.c.3.s8 %v248_v13  ;;  %v2481_v4 = vmul.f32 %v3852_v9, %v1701_v58 }
 0x1f2   :  { %3405 = vmatpush1.bf16.msra.mxu0 %v2918_v57  ;;  %v1698_v5 = vcvt.s32.f32 %v930_v61  ;;  %v551_v7 = vunpack.c.0.s8 %v155_v56  ;;  %v553_v6 = vunpack.c.1.s8 %v155_v56  ;;  %v2094_v8 = vmul.f32 %v3856_v16, %v1314_v63  ;;  %v157_v57 = vld [vmem:[#allocation2 + $0x238] sm:$0xff] }
 0x1f3   :  { %3160 = vmatprep.subr.bf16.mxu1 %v2729_v62  ;;  %v2096_v10 = vmul.f32 %v3856_v16, %v1316_v60  ;;  %v1700_v11 = vcvt.s32.f32 %v932_v0  ;;  %v935_v12 = vunpack.c.0.s8 %v4661_v49  ;;  %v2921_v15 = vpack.c.bf16 %v2481_v4, %v2479_v59  ;;  %v4683_v63 = vld [vmem:[#allocation2 + $0x538] sm:$0xff] }
 0x1f4   :  { %v2478_v17 = vmul.f32 %v3856_v16, %v1698_v5  ;;  %v1319_v18 = vcvt.s32.f32 %v551_v7  ;;  %v1321_v13 = vcvt.s32.f32 %v553_v6  ;;  %v937_v24 = vunpack.c.1.s8 %v4661_v49 }
 0x1f5   :  { %v2728_v22 = vpack.c.bf16 %v2096_v10, %v2094_v8  ;;  %v2480_v23 = vmul.f32 %v3856_v16, %v1700_v11  ;;  %v1703_v25 = vcvt.s32.f32 %v935_v12  ;;  %3406 = vmatprep.subr.bf16.mxu0 %v2921_v15  ;;  %v550_v21 = vunpack.c.0.s8 %v154_v14  ;;  %v156_v15 = vld [vmem:[#allocation2 + $0x230] sm:$0xff] }
 0x1f6   :  { %v2099_v27 = vmul.f32 %v3852_v9, %v1319_v18  ;;  %v2101_v26 = vmul.f32 %v3852_v9, %v1321_v13  ;;  %v552_v28 = vunpack.c.1.s8 %v154_v14  ;;  %v1705_v29 = vcvt.s32.f32 %v937_v24 }
 0x1f7   :  { %3161 = vmatpush1.bf16.msra.mxu1 %v2728_v22  ;;  %v2920_v19 = vpack.c.bf16 %v2480_v23, %v2478_v17  ;;  %v2483_v31 = vmul.f32 %v3852_v9, %v1703_v25  ;;  %v934_v30 = vunpack.c.0.s8 %v250_v20  ;;  %v1318_v33 = vcvt.s32.f32 %v550_v21  ;;  %v252_v22 = vld [vmem:[#allocation2 + $0x530] sm:$0xff] }
 0x1f8   :  { %v2731_v32 = vpack.c.bf16 %v2101_v26, %v2099_v27  ;;  %v1320_v35 = vcvt.s32.f32 %v552_v28  ;;  %v936_v36 = vunpack.c.1.s8 %v250_v20  ;;  %v2485_v38 = vmul.f32 %v3852_v9, %v1705_v29 }
 0x1f9   :  { %3407 = vmatpush1.bf16.msra.mxu0 %v2920_v19  ;;  %v1702_v34 = vcvt.s32.f32 %v934_v30  ;;  %v555_v37 = vunpack.c.2.s8 %v155_v56  ;;  %v557_v39 = vunpack.c.3.s8 %v155_v56  ;;  %v2098_v41 = vmul.f32 %v3856_v16, %v1318_v33 }
 0x1fa   :  { %3162 = vmatprep.subr.bf16.mxu1 %v2731_v32  ;;  %v2100_v43 = vmul.f32 %v3856_v16, %v1320_v35  ;;  %v1704_v46 = vcvt.s32.f32 %v936_v36  ;;  %v939_v44 = vunpack.c.2.s8 %v4661_v49  ;;  %v2923_v40 = vpack.c.bf16 %v2485_v38, %v2483_v31 }
 0x1fb   :  { %v2482_v45 = vmul.f32 %v3856_v16, %v1702_v34  ;;  %v1323_v48 = vcvt.s32.f32 %v555_v37  ;;  %v1325_v50 = vcvt.s32.f32 %v557_v39  ;;  %v941_v42 = vunpack.c.3.s8 %v4661_v49 }
 0x1fc   :  { %v2730_v51 = vpack.c.bf16 %v2100_v43, %v2098_v41  ;;  %v2484_v47 = vmul.f32 %v3856_v16, %v1704_v46  ;;  %v1707_v53 = vcvt.s32.f32 %v939_v44  ;;  %3408 = vmatprep.subr.bf16.mxu0 %v2923_v40  ;;  %v554_v55 = vunpack.c.2.s8 %v154_v14 }
 0x1fd   :  { %v2103_v52 = vmul.f32 %v3852_v9, %v1323_v48  ;;  %v2105_v54 = vmul.f32 %v3852_v9, %v1325_v50  ;;  %v556_v56 = vunpack.c.3.s8 %v154_v14  ;;  %v1709_v59 = vcvt.s32.f32 %v941_v42 }
 0x1fe   :  { %3163 = vmatpush1.bf16.msra.mxu1 %v2730_v51  ;;  %v2922_v58 = vpack.c.bf16 %v2484_v47, %v2482_v45  ;;  %v2487_v61 = vmul.f32 %v3852_v9, %v1707_v53  ;;  %v938_v62 = vunpack.c.2.s8 %v250_v20  ;;  %v1322_v0 = vcvt.s32.f32 %v554_v55 }
 0x1ff   :  { %v2733_v60 = vpack.c.bf16 %v2105_v54, %v2103_v52  ;;  %v1324_v49 = vcvt.s32.f32 %v556_v56  ;;  %v940_v4 = vunpack.c.3.s8 %v250_v20  ;;  %v2489_v5 = vmul.f32 %v3852_v9, %v1709_v59 }
 0x200   :  { %3409 = vmatpush1.bf16.msra.mxu0 %v2922_v58  ;;  %v1706_v7 = vcvt.s32.f32 %v938_v62  ;;  %v559_v6 = vunpack.c.0.s8 %v157_v57  ;;  %v561_v8 = vunpack.c.1.s8 %v157_v57  ;;  %v2102_v10 = vmul.f32 %v3856_v16, %v1322_v0  ;;  %v159_v58 = vld [vmem:[#allocation2 + $0x248] sm:$0xff] }
 0x201   :  { %3164 = vmatprep.subr.bf16.mxu1 %v2733_v60  ;;  %v2104_v11 = vmul.f32 %v3856_v16, %v1324_v49  ;;  %v1708_v12 = vcvt.s32.f32 %v940_v4  ;;  %v943_v14 = vunpack.c.0.s8 %v4683_v63  ;;  %v2925_v17 = vpack.c.bf16 %v2489_v5, %v2487_v61  ;;  %v4705_v0 = vld [vmem:[#allocation2 + $0x548] sm:$0xff] }
 0x202   :  { %v2486_v18 = vmul.f32 %v3856_v16, %v1706_v7  ;;  %v1327_v13 = vcvt.s32.f32 %v559_v6  ;;  %v1329_v20 = vcvt.s32.f32 %v561_v8  ;;  %v945_v25 = vunpack.c.1.s8 %v4683_v63 }
 0x203   :  { %v2732_v23 = vpack.c.bf16 %v2104_v11, %v2102_v10  ;;  %v2488_v24 = vmul.f32 %v3856_v16, %v1708_v12  ;;  %v1711_v27 = vcvt.s32.f32 %v943_v14  ;;  %3410 = vmatprep.subr.bf16.mxu0 %v2925_v17  ;;  %v558_v28 = vunpack.c.0.s8 %v156_v15  ;;  %v158_v17 = vld [vmem:[#allocation2 + $0x240] sm:$0xff] }
 0x204   :  { %v2107_v26 = vmul.f32 %v3852_v9, %v1327_v13  ;;  %v2109_v21 = vmul.f32 %v3852_v9, %v1329_v20  ;;  %v560_v19 = vunpack.c.1.s8 %v156_v15  ;;  %v1713_v31 = vcvt.s32.f32 %v945_v25 }
 0x205   :  { %3165 = vmatpush1.bf16.msra.mxu1 %v2732_v23  ;;  %v2924_v29 = vpack.c.bf16 %v2488_v24, %v2486_v18  ;;  %v2491_v30 = vmul.f32 %v3852_v9, %v1711_v27  ;;  %v942_v32 = vunpack.c.0.s8 %v252_v22  ;;  %v1326_v35 = vcvt.s32.f32 %v558_v28  ;;  %v254_v23 = vld [vmem:[#allocation2 + $0x540] sm:$0xff] }
 0x206   :  { %v2735_v33 = vpack.c.bf16 %v2109_v21, %v2107_v26  ;;  %v1328_v36 = vcvt.s32.f32 %v560_v19  ;;  %v944_v38 = vunpack.c.1.s8 %v252_v22  ;;  %v2493_v34 = vmul.f32 %v3852_v9, %v1713_v31 }
 0x207   :  { %3411 = vmatpush1.bf16.msra.mxu0 %v2924_v29  ;;  %v1710_v37 = vcvt.s32.f32 %v942_v32  ;;  %v563_v39 = vunpack.c.2.s8 %v157_v57  ;;  %v565_v41 = vunpack.c.3.s8 %v157_v57  ;;  %v2106_v43 = vmul.f32 %v3856_v16, %v1326_v35 }
 0x208   :  { %3166 = vmatprep.subr.bf16.mxu1 %v2735_v33  ;;  %v2108_v46 = vmul.f32 %v3856_v16, %v1328_v36  ;;  %v1712_v44 = vcvt.s32.f32 %v944_v38  ;;  %v947_v40 = vunpack.c.2.s8 %v4683_v63  ;;  %v2927_v45 = vpack.c.bf16 %v2493_v34, %v2491_v30 }
 0x209   :  { %v2490_v48 = vmul.f32 %v3856_v16, %v1710_v37  ;;  %v1331_v50 = vcvt.s32.f32 %v563_v39  ;;  %v1333_v51 = vcvt.s32.f32 %v565_v41  ;;  %v949_v53 = vunpack.c.3.s8 %v4683_v63 }
 0x20a   :  { %v2734_v47 = vpack.c.bf16 %v2108_v46, %v2106_v43  ;;  %v2492_v42 = vmul.f32 %v3856_v16, %v1712_v44  ;;  %v1715_v52 = vcvt.s32.f32 %v947_v40  ;;  %3412 = vmatprep.subr.bf16.mxu0 %v2927_v45  ;;  %v562_v56 = vunpack.c.2.s8 %v156_v15 }
 0x20b   :  { %v2111_v54 = vmul.f32 %v3852_v9, %v1331_v50  ;;  %v2113_v55 = vmul.f32 %v3852_v9, %v1333_v51  ;;  %v564_v57 = vunpack.c.3.s8 %v156_v15  ;;  %v1717_v61 = vcvt.s32.f32 %v949_v53 }
 0x20c   :  { %3167 = vmatpush1.bf16.msra.mxu1 %v2734_v47  ;;  %v2926_v59 = vpack.c.bf16 %v2492_v42, %v2490_v48  ;;  %v2495_v62 = vmul.f32 %v3852_v9, %v1715_v52  ;;  %v946_v60 = vunpack.c.2.s8 %v252_v22  ;;  %v1330_v4 = vcvt.s32.f32 %v562_v56 }
 0x20d   :  { %v2737_v49 = vpack.c.bf16 %v2113_v55, %v2111_v54  ;;  %v1332_v63 = vcvt.s32.f32 %v564_v57  ;;  %v948_v5 = vunpack.c.3.s8 %v252_v22  ;;  %v2497_v7 = vmul.f32 %v3852_v9, %v1717_v61 }
 0x20e   :  { %3413 = vmatpush1.bf16.msra.mxu0 %v2926_v59  ;;  %v1714_v6 = vcvt.s32.f32 %v946_v60  ;;  %v567_v8 = vunpack.c.0.s8 %v159_v58  ;;  %v569_v10 = vunpack.c.1.s8 %v159_v58  ;;  %v2110_v11 = vmul.f32 %v3856_v16, %v1330_v4  ;;  %v161_v59 = vld [vmem:[#allocation2 + $0x258] sm:$0xff] }
 0x20f   :  { %3168 = vmatprep.subr.bf16.mxu1 %v2737_v49  ;;  %v2112_v12 = vmul.f32 %v3856_v16, %v1332_v63  ;;  %v1716_v14 = vcvt.s32.f32 %v948_v5  ;;  %v951_v15 = vunpack.c.0.s8 %v4705_v0  ;;  %v2929_v18 = vpack.c.bf16 %v2497_v7, %v2495_v62  ;;  %v4727_v4 = vld [vmem:[#allocation2 + $0x558] sm:$0xff] }
 0x210   :  { %v2494_v13 = vmul.f32 %v3856_v16, %v1714_v6  ;;  %v1335_v20 = vcvt.s32.f32 %v567_v8  ;;  %v1337_v22 = vcvt.s32.f32 %v569_v10  ;;  %v953_v27 = vunpack.c.1.s8 %v4705_v0 }
 0x211   :  { %v2736_v24 = vpack.c.bf16 %v2112_v12, %v2110_v11  ;;  %v2496_v25 = vmul.f32 %v3856_v16, %v1716_v14  ;;  %v1719_v26 = vcvt.s32.f32 %v951_v15  ;;  %3414 = vmatprep.subr.bf16.mxu0 %v2929_v18  ;;  %v566_v19 = vunpack.c.0.s8 %v158_v17  ;;  %v160_v18 = vld [vmem:[#allocation2 + $0x250] sm:$0xff] }
 0x212   :  { %v2115_v21 = vmul.f32 %v3852_v9, %v1335_v20  ;;  %v2117_v28 = vmul.f32 %v3852_v9, %v1337_v22  ;;  %v568_v29 = vunpack.c.1.s8 %v158_v17  ;;  %v1721_v30 = vcvt.s32.f32 %v953_v27 }
 0x213   :  { %3169 = vmatpush1.bf16.msra.mxu1 %v2736_v24  ;;  %v2928_v31 = vpack.c.bf16 %v2496_v25, %v2494_v13  ;;  %v2499_v32 = vmul.f32 %v3852_v9, %v1719_v26  ;;  %v950_v33 = vunpack.c.0.s8 %v254_v23  ;;  %v1334_v36 = vcvt.s32.f32 %v566_v19  ;;  %v256_v24 = vld [vmem:[#allocation2 + $0x550] sm:$0xff] }
 0x214   :  { %v2739_v35 = vpack.c.bf16 %v2117_v28, %v2115_v21  ;;  %v1336_v38 = vcvt.s32.f32 %v568_v29  ;;  %v952_v34 = vunpack.c.1.s8 %v254_v23  ;;  %v2501_v37 = vmul.f32 %v3852_v9, %v1721_v30 }
 0x215   :  { %3415 = vmatpush1.bf16.msra.mxu0 %v2928_v31  ;;  %v1718_v39 = vcvt.s32.f32 %v950_v33  ;;  %v571_v41 = vunpack.c.2.s8 %v159_v58  ;;  %v573_v43 = vunpack.c.3.s8 %v159_v58  ;;  %v2114_v46 = vmul.f32 %v3856_v16, %v1334_v36 }
 0x216   :  { %3170 = vmatprep.subr.bf16.mxu1 %v2739_v35  ;;  %v2116_v44 = vmul.f32 %v3856_v16, %v1336_v38  ;;  %v1720_v40 = vcvt.s32.f32 %v952_v34  ;;  %v955_v45 = vunpack.c.2.s8 %v4705_v0  ;;  %v2931_v48 = vpack.c.bf16 %v2501_v37, %v2499_v32 }
 0x217   :  { %v2498_v50 = vmul.f32 %v3856_v16, %v1718_v39  ;;  %v1339_v51 = vcvt.s32.f32 %v571_v41  ;;  %v1341_v47 = vcvt.s32.f32 %v573_v43  ;;  %v957_v52 = vunpack.c.3.s8 %v4705_v0 }
 0x218   :  { %v2738_v42 = vpack.c.bf16 %v2116_v44, %v2114_v46  ;;  %v2500_v53 = vmul.f32 %v3856_v16, %v1720_v40  ;;  %v1723_v54 = vcvt.s32.f32 %v955_v45  ;;  %3416 = vmatprep.subr.bf16.mxu0 %v2931_v48  ;;  %v570_v57 = vunpack.c.2.s8 %v158_v17 }
 0x219   :  { %v2119_v55 = vmul.f32 %v3852_v9, %v1339_v51  ;;  %v2121_v56 = vmul.f32 %v3852_v9, %v1341_v47  ;;  %v572_v58 = vunpack.c.3.s8 %v158_v17  ;;  %v1725_v62 = vcvt.s32.f32 %v957_v52 }
 0x21a   :  { %3171 = vmatpush1.bf16.msra.mxu1 %v2738_v42  ;;  %v2930_v61 = vpack.c.bf16 %v2500_v53, %v2498_v50  ;;  %v2503_v60 = vmul.f32 %v3852_v9, %v1723_v54  ;;  %v954_v49 = vunpack.c.2.s8 %v254_v23  ;;  %v1338_v5 = vcvt.s32.f32 %v570_v57 }
 0x21b   :  { %v2741_v63 = vpack.c.bf16 %v2121_v56, %v2119_v55  ;;  %v1340_v0 = vcvt.s32.f32 %v572_v58  ;;  %v956_v7 = vunpack.c.3.s8 %v254_v23  ;;  %v2505_v6 = vmul.f32 %v3852_v9, %v1725_v62 }
 0x21c   :  { %3417 = vmatpush1.bf16.msra.mxu0 %v2930_v61  ;;  %v1722_v8 = vcvt.s32.f32 %v954_v49  ;;  %v575_v10 = vunpack.c.0.s8 %v161_v59  ;;  %v577_v11 = vunpack.c.1.s8 %v161_v59  ;;  %v2118_v12 = vmul.f32 %v3856_v16, %v1338_v5  ;;  %v163_v61 = vld [vmem:[#allocation2 + $0x268] sm:$0xff] }
 0x21d   :  { %3172 = vmatprep.subr.bf16.mxu1 %v2741_v63  ;;  %v2120_v14 = vmul.f32 %v3856_v16, %v1340_v0  ;;  %v1724_v15 = vcvt.s32.f32 %v956_v7  ;;  %v959_v17 = vunpack.c.0.s8 %v4727_v4  ;;  %v2933_v13 = vpack.c.bf16 %v2505_v6, %v2503_v60  ;;  %v4749_v5 = vld [vmem:[#allocation2 + $0x568] sm:$0xff] }
 0x21e   :  { %v2502_v20 = vmul.f32 %v3856_v16, %v1722_v8  ;;  %v1343_v22 = vcvt.s32.f32 %v575_v10  ;;  %v1345_v23 = vcvt.s32.f32 %v577_v11  ;;  %v961_v26 = vunpack.c.1.s8 %v4727_v4 }
 0x21f   :  { %v2740_v25 = vpack.c.bf16 %v2120_v14, %v2118_v12  ;;  %v2504_v27 = vmul.f32 %v3856_v16, %v1724_v15  ;;  %v1727_v21 = vcvt.s32.f32 %v959_v17  ;;  %3418 = vmatprep.subr.bf16.mxu0 %v2933_v13  ;;  %v574_v29 = vunpack.c.0.s8 %v160_v18  ;;  %v162_v13 = vld [vmem:[#allocation2 + $0x260] sm:$0xff] }
 0x220   :  { %v2123_v28 = vmul.f32 %v3852_v9, %v1343_v22  ;;  %v2125_v19 = vmul.f32 %v3852_v9, %v1345_v23  ;;  %v576_v31 = vunpack.c.1.s8 %v160_v18  ;;  %v1729_v32 = vcvt.s32.f32 %v961_v26 }
 0x221   :  { %3173 = vmatpush1.bf16.msra.mxu1 %v2740_v25  ;;  %v2932_v30 = vpack.c.bf16 %v2504_v27, %v2502_v20  ;;  %v2507_v33 = vmul.f32 %v3852_v9, %v1727_v21  ;;  %v958_v35 = vunpack.c.0.s8 %v256_v24  ;;  %v1342_v38 = vcvt.s32.f32 %v574_v29  ;;  %v258_v25 = vld [vmem:[#allocation2 + $0x560] sm:$0xff] }
 0x222   :  { %v2743_v36 = vpack.c.bf16 %v2125_v19, %v2123_v28  ;;  %v1344_v34 = vcvt.s32.f32 %v576_v31  ;;  %v960_v37 = vunpack.c.1.s8 %v256_v24  ;;  %v2509_v39 = vmul.f32 %v3852_v9, %v1729_v32 }
 0x223   :  { %3419 = vmatpush1.bf16.msra.mxu0 %v2932_v30  ;;  %v1726_v41 = vcvt.s32.f32 %v958_v35  ;;  %v579_v43 = vunpack.c.2.s8 %v161_v59  ;;  %v581_v46 = vunpack.c.3.s8 %v161_v59  ;;  %v2122_v44 = vmul.f32 %v3856_v16, %v1342_v38 }
 0x224   :  { %3174 = vmatprep.subr.bf16.mxu1 %v2743_v36  ;;  %v2124_v40 = vmul.f32 %v3856_v16, %v1344_v34  ;;  %v1728_v45 = vcvt.s32.f32 %v960_v37  ;;  %v963_v48 = vunpack.c.2.s8 %v4727_v4  ;;  %v2935_v50 = vpack.c.bf16 %v2509_v39, %v2507_v33 }
 0x225   :  { %v2506_v51 = vmul.f32 %v3856_v16, %v1726_v41  ;;  %v1347_v47 = vcvt.s32.f32 %v579_v43  ;;  %v1349_v42 = vcvt.s32.f32 %v581_v46  ;;  %v965_v54 = vunpack.c.3.s8 %v4727_v4 }
 0x226   :  { %v2742_v53 = vpack.c.bf16 %v2124_v40, %v2122_v44  ;;  %v2508_v52 = vmul.f32 %v3856_v16, %v1728_v45  ;;  %v1731_v55 = vcvt.s32.f32 %v963_v48  ;;  %3420 = vmatprep.subr.bf16.mxu0 %v2935_v50  ;;  %v578_v58 = vunpack.c.2.s8 %v160_v18 }
 0x227   :  { %v2127_v56 = vmul.f32 %v3852_v9, %v1347_v47  ;;  %v2129_v57 = vmul.f32 %v3852_v9, %v1349_v42  ;;  %v580_v59 = vunpack.c.3.s8 %v160_v18  ;;  %v1733_v60 = vcvt.s32.f32 %v965_v54 }
 0x228   :  { %3175 = vmatpush1.bf16.msra.mxu1 %v2742_v53  ;;  %v2934_v62 = vpack.c.bf16 %v2508_v52, %v2506_v51  ;;  %v2511_v49 = vmul.f32 %v3852_v9, %v1731_v55  ;;  %v962_v63 = vunpack.c.2.s8 %v256_v24  ;;  %v1346_v7 = vcvt.s32.f32 %v578_v58 }
 0x229   :  { %v2745_v0 = vpack.c.bf16 %v2129_v57, %v2127_v56  ;;  %v1348_v4 = vcvt.s32.f32 %v580_v59  ;;  %v964_v6 = vunpack.c.3.s8 %v256_v24  ;;  %v2513_v8 = vmul.f32 %v3852_v9, %v1733_v60 }
 0x22a   :  { %3421 = vmatpush1.bf16.msra.mxu0 %v2934_v62  ;;  %v1730_v10 = vcvt.s32.f32 %v962_v63  ;;  %v583_v11 = vunpack.c.0.s8 %v163_v61  ;;  %v585_v12 = vunpack.c.1.s8 %v163_v61  ;;  %v2126_v14 = vmul.f32 %v3856_v16, %v1346_v7  ;;  %v165_v62 = vld [vmem:[#allocation2 + $0x278] sm:$0xff] }
 0x22b   :  { %3176 = vmatprep.subr.bf16.mxu1 %v2745_v0  ;;  %v2128_v15 = vmul.f32 %v3856_v16, %v1348_v4  ;;  %v1732_v17 = vcvt.s32.f32 %v964_v6  ;;  %v967_v18 = vunpack.c.0.s8 %v4749_v5  ;;  %v2937_v20 = vpack.c.bf16 %v2513_v8, %v2511_v49  ;;  %v4771_v7 = vld [vmem:[#allocation2 + $0x578] sm:$0xff] }
 0x22c   :  { %v2510_v22 = vmul.f32 %v3856_v16, %v1730_v10  ;;  %v1351_v23 = vcvt.s32.f32 %v583_v11  ;;  %v1353_v24 = vcvt.s32.f32 %v585_v12  ;;  %v969_v21 = vunpack.c.1.s8 %v4749_v5 }
 0x22d   :  { %v2744_v27 = vpack.c.bf16 %v2128_v15, %v2126_v14  ;;  %v2512_v26 = vmul.f32 %v3856_v16, %v1732_v17  ;;  %v1735_v28 = vcvt.s32.f32 %v967_v18  ;;  %3422 = vmatprep.subr.bf16.mxu0 %v2937_v20  ;;  %v582_v31 = vunpack.c.0.s8 %v162_v13  ;;  %v164_v20 = vld [vmem:[#allocation2 + $0x270] sm:$0xff] }
 0x22e   :  { %v2131_v19 = vmul.f32 %v3852_v9, %v1351_v23  ;;  %v2133_v29 = vmul.f32 %v3852_v9, %v1353_v24  ;;  %v584_v30 = vunpack.c.1.s8 %v162_v13  ;;  %v1737_v33 = vcvt.s32.f32 %v969_v21 }
 0x22f   :  { %3177 = vmatpush1.bf16.msra.mxu1 %v2744_v27  ;;  %v2936_v32 = vpack.c.bf16 %v2512_v26, %v2510_v22  ;;  %v2515_v35 = vmul.f32 %v3852_v9, %v1735_v28  ;;  %v966_v36 = vunpack.c.0.s8 %v258_v25  ;;  %v1350_v34 = vcvt.s32.f32 %v582_v31  ;;  %v4778_v27 = vld [vmem:[#allocation2 + $0x570] sm:$0xff] }
 0x230   :  { %v2747_v38 = vpack.c.bf16 %v2133_v29, %v2131_v19  ;;  %v1352_v37 = vcvt.s32.f32 %v584_v30  ;;  %v968_v39 = vunpack.c.1.s8 %v258_v25  ;;  %v2517_v41 = vmul.f32 %v3852_v9, %v1737_v33 }
 0x231   :  { %3423 = vmatpush1.bf16.msra.mxu0 %v2936_v32  ;;  %v1734_v43 = vcvt.s32.f32 %v966_v36  ;;  %v587_v46 = vunpack.c.2.s8 %v163_v61  ;;  %v589_v44 = vunpack.c.3.s8 %v163_v61  ;;  %v2130_v40 = vmul.f32 %v3856_v16, %v1350_v34 }
 0x232   :  { %3178 = vmatprep.subr.bf16.mxu1 %v2747_v38  ;;  %v2132_v45 = vmul.f32 %v3856_v16, %v1352_v37  ;;  %v1736_v48 = vcvt.s32.f32 %v968_v39  ;;  %v971_v50 = vunpack.c.2.s8 %v4749_v5  ;;  %v2939_v51 = vpack.c.bf16 %v2517_v41, %v2515_v35 }
 0x233   :  { %v2514_v47 = vmul.f32 %v3856_v16, %v1734_v43  ;;  %v1355_v42 = vcvt.s32.f32 %v587_v46  ;;  %v1357_v53 = vcvt.s32.f32 %v589_v44  ;;  %v973_v55 = vunpack.c.3.s8 %v4749_v5 }
 0x234   :  { %v2746_v52 = vpack.c.bf16 %v2132_v45, %v2130_v40  ;;  %v2516_v54 = vmul.f32 %v3856_v16, %v1736_v48  ;;  %v1739_v56 = vcvt.s32.f32 %v971_v50  ;;  %3424 = vmatprep.subr.bf16.mxu0 %v2939_v51  ;;  %v586_v59 = vunpack.c.2.s8 %v162_v13 }
 0x235   :  { %v2135_v57 = vmul.f32 %v3852_v9, %v1355_v42  ;;  %v2137_v58 = vmul.f32 %v3852_v9, %v1357_v53  ;;  %v588_v61 = vunpack.c.3.s8 %v162_v13  ;;  %v1741_v49 = vcvt.s32.f32 %v973_v55 }
 0x236   :  { %3179 = vmatpush1.bf16.msra.mxu1 %v2746_v52  ;;  %v2938_v60 = vpack.c.bf16 %v2516_v54, %v2514_v47  ;;  %v2519_v63 = vmul.f32 %v3852_v9, %v1739_v56  ;;  %v970_v0 = vunpack.c.2.s8 %v258_v25  ;;  %v1354_v6 = vcvt.s32.f32 %v586_v59 }
 0x237   :  { %v2749_v4 = vpack.c.bf16 %v2137_v58, %v2135_v57  ;;  %v1356_v5 = vcvt.s32.f32 %v588_v61  ;;  %v972_v8 = vunpack.c.3.s8 %v258_v25  ;;  %v2521_v10 = vmul.f32 %v3852_v9, %v1741_v49  ;;  %v4799_v49 = vld [vmem:[#allocation2 + $0x288] sm:$0xff] }
 0x238   :  { %3425 = vmatpush1.bf16.msra.mxu0 %v2938_v60  ;;  %v1738_v11 = vcvt.s32.f32 %v970_v0  ;;  %v591_v12 = vunpack.c.0.s8 %v165_v62  ;;  %v593_v14 = vunpack.c.1.s8 %v165_v62  ;;  %v2134_v15 = vmul.f32 %v3856_v16, %v1354_v6  ;;  %v47_v60 = vld [vmem:[%s5035_s0 + $0x48] sm:$0xff] }
 0x239   :  { %3180 = vmatprep.subr.bf16.mxu1 %v2749_v4  ;;  %v2136_v17 = vmul.f32 %v3856_v16, %v1356_v5  ;;  %v1740_v18 = vcvt.s32.f32 %v972_v8  ;;  %v975_v13 = vunpack.c.0.s8 %v4771_v7  ;;  %v2941_v22 = vpack.c.bf16 %v2521_v10, %v2519_v63 }
 0x23a   :  { %v2518_v23 = vmul.f32 %v3856_v16, %v1738_v11  ;;  %v1359_v24 = vcvt.s32.f32 %v591_v12  ;;  %v1361_v25 = vcvt.s32.f32 %v593_v14  ;;  %v977_v28 = vunpack.c.1.s8 %v4771_v7  ;;  %v59_v11 = vld [vmem:[%s5035_s0 + $0xa8] sm:$0xff] }
 0x23b   :  { %v2748_v26 = vpack.c.bf16 %v2136_v17, %v2134_v15  ;;  %v2520_v21 = vmul.f32 %v3856_v16, %v1740_v18  ;;  %v1743_v19 = vcvt.s32.f32 %v975_v13  ;;  %3426 = vmatprep.subr.bf16.mxu0 %v2941_v22  ;;  %v590_v30 = vunpack.c.0.s8 %v164_v20  ;;  %v263_v18 = vld [vmem:[#allocation2 + $0x588] sm:$0xff] }
 0x23c   :  { %v2139_v29 = vmul.f32 %v3852_v9, %v1359_v24  ;;  %v2141_v31 = vmul.f32 %v3852_v9, %v1361_v25  ;;  %v592_v32 = vunpack.c.1.s8 %v164_v20  ;;  %v1745_v35 = vcvt.s32.f32 %v977_v28  ;;  %v46_v24 = vld [vmem:[%s5035_s0 + $0x40] sm:$0xff] }
 0x23d   :  { %3181 = vmatpush1.bf16.msra.mxu1 %v2748_v26  ;;  %v2940_v33 = vpack.c.bf16 %v2520_v21, %v2518_v23  ;;  %v2523_v36 = vmul.f32 %v3852_v9, %v1743_v19  ;;  %v974_v38 = vunpack.c.0.s8 %v4778_v27  ;;  %v1358_v37 = vcvt.s32.f32 %v590_v30  ;;  %v4815_v25 = vld [vmem:[#allocation2 + $0x280] sm:$0xff] }
 0x23e   :  { %v2751_v34 = vpack.c.bf16 %v2141_v31, %v2139_v29  ;;  %v1360_v39 = vcvt.s32.f32 %v592_v32  ;;  %v976_v41 = vunpack.c.1.s8 %v4778_v27  ;;  %v2525_v43 = vmul.f32 %v3852_v9, %v1745_v35  ;;  %v58_v32 = vld [vmem:[%s5035_s0 + $0xa0] sm:$0xff] }
 0x23f   :  { %3427 = vmatpush1.bf16.msra.mxu0 %v2940_v33  ;;  %v1742_v46 = vcvt.s32.f32 %v974_v38  ;;  %v595_v44 = vunpack.c.2.s8 %v165_v62  ;;  %v597_v40 = vunpack.c.3.s8 %v165_v62  ;;  %v2138_v45 = vmul.f32 %v3856_v16, %v1358_v37  ;;  %v4822_v33 = vld [vmem:[#allocation2 + $0x580] sm:$0xff] }
 0x240   :  { %3182 = vmatprep.subr.bf16.mxu1 %v2751_v34  ;;  %v2140_v48 = vmul.f32 %v3856_v16, %v1360_v39  ;;  %v1744_v50 = vcvt.s32.f32 %v976_v41  ;;  %v979_v51 = vunpack.c.2.s8 %v4771_v7  ;;  %v2943_v47 = vpack.c.bf16 %v2525_v43, %v2523_v36 }
 0x241   :  { %v2522_v42 = vmul.f32 %v3856_v16, %v1742_v46  ;;  %v1363_v53 = vcvt.s32.f32 %v595_v44  ;;  %v1365_v52 = vcvt.s32.f32 %v597_v40  ;;  %v981_v56 = vunpack.c.3.s8 %v4771_v7 }
 0x242   :  { %v2750_v54 = vpack.c.bf16 %v2140_v48, %v2138_v45  ;;  %v2524_v55 = vmul.f32 %v3856_v16, %v1744_v50  ;;  %v1747_v57 = vcvt.s32.f32 %v979_v51  ;;  %3428 = vmatprep.subr.bf16.mxu0 %v2943_v47  ;;  %v594_v61 = vunpack.c.2.s8 %v164_v20 }
 0x243   :  { %v2143_v58 = vmul.f32 %v3852_v9, %v1363_v53  ;;  %v2145_v59 = vmul.f32 %v3852_v9, %v1365_v52  ;;  %v596_v62 = vunpack.c.3.s8 %v164_v20  ;;  %v1749_v0 = vcvt.s32.f32 %v981_v56 }
 0x244   :  { %3183 = vmatpush1.bf16.msra.mxu1 %v2750_v54  ;;  %v2942_v63 = vpack.c.bf16 %v2524_v55, %v2522_v42  ;;  %v2527_v4 = vmul.f32 %v3852_v9, %v1747_v57  ;;  %v978_v7 = vunpack.c.2.s8 %v4778_v27  ;;  %v1362_v5 = vcvt.s32.f32 %v594_v61 }
 0x245   :  { %v2753_v6 = vpack.c.bf16 %v2145_v59, %v2143_v58  ;;  %v1364_v8 = vcvt.s32.f32 %v596_v62  ;;  %v980_v10 = vunpack.c.3.s8 %v4778_v27  ;;  %v2529_v12 = vmul.f32 %v3852_v9, %v1749_v0 }
 0x246   :  { %3429 = vmatpush1.bf16.msra.mxu0 %v2942_v63  ;;  %v1746_v14 = vcvt.s32.f32 %v978_v7  ;;  %v71_v15 = vpack.c.bf16 %v47_v60, %v47_v60  ;;  %v599_v17 = vunpack.c.0.s8 %v4799_v49  ;;  %v2142_v13 = vmul.f32 %v3856_v16, %v1362_v5 }
 0x247   :  { %3184 = vmatprep.subr.bf16.mxu1 %v2753_v6  ;;  %v2144_v20 = vmul.f32 %v3856_v16, %v1364_v8  ;;  %v1748_v22 = vcvt.s32.f32 %v980_v10  ;;  %v601_v23 = vunpack.c.1.s8 %v4799_v49  ;;  %v2945_v27 = vpack.c.bf16 %v2529_v12, %v2527_v4  ;;  %v169_v10 = vld [vmem:[#allocation2 + $0x298] sm:$0xff] }
 0x248   :  { %v2526_v26 = vmul.f32 %v3856_v16, %v1746_v14  ;;  %3186 = vmatprep.mubr.bf16.mxu1 %v71_v15  ;;  %v1367_v21 = vcvt.s32.f32 %v599_v17  ;;  %v83_v28 = vpack.c.bf16 %v59_v11, %v59_v11  ;;  %v983_v30 = vunpack.c.0.s8 %v263_v18 }
 0x249   :  { %v2752_v19 = vpack.c.bf16 %v2144_v20, %v2142_v13  ;;  %v2528_v29 = vmul.f32 %v3856_v16, %v1748_v22  ;;  %v1369_v31 = vcvt.s32.f32 %v601_v23  ;;  %3430 = vmatprep.subr.bf16.mxu0 %v2945_v27  ;;  %v985_v36 = vunpack.c.1.s8 %v263_v18  ;;  %v265_v22 = vld [vmem:[#allocation2 + $0x598] sm:$0xff] }
 0x24a   :  { %v2147_v35 = vmul.f32 %v3852_v9, %v1367_v21  ;;  %3432 = vmatprep.mubr.bf16.mxu0 %v83_v28  ;;  %v70_v38 = vpack.c.bf16 %v46_v24, %v46_v24  ;;  %v598_v34 = vunpack.c.0.s8 %v4815_v25  ;;  %v1751_v41 = vcvt.s32.f32 %v983_v30 }
 0x24b   :  { %3185 = vmatpush1.bf16.msra.mxu1 %v2752_v19  ;;  %v2944_v37 = vpack.c.bf16 %v2528_v29, %v2526_v26  ;;  %v2149_v39 = vmul.f32 %v3852_v9, %v1369_v31  ;;  %v600_v43 = vunpack.c.1.s8 %v4815_v25  ;;  %v1753_v46 = vcvt.s32.f32 %v985_v36  ;;  %v168_v26 = vld [vmem:[#allocation2 + $0x290] sm:$0xff] }
 0x24c   :  { %v1366_v44 = vcvt.s32.f32 %v598_v34  ;;  %v82_v40 = vpack.c.bf16 %v58_v32, %v58_v32  ;;  %v982_v45 = vunpack.c.0.s8 %v4822_v33  ;;  %v2531_v50 = vmul.f32 %v3852_v9, %v1751_v41 }
 0x24d   :  { %3431 = vmatpush1.bf16.msra.mxu0 %v2944_v37  ;;  %v2755_v48 = vpack.c.bf16 %v2149_v39, %v2147_v35  ;;  %v1368_v51 = vcvt.s32.f32 %v600_v43  ;;  %v984_v47 = vunpack.c.1.s8 %v4822_v33  ;;  %v2533_v42 = vmul.f32 %v3852_v9, %v1753_v46 }
 0x24e   :  { %3187 = vmatmul.mubr.bf16.vlgmr.msra.gmra.mrb[0].mxu1 %v70_v38  ;;  %v2146_v53 = vmul.f32 %v3856_v16, %v1366_v44  ;;  %v1750_v52 = vcvt.s32.f32 %v982_v45  ;;  %v603_v54 = vunpack.c.2.s8 %v4799_v49  ;;  %v605_v57 = vunpack.c.3.s8 %v4799_v49 }
 0x24f   :  { %3195 = vmatprep.subr.bf16.mxu1 %v2755_v48  ;;  %v2148_v55 = vmul.f32 %v3856_v16, %v1368_v51  ;;  %v1752_v56 = vcvt.s32.f32 %v984_v47  ;;  %v987_v58 = vunpack.c.2.s8 %v263_v18  ;;  %v2947_v59 = vpack.c.bf16 %v2533_v42, %v2531_v50 }
 0x250   :  { %3433 = vmatmul.mubr.bf16.vlgmr.msra.gmra.mrb[0].mxu0 %v82_v40  ;;  %v2530_v61 = vmul.f32 %v3856_v16, %v1750_v52  ;;  %v1371_v62 = vcvt.s32.f32 %v603_v54  ;;  %v989_v60 = vunpack.c.3.s8 %v263_v18  ;;  %v1373_v4 = vcvt.s32.f32 %v605_v57 }
 0x251   :  { %v2754_v63 = vpack.c.bf16 %v2148_v55, %v2146_v53  ;;  %v2532_v0 = vmul.f32 %v3856_v16, %v1752_v56  ;;  %v1755_v7 = vcvt.s32.f32 %v987_v58  ;;  %3441 = vmatprep.subr.bf16.mxu0 %v2947_v59  ;;  %v602_v8 = vunpack.c.2.s8 %v4815_v25 }
 0x252   :  { %v2151_v6 = vmul.f32 %v3852_v9, %v1371_v62  ;;  %v1757_v5 = vcvt.s32.f32 %v989_v60  ;;  %v604_v49 = vunpack.c.3.s8 %v4815_v25  ;;  %v2153_v12 = vmul.f32 %v3852_v9, %v1373_v4 }
 0x253   :  { %3196 = vmatpush1.bf16.msra.mxu1 %v2754_v63  ;;  %v2946_v11 = vpack.c.bf16 %v2532_v0, %v2530_v61  ;;  %v2535_v14 = vmul.f32 %v3852_v9, %v1755_v7  ;;  %v986_v15 = vunpack.c.2.s8 %v4822_v33  ;;  %v1370_v18 = vcvt.s32.f32 %v602_v8 }
 0x254   :  { %v2537_v17 = vmul.f32 %v3852_v9, %v1757_v5  ;;  %v1372_v13 = vcvt.s32.f32 %v604_v49  ;;  %v988_v20 = vunpack.c.3.s8 %v4822_v33  ;;  %v2757_v23 = vpack.c.bf16 %v2153_v12, %v2151_v6  ;;  %v264_v33 = vld [vmem:[#allocation2 + $0x590] sm:$0xff]  ;;  %v171_v12 = vld [vmem:[#allocation2 + $0x2a8] sm:$0xff] }
 0x255   :  { %3442 = vmatpush1.bf16.msra.mxu0 %v2946_v11  ;;  %v1754_v24 = vcvt.s32.f32 %v986_v15  ;;  %v607_v25 = vunpack.c.0.s8 %v169_v10  ;;  %v609_v27 = vunpack.c.1.s8 %v169_v10  ;;  %v2150_v28 = vmul.f32 %v3856_v16, %v1370_v18 }
 0x256   :  { %v2949_v21 = vpack.c.bf16 %v2537_v17, %v2535_v14  ;;  %v2152_v19 = vmul.f32 %v3856_v16, %v1372_v13  ;;  %v1756_v29 = vcvt.s32.f32 %v988_v20  ;;  %3197 = vmatprep.subr.bf16.mxu1 %v2757_v23  ;;  %v991_v35 = vunpack.c.0.s8 %v265_v22  ;;  %v267_v23 = vld [vmem:[#allocation2 + $0x5a8] sm:$0xff] }
 0x257   :  { %v2534_v31 = vmul.f32 %v3856_v16, %v1754_v24  ;;  %v1375_v30 = vcvt.s32.f32 %v607_v25  ;;  %v1377_v32 = vcvt.s32.f32 %v609_v27  ;;  %v993_v34 = vunpack.c.1.s8 %v265_v22 }
 0x258   :  { %3443 = vmatprep.subr.bf16.mxu0 %v2949_v21  ;;  %v2756_v36 = vpack.c.bf16 %v2152_v19, %v2150_v28  ;;  %v2536_v38 = vmul.f32 %v3856_v16, %v1756_v29  ;;  %v606_v37 = vunpack.c.0.s8 %v168_v26  ;;  %v1759_v43 = vcvt.s32.f32 %v991_v35 }
 0x259   :  { %v2155_v39 = vmul.f32 %v3852_v9, %v1375_v30  ;;  %v2157_v41 = vmul.f32 %v3852_v9, %v1377_v32  ;;  %v608_v46 = vunpack.c.1.s8 %v168_v26  ;;  %v1761_v40 = vcvt.s32.f32 %v993_v34 }
 0x25a   :  { %3198 = vmatpush1.bf16.msra.mxu1 %v2756_v36  ;;  %v2948_v44 = vpack.c.bf16 %v2536_v38, %v2534_v31  ;;  %v1374_v45 = vcvt.s32.f32 %v606_v37  ;;  %v990_v48 = vunpack.c.0.s8 %v264_v33  ;;  %v2539_v51 = vmul.f32 %v3852_v9, %v1759_v43 }
 0x25b   :  { %v2759_v50 = vpack.c.bf16 %v2157_v41, %v2155_v39  ;;  %v1376_v47 = vcvt.s32.f32 %v608_v46  ;;  %v992_v42 = vunpack.c.1.s8 %v264_v33  ;;  %v2541_v53 = vmul.f32 %v3852_v9, %v1761_v40 }
 0x25c   :  { %3444 = vmatpush1.bf16.msra.mxu0 %v2948_v44  ;;  %v2154_v52 = vmul.f32 %v3856_v16, %v1374_v45  ;;  %v1758_v54 = vcvt.s32.f32 %v990_v48  ;;  %v611_v55 = vunpack.c.2.s8 %v169_v10  ;;  %v613_v58 = vunpack.c.3.s8 %v169_v10 }
 0x25d   :  { %3199 = vmatprep.subr.bf16.mxu1 %v2759_v50  ;;  %v2156_v56 = vmul.f32 %v3856_v16, %v1376_v47  ;;  %v1760_v57 = vcvt.s32.f32 %v992_v42  ;;  %v995_v59 = vunpack.c.2.s8 %v265_v22  ;;  %v2951_v61 = vpack.c.bf16 %v2541_v53, %v2539_v51 }
 0x25e   :  { %v2538_v62 = vmul.f32 %v3856_v16, %v1758_v54  ;;  %v1379_v60 = vcvt.s32.f32 %v611_v55  ;;  %v997_v63 = vunpack.c.3.s8 %v265_v22  ;;  %v1381_v7 = vcvt.s32.f32 %v613_v58 }
 0x25f   :  { %v2758_v0 = vpack.c.bf16 %v2156_v56, %v2154_v52  ;;  %v2540_v4 = vmul.f32 %v3856_v16, %v1760_v57  ;;  %v1763_v6 = vcvt.s32.f32 %v995_v59  ;;  %3445 = vmatprep.subr.bf16.mxu0 %v2951_v61  ;;  %v610_v49 = vunpack.c.2.s8 %v168_v26 }
 0x260   :  { %v2159_v5 = vmul.f32 %v3852_v9, %v1379_v60  ;;  %v1765_v8 = vcvt.s32.f32 %v997_v63  ;;  %v612_v11 = vunpack.c.3.s8 %v168_v26  ;;  %v2161_v14 = vmul.f32 %v3852_v9, %v1381_v7  ;;  %v170_v26 = vld [vmem:[#allocation2 + $0x2a0] sm:$0xff] }
 0x261   :  { %3200 = vmatpush1.bf16.msra.mxu1 %v2758_v0  ;;  %v2950_v10 = vpack.c.bf16 %v2540_v4, %v2538_v62  ;;  %v2543_v15 = vmul.f32 %v3852_v9, %v1763_v6  ;;  %v994_v17 = vunpack.c.2.s8 %v264_v33  ;;  %v1378_v13 = vcvt.s32.f32 %v610_v49 }
 0x262   :  { %v2545_v18 = vmul.f32 %v3852_v9, %v1765_v8  ;;  %v1380_v20 = vcvt.s32.f32 %v612_v11  ;;  %v996_v22 = vunpack.c.3.s8 %v264_v33  ;;  %v2761_v24 = vpack.c.bf16 %v2161_v14, %v2159_v5  ;;  %v266_v33 = vld [vmem:[#allocation2 + $0x5a0] sm:$0xff]  ;;  %v173_v14 = vld [vmem:[#allocation2 + $0x2b8] sm:$0xff] }
 0x263   :  { %3446 = vmatpush1.bf16.msra.mxu0 %v2950_v10  ;;  %v1762_v25 = vcvt.s32.f32 %v994_v17  ;;  %v615_v27 = vunpack.c.0.s8 %v171_v12  ;;  %v617_v21 = vunpack.c.1.s8 %v171_v12  ;;  %v2158_v19 = vmul.f32 %v3856_v16, %v1378_v13 }
 0x264   :  { %v2953_v28 = vpack.c.bf16 %v2545_v18, %v2543_v15  ;;  %v2160_v29 = vmul.f32 %v3856_v16, %v1380_v20  ;;  %v1764_v31 = vcvt.s32.f32 %v996_v22  ;;  %3201 = vmatprep.subr.bf16.mxu1 %v2761_v24  ;;  %v999_v36 = vunpack.c.0.s8 %v267_v23  ;;  %v269_v24 = vld [vmem:[#allocation2 + $0x5b8] sm:$0xff] }
 0x265   :  { %v2542_v30 = vmul.f32 %v3856_v16, %v1762_v25  ;;  %v1383_v32 = vcvt.s32.f32 %v615_v27  ;;  %v1385_v35 = vcvt.s32.f32 %v617_v21  ;;  %v1001_v37 = vunpack.c.1.s8 %v267_v23 }
 0x266   :  { %3447 = vmatprep.subr.bf16.mxu0 %v2953_v28  ;;  %v2760_v38 = vpack.c.bf16 %v2160_v29, %v2158_v19  ;;  %v2544_v34 = vmul.f32 %v3856_v16, %v1764_v31  ;;  %v614_v39 = vunpack.c.0.s8 %v170_v26  ;;  %v1767_v46 = vcvt.s32.f32 %v999_v36 }
 0x267   :  { %v2163_v41 = vmul.f32 %v3852_v9, %v1383_v32  ;;  %v2165_v43 = vmul.f32 %v3852_v9, %v1385_v35  ;;  %v616_v44 = vunpack.c.1.s8 %v170_v26  ;;  %v1769_v45 = vcvt.s32.f32 %v1001_v37 }
 0x268   :  { %3202 = vmatpush1.bf16.msra.mxu1 %v2760_v38  ;;  %v2952_v40 = vpack.c.bf16 %v2544_v34, %v2542_v30  ;;  %v1382_v48 = vcvt.s32.f32 %v614_v39  ;;  %v998_v50 = vunpack.c.0.s8 %v266_v33  ;;  %v2547_v47 = vmul.f32 %v3852_v9, %v1767_v46 }
 0x269   :  { %v2763_v51 = vpack.c.bf16 %v2165_v43, %v2163_v41  ;;  %v1384_v42 = vcvt.s32.f32 %v616_v44  ;;  %v1000_v53 = vunpack.c.1.s8 %v266_v33  ;;  %v2549_v52 = vmul.f32 %v3852_v9, %v1769_v45 }
 0x26a   :  { %3448 = vmatpush1.bf16.msra.mxu0 %v2952_v40  ;;  %v2162_v54 = vmul.f32 %v3856_v16, %v1382_v48  ;;  %v1766_v55 = vcvt.s32.f32 %v998_v50  ;;  %v619_v56 = vunpack.c.2.s8 %v171_v12  ;;  %v621_v59 = vunpack.c.3.s8 %v171_v12 }
 0x26b   :  { %3203 = vmatprep.subr.bf16.mxu1 %v2763_v51  ;;  %v2164_v57 = vmul.f32 %v3856_v16, %v1384_v42  ;;  %v1768_v58 = vcvt.s32.f32 %v1000_v53  ;;  %v1003_v61 = vunpack.c.2.s8 %v267_v23  ;;  %v2955_v62 = vpack.c.bf16 %v2549_v52, %v2547_v47 }
 0x26c   :  { %v2546_v60 = vmul.f32 %v3856_v16, %v1766_v55  ;;  %v1387_v63 = vcvt.s32.f32 %v619_v56  ;;  %v1005_v0 = vunpack.c.3.s8 %v267_v23  ;;  %v1389_v6 = vcvt.s32.f32 %v621_v59 }
 0x26d   :  { %v2762_v4 = vpack.c.bf16 %v2164_v57, %v2162_v54  ;;  %v2548_v7 = vmul.f32 %v3856_v16, %v1768_v58  ;;  %v1771_v5 = vcvt.s32.f32 %v1003_v61  ;;  %3449 = vmatprep.subr.bf16.mxu0 %v2955_v62  ;;  %v618_v11 = vunpack.c.2.s8 %v170_v26 }
 0x26e   :  { %v2167_v8 = vmul.f32 %v3852_v9, %v1387_v63  ;;  %v1773_v49 = vcvt.s32.f32 %v1005_v0  ;;  %v620_v10 = vunpack.c.3.s8 %v170_v26  ;;  %v2169_v15 = vmul.f32 %v3852_v9, %v1389_v6  ;;  %v172_v26 = vld [vmem:[#allocation2 + $0x2b0] sm:$0xff] }
 0x26f   :  { %3204 = vmatpush1.bf16.msra.mxu1 %v2762_v4  ;;  %v2954_v12 = vpack.c.bf16 %v2548_v7, %v2546_v60  ;;  %v2551_v17 = vmul.f32 %v3852_v9, %v1771_v5  ;;  %v1002_v18 = vunpack.c.2.s8 %v266_v33  ;;  %v1386_v20 = vcvt.s32.f32 %v618_v11 }
 0x270   :  { %v2553_v13 = vmul.f32 %v3852_v9, %v1773_v49  ;;  %v1388_v22 = vcvt.s32.f32 %v620_v10  ;;  %v1004_v23 = vunpack.c.3.s8 %v266_v33  ;;  %v2765_v25 = vpack.c.bf16 %v2169_v15, %v2167_v8  ;;  %v268_v33 = vld [vmem:[#allocation2 + $0x5b0] sm:$0xff]  ;;  %v175_v15 = vld [vmem:[#allocation2 + $0x2c8] sm:$0xff] }
 0x271   :  { %3450 = vmatpush1.bf16.msra.mxu0 %v2954_v12  ;;  %v1770_v27 = vcvt.s32.f32 %v1002_v18  ;;  %v623_v21 = vunpack.c.0.s8 %v173_v14  ;;  %v625_v28 = vunpack.c.1.s8 %v173_v14  ;;  %v2166_v29 = vmul.f32 %v3856_v16, %v1386_v20 }
 0x272   :  { %v2957_v19 = vpack.c.bf16 %v2553_v13, %v2551_v17  ;;  %v2168_v31 = vmul.f32 %v3856_v16, %v1388_v22  ;;  %v1772_v30 = vcvt.s32.f32 %v1004_v23  ;;  %3205 = vmatprep.subr.bf16.mxu1 %v2765_v25  ;;  %v1007_v38 = vunpack.c.0.s8 %v269_v24  ;;  %v271_v25 = vld [vmem:[#allocation2 + $0x5c8] sm:$0xff] }
 0x273   :  { %v2550_v32 = vmul.f32 %v3856_v16, %v1770_v27  ;;  %v1391_v35 = vcvt.s32.f32 %v623_v21  ;;  %v1393_v36 = vcvt.s32.f32 %v625_v28  ;;  %v1009_v39 = vunpack.c.1.s8 %v269_v24 }
 0x274   :  { %3451 = vmatprep.subr.bf16.mxu0 %v2957_v19  ;;  %v2764_v34 = vpack.c.bf16 %v2168_v31, %v2166_v29  ;;  %v2552_v37 = vmul.f32 %v3856_v16, %v1772_v30  ;;  %v622_v41 = vunpack.c.0.s8 %v172_v26  ;;  %v1775_v44 = vcvt.s32.f32 %v1007_v38 }
 0x275   :  { %v2171_v43 = vmul.f32 %v3852_v9, %v1391_v35  ;;  %v2173_v46 = vmul.f32 %v3852_v9, %v1393_v36  ;;  %v624_v40 = vunpack.c.1.s8 %v172_v26  ;;  %v1777_v48 = vcvt.s32.f32 %v1009_v39 }
 0x276   :  { %3206 = vmatpush1.bf16.msra.mxu1 %v2764_v34  ;;  %v2956_v45 = vpack.c.bf16 %v2552_v37, %v2550_v32  ;;  %v1390_v50 = vcvt.s32.f32 %v622_v41  ;;  %v1006_v51 = vunpack.c.0.s8 %v268_v33  ;;  %v2555_v42 = vmul.f32 %v3852_v9, %v1775_v44 }
 0x277   :  { %v2767_v47 = vpack.c.bf16 %v2173_v46, %v2171_v43  ;;  %v1392_v53 = vcvt.s32.f32 %v624_v40  ;;  %v1008_v52 = vunpack.c.1.s8 %v268_v33  ;;  %v2557_v54 = vmul.f32 %v3852_v9, %v1777_v48 }
 0x278   :  { %3452 = vmatpush1.bf16.msra.mxu0 %v2956_v45  ;;  %v2170_v55 = vmul.f32 %v3856_v16, %v1390_v50  ;;  %v1774_v56 = vcvt.s32.f32 %v1006_v51  ;;  %v627_v57 = vunpack.c.2.s8 %v173_v14  ;;  %v629_v61 = vunpack.c.3.s8 %v173_v14 }
 0x279   :  { %3207 = vmatprep.subr.bf16.mxu1 %v2767_v47  ;;  %v2172_v58 = vmul.f32 %v3856_v16, %v1392_v53  ;;  %v1776_v59 = vcvt.s32.f32 %v1008_v52  ;;  %v1011_v62 = vunpack.c.2.s8 %v269_v24  ;;  %v2959_v60 = vpack.c.bf16 %v2557_v54, %v2555_v42 }
 0x27a   :  { %v2554_v63 = vmul.f32 %v3856_v16, %v1774_v56  ;;  %v1395_v0 = vcvt.s32.f32 %v627_v57  ;;  %v1013_v4 = vunpack.c.3.s8 %v269_v24  ;;  %v1397_v5 = vcvt.s32.f32 %v629_v61 }
 0x27b   :  { %v2766_v7 = vpack.c.bf16 %v2172_v58, %v2170_v55  ;;  %v2556_v6 = vmul.f32 %v3856_v16, %v1776_v59  ;;  %v1779_v8 = vcvt.s32.f32 %v1011_v62  ;;  %3453 = vmatprep.subr.bf16.mxu0 %v2959_v60  ;;  %v626_v10 = vunpack.c.2.s8 %v172_v26 }
 0x27c   :  { %v2175_v49 = vmul.f32 %v3852_v9, %v1395_v0  ;;  %v1781_v11 = vcvt.s32.f32 %v1013_v4  ;;  %v628_v12 = vunpack.c.3.s8 %v172_v26  ;;  %v2177_v17 = vmul.f32 %v3852_v9, %v1397_v5  ;;  %v174_v26 = vld [vmem:[#allocation2 + $0x2c0] sm:$0xff] }
 0x27d   :  { %3208 = vmatpush1.bf16.msra.mxu1 %v2766_v7  ;;  %v2958_v14 = vpack.c.bf16 %v2556_v6, %v2554_v63  ;;  %v2559_v18 = vmul.f32 %v3852_v9, %v1779_v8  ;;  %v1010_v13 = vunpack.c.2.s8 %v268_v33  ;;  %v1394_v22 = vcvt.s32.f32 %v626_v10 }
 0x27e   :  { %v2561_v20 = vmul.f32 %v3852_v9, %v1781_v11  ;;  %v1396_v23 = vcvt.s32.f32 %v628_v12  ;;  %v1012_v24 = vunpack.c.3.s8 %v268_v33  ;;  %v2769_v27 = vpack.c.bf16 %v2177_v17, %v2175_v49  ;;  %v270_v33 = vld [vmem:[#allocation2 + $0x5c0] sm:$0xff]  ;;  %v177_v17 = vld [vmem:[#allocation2 + $0x2d8] sm:$0xff] }
 0x27f   :  { %3454 = vmatpush1.bf16.msra.mxu0 %v2958_v14  ;;  %v1778_v21 = vcvt.s32.f32 %v1010_v13  ;;  %v631_v28 = vunpack.c.0.s8 %v175_v15  ;;  %v633_v19 = vunpack.c.1.s8 %v175_v15  ;;  %v2174_v31 = vmul.f32 %v3856_v16, %v1394_v22 }
 0x280   :  { %v2961_v29 = vpack.c.bf16 %v2561_v20, %v2559_v18  ;;  %v2176_v30 = vmul.f32 %v3856_v16, %v1396_v23  ;;  %v1780_v32 = vcvt.s32.f32 %v1012_v24  ;;  %3209 = vmatprep.subr.bf16.mxu1 %v2769_v27  ;;  %v1015_v34 = vunpack.c.0.s8 %v271_v25  ;;  %v273_v27 = vld [vmem:[#allocation2 + $0x5d8] sm:$0xff] }
 0x281   :  { %v2558_v35 = vmul.f32 %v3856_v16, %v1778_v21  ;;  %v1399_v36 = vcvt.s32.f32 %v631_v28  ;;  %v1401_v38 = vcvt.s32.f32 %v633_v19  ;;  %v1017_v41 = vunpack.c.1.s8 %v271_v25 }
 0x282   :  { %3455 = vmatprep.subr.bf16.mxu0 %v2961_v29  ;;  %v2768_v37 = vpack.c.bf16 %v2176_v30, %v2174_v31  ;;  %v2560_v39 = vmul.f32 %v3856_v16, %v1780_v32  ;;  %v630_v43 = vunpack.c.0.s8 %v174_v26  ;;  %v1783_v40 = vcvt.s32.f32 %v1015_v34 }
 0x283   :  { %v2179_v46 = vmul.f32 %v3852_v9, %v1399_v36  ;;  %v2181_v44 = vmul.f32 %v3852_v9, %v1401_v38  ;;  %v632_v45 = vunpack.c.1.s8 %v174_v26  ;;  %v1785_v50 = vcvt.s32.f32 %v1017_v41 }
 0x284   :  { %3210 = vmatpush1.bf16.msra.mxu1 %v2768_v37  ;;  %v2960_v48 = vpack.c.bf16 %v2560_v39, %v2558_v35  ;;  %v1398_v51 = vcvt.s32.f32 %v630_v43  ;;  %v1014_v47 = vunpack.c.0.s8 %v270_v33  ;;  %v2563_v53 = vmul.f32 %v3852_v9, %v1783_v40 }
 0x285   :  { %v2771_v42 = vpack.c.bf16 %v2181_v44, %v2179_v46  ;;  %v1400_v52 = vcvt.s32.f32 %v632_v45  ;;  %v1016_v54 = vunpack.c.1.s8 %v270_v33  ;;  %v2565_v55 = vmul.f32 %v3852_v9, %v1785_v50 }
 0x286   :  { %3456 = vmatpush1.bf16.msra.mxu0 %v2960_v48  ;;  %v2178_v56 = vmul.f32 %v3856_v16, %v1398_v51  ;;  %v1782_v57 = vcvt.s32.f32 %v1014_v47  ;;  %v635_v58 = vunpack.c.2.s8 %v175_v15  ;;  %v637_v62 = vunpack.c.3.s8 %v175_v15 }
 0x287   :  { %3211 = vmatprep.subr.bf16.mxu1 %v2771_v42  ;;  %v2180_v59 = vmul.f32 %v3856_v16, %v1400_v52  ;;  %v1784_v61 = vcvt.s32.f32 %v1016_v54  ;;  %v1019_v60 = vunpack.c.2.s8 %v271_v25  ;;  %v2963_v63 = vpack.c.bf16 %v2565_v55, %v2563_v53 }
 0x288   :  { %v2562_v0 = vmul.f32 %v3856_v16, %v1782_v57  ;;  %v1403_v4 = vcvt.s32.f32 %v635_v58  ;;  %v1021_v7 = vunpack.c.3.s8 %v271_v25  ;;  %v1405_v8 = vcvt.s32.f32 %v637_v62 }
 0x289   :  { %v2770_v6 = vpack.c.bf16 %v2180_v59, %v2178_v56  ;;  %v2564_v5 = vmul.f32 %v3856_v16, %v1784_v61  ;;  %v1787_v49 = vcvt.s32.f32 %v1019_v60  ;;  %3457 = vmatprep.subr.bf16.mxu0 %v2963_v63  ;;  %v634_v12 = vunpack.c.2.s8 %v174_v26 }
 0x28a   :  { %v2183_v11 = vmul.f32 %v3852_v9, %v1403_v4  ;;  %v1789_v10 = vcvt.s32.f32 %v1021_v7  ;;  %v636_v14 = vunpack.c.3.s8 %v174_v26  ;;  %v2185_v18 = vmul.f32 %v3852_v9, %v1405_v8  ;;  %v176_v26 = vld [vmem:[#allocation2 + $0x2d0] sm:$0xff] }
 0x28b   :  { %3212 = vmatpush1.bf16.msra.mxu1 %v2770_v6  ;;  %v2962_v15 = vpack.c.bf16 %v2564_v5, %v2562_v0  ;;  %v2567_v13 = vmul.f32 %v3852_v9, %v1787_v49  ;;  %v1018_v20 = vunpack.c.2.s8 %v270_v33  ;;  %v1402_v23 = vcvt.s32.f32 %v634_v12 }
 0x28c   :  { %v2569_v22 = vmul.f32 %v3852_v9, %v1789_v10  ;;  %v1404_v24 = vcvt.s32.f32 %v636_v14  ;;  %v1020_v25 = vunpack.c.3.s8 %v270_v33  ;;  %v2773_v21 = vpack.c.bf16 %v2185_v18, %v2183_v11  ;;  %v272_v33 = vld [vmem:[#allocation2 + $0x5d0] sm:$0xff]  ;;  %v179_v18 = vld [vmem:[#allocation2 + $0x2e8] sm:$0xff] }
 0x28d   :  { %3458 = vmatpush1.bf16.msra.mxu0 %v2962_v15  ;;  %v1786_v28 = vcvt.s32.f32 %v1018_v20  ;;  %v639_v19 = vunpack.c.0.s8 %v177_v17  ;;  %v641_v29 = vunpack.c.1.s8 %v177_v17  ;;  %v2182_v30 = vmul.f32 %v3856_v16, %v1402_v23 }
 0x28e   :  { %v2965_v31 = vpack.c.bf16 %v2569_v22, %v2567_v13  ;;  %v2184_v32 = vmul.f32 %v3856_v16, %v1404_v24  ;;  %v1788_v35 = vcvt.s32.f32 %v1020_v25  ;;  %3213 = vmatprep.subr.bf16.mxu1 %v2773_v21  ;;  %v1023_v37 = vunpack.c.0.s8 %v273_v27  ;;  %v275_v21 = vld [vmem:[#allocation2 + $0x5e8] sm:$0xff] }
 0x28f   :  { %v2566_v36 = vmul.f32 %v3856_v16, %v1786_v28  ;;  %v1407_v38 = vcvt.s32.f32 %v639_v19  ;;  %v1409_v34 = vcvt.s32.f32 %v641_v29  ;;  %v1025_v43 = vunpack.c.1.s8 %v273_v27 }
 0x290   :  { %3459 = vmatprep.subr.bf16.mxu0 %v2965_v31  ;;  %v2772_v39 = vpack.c.bf16 %v2184_v32, %v2182_v30  ;;  %v2568_v41 = vmul.f32 %v3856_v16, %v1788_v35  ;;  %v638_v46 = vunpack.c.0.s8 %v176_v26  ;;  %v1791_v45 = vcvt.s32.f32 %v1023_v37 }
 0x291   :  { %v2187_v44 = vmul.f32 %v3852_v9, %v1407_v38  ;;  %v2189_v40 = vmul.f32 %v3852_v9, %v1409_v34  ;;  %v640_v48 = vunpack.c.1.s8 %v176_v26  ;;  %v1793_v51 = vcvt.s32.f32 %v1025_v43 }
 0x292   :  { %3214 = vmatpush1.bf16.msra.mxu1 %v2772_v39  ;;  %v2964_v50 = vpack.c.bf16 %v2568_v41, %v2566_v36  ;;  %v1406_v47 = vcvt.s32.f32 %v638_v46  ;;  %v1022_v42 = vunpack.c.0.s8 %v272_v33  ;;  %v2571_v52 = vmul.f32 %v3852_v9, %v1791_v45 }
 0x293   :  { %v2775_v53 = vpack.c.bf16 %v2189_v40, %v2187_v44  ;;  %v1408_v54 = vcvt.s32.f32 %v640_v48  ;;  %v1024_v55 = vunpack.c.1.s8 %v272_v33  ;;  %v2573_v56 = vmul.f32 %v3852_v9, %v1793_v51 }
 0x294   :  { %3460 = vmatpush1.bf16.msra.mxu0 %v2964_v50  ;;  %v2186_v57 = vmul.f32 %v3856_v16, %v1406_v47  ;;  %v1790_v58 = vcvt.s32.f32 %v1022_v42  ;;  %v643_v59 = vunpack.c.2.s8 %v177_v17  ;;  %v645_v60 = vunpack.c.3.s8 %v177_v17 }
 0x295   :  { %3215 = vmatprep.subr.bf16.mxu1 %v2775_v53  ;;  %v2188_v61 = vmul.f32 %v3856_v16, %v1408_v54  ;;  %v1792_v62 = vcvt.s32.f32 %v1024_v55  ;;  %v1027_v63 = vunpack.c.2.s8 %v273_v27  ;;  %v2967_v0 = vpack.c.bf16 %v2573_v56, %v2571_v52 }
 0x296   :  { %v2570_v4 = vmul.f32 %v3856_v16, %v1790_v58  ;;  %v1411_v7 = vcvt.s32.f32 %v643_v59  ;;  %v1029_v6 = vunpack.c.3.s8 %v273_v27  ;;  %v1413_v49 = vcvt.s32.f32 %v645_v60 }
 0x297   :  { %v2774_v5 = vpack.c.bf16 %v2188_v61, %v2186_v57  ;;  %v2572_v8 = vmul.f32 %v3856_v16, %v1792_v62  ;;  %v1795_v11 = vcvt.s32.f32 %v1027_v63  ;;  %3461 = vmatprep.subr.bf16.mxu0 %v2967_v0  ;;  %v642_v14 = vunpack.c.2.s8 %v176_v26 }
 0x298   :  { %v2191_v10 = vmul.f32 %v3852_v9, %v1411_v7  ;;  %v1797_v12 = vcvt.s32.f32 %v1029_v6  ;;  %v644_v15 = vunpack.c.3.s8 %v176_v26  ;;  %v2193_v13 = vmul.f32 %v3852_v9, %v1413_v49  ;;  %v178_v26 = vld [vmem:[#allocation2 + $0x2e0] sm:$0xff] }
 0x299   :  { %3216 = vmatpush1.bf16.msra.mxu1 %v2774_v5  ;;  %v2966_v17 = vpack.c.bf16 %v2572_v8, %v2570_v4  ;;  %v2575_v20 = vmul.f32 %v3852_v9, %v1795_v11  ;;  %v1026_v22 = vunpack.c.2.s8 %v272_v33  ;;  %v1410_v24 = vcvt.s32.f32 %v642_v14 }
 0x29a   :  { %v2577_v23 = vmul.f32 %v3852_v9, %v1797_v12  ;;  %v1412_v25 = vcvt.s32.f32 %v644_v15  ;;  %v1028_v27 = vunpack.c.3.s8 %v272_v33  ;;  %v2777_v28 = vpack.c.bf16 %v2193_v13, %v2191_v10  ;;  %v274_v33 = vld [vmem:[#allocation2 + $0x5e0] sm:$0xff]  ;;  %v181_v13 = vld [vmem:[#allocation2 + $0x2f8] sm:$0xff] }
 0x29b   :  { %3462 = vmatpush1.bf16.msra.mxu0 %v2966_v17  ;;  %v1794_v19 = vcvt.s32.f32 %v1026_v22  ;;  %v647_v29 = vunpack.c.0.s8 %v179_v18  ;;  %v649_v31 = vunpack.c.1.s8 %v179_v18  ;;  %v2190_v32 = vmul.f32 %v3856_v16, %v1410_v24 }
 0x29c   :  { %v2969_v30 = vpack.c.bf16 %v2577_v23, %v2575_v20  ;;  %v2192_v35 = vmul.f32 %v3856_v16, %v1412_v25  ;;  %v1796_v36 = vcvt.s32.f32 %v1028_v27  ;;  %3217 = vmatprep.subr.bf16.mxu1 %v2777_v28  ;;  %v1031_v39 = vunpack.c.0.s8 %v275_v21  ;;  %v277_v28 = vld [vmem:[#allocation2 + $0x5f8] sm:$0xff] }
 0x29d   :  { %v2574_v38 = vmul.f32 %v3856_v16, %v1794_v19  ;;  %v1415_v34 = vcvt.s32.f32 %v647_v29  ;;  %v1417_v37 = vcvt.s32.f32 %v649_v31  ;;  %v1033_v46 = vunpack.c.1.s8 %v275_v21 }
 0x29e   :  { %3463 = vmatprep.subr.bf16.mxu0 %v2969_v30  ;;  %v2776_v41 = vpack.c.bf16 %v2192_v35, %v2190_v32  ;;  %v2576_v43 = vmul.f32 %v3856_v16, %v1796_v36  ;;  %v646_v44 = vunpack.c.0.s8 %v178_v26  ;;  %v1799_v48 = vcvt.s32.f32 %v1031_v39 }
 0x29f   :  { %v2195_v40 = vmul.f32 %v3852_v9, %v1415_v34  ;;  %v2197_v45 = vmul.f32 %v3852_v9, %v1417_v37  ;;  %v648_v50 = vunpack.c.1.s8 %v178_v26  ;;  %v1801_v47 = vcvt.s32.f32 %v1033_v46 }
 0x2a0   :  { %3218 = vmatpush1.bf16.msra.mxu1 %v2776_v41  ;;  %v2968_v51 = vpack.c.bf16 %v2576_v43, %v2574_v38  ;;  %v1414_v42 = vcvt.s32.f32 %v646_v44  ;;  %v1030_v53 = vunpack.c.0.s8 %v274_v33  ;;  %v2579_v54 = vmul.f32 %v3852_v9, %v1799_v48 }
 0x2a1   :  { %v2779_v52 = vpack.c.bf16 %v2197_v45, %v2195_v40  ;;  %v1416_v55 = vcvt.s32.f32 %v648_v50  ;;  %v1032_v56 = vunpack.c.1.s8 %v274_v33  ;;  %v2581_v57 = vmul.f32 %v3852_v9, %v1801_v47 }
 0x2a2   :  { %3464 = vmatpush1.bf16.msra.mxu0 %v2968_v51  ;;  %v2194_v58 = vmul.f32 %v3856_v16, %v1414_v42  ;;  %v1798_v59 = vcvt.s32.f32 %v1030_v53  ;;  %v651_v61 = vunpack.c.2.s8 %v179_v18  ;;  %v653_v63 = vunpack.c.3.s8 %v179_v18 }
 0x2a3   :  { %3219 = vmatprep.subr.bf16.mxu1 %v2779_v52  ;;  %v2196_v62 = vmul.f32 %v3856_v16, %v1416_v55  ;;  %v1800_v60 = vcvt.s32.f32 %v1032_v56  ;;  %v1035_v0 = vunpack.c.2.s8 %v275_v21  ;;  %v2971_v4 = vpack.c.bf16 %v2581_v57, %v2579_v54 }
 0x2a4   :  { %v2578_v7 = vmul.f32 %v3856_v16, %v1798_v59  ;;  %v1419_v6 = vcvt.s32.f32 %v651_v61  ;;  %v1037_v5 = vunpack.c.3.s8 %v275_v21  ;;  %v1421_v11 = vcvt.s32.f32 %v653_v63 }
 0x2a5   :  { %v2778_v8 = vpack.c.bf16 %v2196_v62, %v2194_v58  ;;  %v2580_v49 = vmul.f32 %v3856_v16, %v1800_v60  ;;  %v1803_v10 = vcvt.s32.f32 %v1035_v0  ;;  %3465 = vmatprep.subr.bf16.mxu0 %v2971_v4  ;;  %v650_v15 = vunpack.c.2.s8 %v178_v26 }
 0x2a6   :  { %v2199_v12 = vmul.f32 %v3852_v9, %v1419_v6  ;;  %v1805_v14 = vcvt.s32.f32 %v1037_v5  ;;  %v652_v17 = vunpack.c.3.s8 %v178_v26  ;;  %v2201_v20 = vmul.f32 %v3852_v9, %v1421_v11  ;;  %v180_v26 = vld [vmem:[#allocation2 + $0x2f0] sm:$0xff] }
 0x2a7   :  { %3220 = vmatpush1.bf16.msra.mxu1 %v2778_v8  ;;  %v2970_v18 = vpack.c.bf16 %v2580_v49, %v2578_v7  ;;  %v2583_v22 = vmul.f32 %v3852_v9, %v1803_v10  ;;  %v1034_v23 = vunpack.c.2.s8 %v274_v33  ;;  %v1418_v25 = vcvt.s32.f32 %v650_v15 }
 0x2a8   :  { %v2585_v24 = vmul.f32 %v3852_v9, %v1805_v14  ;;  %v1420_v27 = vcvt.s32.f32 %v652_v17  ;;  %v1036_v21 = vunpack.c.3.s8 %v274_v33  ;;  %v2781_v19 = vpack.c.bf16 %v2201_v20, %v2199_v12  ;;  %v276_v33 = vld [vmem:[#allocation2 + $0x5f0] sm:$0xff]  ;;  %v61_v20 = vld [vmem:[%s5035_s0 + $0xb8] sm:$0xff] }
 0x2a9   :  { %3466 = vmatpush1.bf16.msra.mxu0 %v2970_v18  ;;  %v1802_v29 = vcvt.s32.f32 %v1034_v23  ;;  %v655_v31 = vunpack.c.0.s8 %v181_v13  ;;  %v657_v30 = vunpack.c.1.s8 %v181_v13  ;;  %v2198_v35 = vmul.f32 %v3856_v16, %v1418_v25 }
 0x2aa   :  { %v2973_v32 = vpack.c.bf16 %v2585_v24, %v2583_v22  ;;  %v2200_v36 = vmul.f32 %v3856_v16, %v1420_v27  ;;  %v1804_v38 = vcvt.s32.f32 %v1036_v21  ;;  %3221 = vmatprep.subr.bf16.mxu1 %v2781_v19  ;;  %v1039_v41 = vunpack.c.0.s8 %v277_v28 }
 0x2ab   :  { %v2582_v34 = vmul.f32 %v3856_v16, %v1802_v29  ;;  %v1423_v37 = vcvt.s32.f32 %v655_v31  ;;  %v1425_v39 = vcvt.s32.f32 %v657_v30  ;;  %v1041_v44 = vunpack.c.1.s8 %v277_v28 }
 0x2ac   :  { %3467 = vmatprep.subr.bf16.mxu0 %v2973_v32  ;;  %v2780_v43 = vpack.c.bf16 %v2200_v36, %v2198_v35  ;;  %v2584_v46 = vmul.f32 %v3856_v16, %v1804_v38  ;;  %v654_v40 = vunpack.c.0.s8 %v180_v26  ;;  %v1807_v50 = vcvt.s32.f32 %v1039_v41 }
 0x2ad   :  { %v2203_v45 = vmul.f32 %v3852_v9, %v1423_v37  ;;  %v2205_v48 = vmul.f32 %v3852_v9, %v1425_v39  ;;  %v656_v51 = vunpack.c.1.s8 %v180_v26  ;;  %v1809_v42 = vcvt.s32.f32 %v1041_v44  ;;  %v3753_v37 = vld [vmem:[%s5039_s4 + $0x40] sm:$0xff]  }
 0x2ae   :  { %3222 = vmatpush1.bf16.msra.mxu1 %v2780_v43  ;;  %v2972_v47 = vpack.c.bf16 %v2584_v46, %v2582_v34  ;;  %v1422_v53 = vcvt.s32.f32 %v654_v40  ;;  %v1038_v52 = vunpack.c.0.s8 %v276_v33  ;;  %v2587_v55 = vmul.f32 %v3852_v9, %v1807_v50  ;;  %v48_v34 = vld [vmem:[%s5035_s0 + $0x50] sm:$0xff]  ;;  %v3754_v44 = vld [vmem:[%s5039_s4] sm:$0xff]  }
 0x2af   :  { %v2783_v54 = vpack.c.bf16 %v2205_v48, %v2203_v45  ;;  %v1424_v56 = vcvt.s32.f32 %v656_v51  ;;  %v1040_v57 = vunpack.c.1.s8 %v276_v33  ;;  %v2589_v58 = vmul.f32 %v3852_v9, %v1809_v42  ;;  %v3755_v45 = vld [vmem:[%s5039_s4 + $0x48] sm:$0xff]   ;;  %v3757_v48 = vld [vmem:[%s5039_s4 + $0x50] sm:$0xff]   ;;  %v3759_v51 = vld [vmem:[%s5039_s4 + $0x58] sm:$0xff]  }
 0x2b0   :  { %3468 = vmatpush1.bf16.msra.mxu0 %v2972_v47  ;;  %v2202_v59 = vmul.f32 %v3856_v16, %v1422_v53  ;;  %v1806_v61 = vcvt.s32.f32 %v1038_v52  ;;  %v659_v62 = vunpack.c.2.s8 %v181_v13  ;;  %v661_v0 = vunpack.c.3.s8 %v181_v13  ;;  %v49_v13 = vld [vmem:[%s5035_s0 + $0x58] sm:$0xff]  ;;  %v3758_v50 = vld [vmem:[%s5039_s4 + $0x10] sm:$0xff]   ;;  %v3761_v42 = vld [vmem:[%s5039_s4 + $0x60] sm:$0xff]  }
 0x2b1   :  { %3223 = vmatprep.subr.bf16.mxu1 %v2783_v54  ;;  %v2204_v60 = vmul.f32 %v3856_v16, %v1424_v56  ;;  %v1808_v63 = vcvt.s32.f32 %v1040_v57  ;;  %v1043_v4 = vunpack.c.2.s8 %v277_v28  ;;  %v2975_v7 = vpack.c.bf16 %v2589_v58, %v2587_v55  ;;  %v3760_v47 = vld [vmem:[%s5039_s4 + $0x18] sm:$0xff]   ;;  %v3762_v53 = vld [vmem:[%s5039_s4 + $0x20] sm:$0xff]   ;;  %v3763_v52 = vld [vmem:[%s5039_s4 + $0x68] sm:$0xff]  }
 0x2b2   :  { %v2586_v6 = vmul.f32 %v3856_v16, %v1806_v61  ;;  %v1427_v5 = vcvt.s32.f32 %v659_v62  ;;  %v1045_v8 = vunpack.c.3.s8 %v277_v28  ;;  %v1429_v10 = vcvt.s32.f32 %v661_v0  ;;  %v3764_v54 = vld [vmem:[%s5039_s4 + $0x28] sm:$0xff]   ;;  %v3765_v55 = vld [vmem:[%s5039_s4 + $0x70] sm:$0xff]   ;;  %v3767_v57 = vld [vmem:[%s5039_s4 + $0x78] sm:$0xff]  }
 0x2b3   :  { %v2782_v49 = vpack.c.bf16 %v2204_v60, %v2202_v59  ;;  %v2588_v11 = vmul.f32 %v3856_v16, %v1808_v63  ;;  %v1811_v12 = vcvt.s32.f32 %v1043_v4  ;;  %3469 = vmatprep.subr.bf16.mxu0 %v2975_v7  ;;  %v658_v17 = vunpack.c.2.s8 %v180_v26  ;;  %v3766_v56 = vld [vmem:[%s5039_s4 + $0x30] sm:$0xff]   ;;  %v3768_v58 = vld [vmem:[%s5039_s4 + $0x38] sm:$0xff]   ;;  %v2978_v59 = vld [vmem:[%s5038_s3] sm:$0x3] }
 0x2b4   :  { %v2207_v14 = vmul.f32 %v3852_v9, %v1427_v5  ;;  %v1813_v15 = vcvt.s32.f32 %v1045_v8  ;;  %v660_v18 = vunpack.c.3.s8 %v180_v26  ;;  %v2209_v23 = vmul.f32 %v3852_v9, %v1429_v10 }
 0x2b5   :  { %3224 = vmatpush1.bf16.msra.mxu1 %v2782_v49  ;;  %v2974_v22 = vpack.c.bf16 %v2588_v11, %v2586_v6  ;;  %v2591_v24 = vmul.f32 %v3852_v9, %v1811_v12  ;;  %v1042_v25 = vunpack.c.2.s8 %v276_v33  ;;  %v1426_v21 = vcvt.s32.f32 %v658_v17 }
 0x2b6   :  { %v2593_v27 = vmul.f32 %v3852_v9, %v1813_v15  ;;  %v1428_v28 = vcvt.s32.f32 %v660_v18  ;;  %v1044_v19 = vunpack.c.3.s8 %v276_v33  ;;  %v2785_v29 = vpack.c.bf16 %v2209_v23, %v2207_v14  ;;  %v60_v33 = vld [vmem:[%s5035_s0 + $0xb0] sm:$0xff] }
 0x2b7   :  { %3470 = vmatpush1.bf16.msra.mxu0 %v2974_v22  ;;  %v1810_v31 = vcvt.s32.f32 %v1042_v25  ;;  %v73_v30 = vpack.c.bf16 %v49_v13, %v49_v13  ;;  %v85_v26 = vpack.c.bf16 %v61_v20, %v61_v20  ;;  %v2206_v35 = vmul.f32 %v3856_v16, %v1426_v21 }
 0x2b8   :  { %v2977_v32 = vpack.c.bf16 %v2593_v27, %v2591_v24  ;;  %v2208_v36 = vmul.f32 %v3856_v16, %v1428_v28  ;;  %v1812_v38 = vcvt.s32.f32 %v1044_v19  ;;  %3225 = vmatprep.subr.bf16.mxu1 %v2785_v29  ;;  %v72_v43 = vpack.c.bf16 %v48_v34, %v48_v34 }
 0x2b9   :  { %v2590_v9 = vmul.f32 %v3856_v16, %v1810_v31  ;;  %3227 = vmatprep.mubr.bf16.mxu1 %v73_v30  ;;  %3473 = vmatprep.mubr.bf16.mxu0 %v85_v26  ;;  %v84_v40 = vpack.c.bf16 %v60_v33, %v60_v33  ;;  %v2983_v61 = vrot.slane %v2978_v59, %v1818_v3 }
 0x2ba   :  { %3471 = vmatprep.subr.bf16.mxu0 %v2977_v32  ;;  %v2784_v39 = vpack.c.bf16 %v2208_v36, %v2206_v35  ;;  %v2592_v41 = vmul.f32 %v3856_v16, %v1812_v38  ;;  %v3756_v16 = vld [vmem:[%s5039_s4 + $0x8] sm:$0xff]   ;;  %v2987_v62 = vrot.slane %v2978_v59, %v1822_v2  ;;  %v3667_v2 = vld [vmem:[%s5040_s5] ss:$0 sm:$0xff] }
 0x2bc   :  { %3226 = vmatpush1.bf16.msra.mxu1 %v2784_v39  ;;  %v2976_v46 = vpack.c.bf16 %v2592_v41, %v2590_v9 }
 0x2bd   :  { %3684 = vmatprep.subr.bf16.mxu1 %v3753_v37 }
 0x2be   :  { %3472 = vmatpush1.bf16.msra.mxu0 %v2976_v46 }
 0x2bf   :  { %3228 = vmatmul.mubr.bf16.vlgmr.msra.gmra.mrb[0].mxu1 %v72_v43 }
 0x2c0   :  { %3685 = vmatpush3.bf16.msra.mxu1 %v3754_v44 }
 0x2c1   :  { %3474 = vmatmul.mubr.bf16.vlgmr.msra.gmra.mrb[0].mxu0 %v84_v40  ;;  %3686 = vmatprep.subr.bf16.mxu1 %v3755_v45 }
 0x2c4   :  { %3687 = vmatpush3.bf16.msra.mxu1 %v3756_v16 }
 0x2c5   :  { %3688 = vmatprep.subr.bf16.mxu1 %v3757_v48 }
 0x2c8   :  { %3689 = vmatpush3.bf16.msra.mxu1 %v3758_v50 }
 0x2c9   :  { %3690 = vmatprep.subr.bf16.mxu1 %v3759_v51 }
 0x2cc   :  { %3691 = vmatpush3.bf16.msra.mxu1 %v3760_v47 }
 0x2cd   :  { %3692 = vmatprep.subr.bf16.mxu1 %v3761_v42 }
 0x2d0   :  { %3693 = vmatpush3.bf16.msra.mxu1 %v3762_v53 }
 0x2d1   :  { %3694 = vmatprep.subr.bf16.mxu1 %v3763_v52 }
 0x2d4   :  { %3695 = vmatpush3.bf16.msra.mxu1 %v3764_v54 }
 0x2d5   :  { %3696 = vmatprep.subr.bf16.mxu1 %v3765_v55 }
 0x2d8   :  { %3697 = vmatpush3.bf16.msra.mxu1 %v3766_v56 }
 0x2d9   :  { %3698 = vmatprep.subr.bf16.mxu1 %v3767_v57 }
 0x2dc   :  { %3699 = vmatpush3.bf16.msra.mxu1 %v3768_v58 }
 0x392   :  { %v3229_v60 = vpop.f32.mrb[0].mxu1 }
 0x393   :  { %v3706_v63 = vadd.f32 %v3229_v60, %v2983_v61  ;;  %v3231_v0 = vpop.f32.mrb[1].mxu1 }
 0x394   :  { %v3475_v4 = vpop.f32.mrb[0].mxu0  ;;  %v3708_v7 = vadd.f32 %v3231_v0, %v2987_v62  ;;  %v3233_v6 = vpop.f32.mrb[2].mxu1 }
 0x395   :  { %v3707_v5 = vadd.f32 %v3706_v63, %v3475_v4  ;;  %v3477_v8 = vpop.f32.mrb[1].mxu0  ;;  %v3234_v49 = vpop.f32.mrb[3].mxu1 }
 0x396   :  { %v3709_v11 = vadd.f32 %v3708_v7, %v3477_v8  ;;  %v3479_v10 = vpop.f32.mrb[2].mxu0 }
 0x397   :  { %v3482_v12 = vmax.f32 %v3707_v5, 0.0  ;;  %v3480_v14 = vpop.f32.mrb[3].mxu0 }
 0x398   :  { %v3483_v15 = vmax.f32 %v3709_v11, 0.0 }
 0x399   :  { %v3484_v18 = vpack.c.bf16 %v3482_v12, %v3482_v12 }
 0x39a   :  { %v3485_v17 = vpack.c.bf16 %v3483_v15, %v3483_v15 }
 0x39c   :  { %3653 = vmatprep.mubr.bf16.mxu1 %v3485_v17 }
 0x39d   :  { %3654 = vmatmul.mubr.bf16.vlgmr.msra.gmra.mrb[4].mxu1 %v3484_v18 }
 0x470   :  { %v3700_v1 = vpop.f32.mrb[4].mxu1 }
 0x471   :  { %v3701_v3 = vpop.f32.mrb[5].mxu1 }
 0x472   :  { %v3702_v13 = vadd.f32 %v3701_v3, %v3700_v1  ;;  %v3703_v20 = vpop.f32.mrb[6].mxu1 }
 0x473   :  { %v3704_v22 = vpop.f32.mrb[7].mxu1 }
 0x474   :  { %v3656_v23 = vadd.f32 %v3702_v13, %v3667_v2 }
 0x476   :  { %3661 = vst [vmem:[%s5041_s6] sm:$0xff] %v3656_v23 }
 0x477   :  { %3666 = vsyncpa [#allocation3], 1 }

</bundles_post_ra>
